<compile_context>
chip_gen: v7x
topology: tpu7x:2x2x1
jax: 0.10.0
libtpu: 0.0.40
codegen_flags: <defaults>
</compile_context>

<pallas_src>
import functools

import jax
import jax.numpy as jnp
import numpy as np
from jax.experimental import pallas as pl


# ----------------------------------------------------------------------------
# Fused kernel: conv features (loop-invariant) + NS-step recurrence, one launch.
# ----------------------------------------------------------------------------
def _geoman_spatial_attention_kernel(
        # inputs
        local_all_ref, global_all_ref,
        a_local_ref, m_local_ref, b2_local_ref,
        a_global_ref, m_global_ref, b2_global_ref,
        wq_cat_ref, bq_cat_ref, v_l_ref, v_g_ref,
        w_cell_ref, b_cell_ref,
        sum_l_ref, sum_g_ref,
        dist_ref, la_init_ref, ga_init_ref,
        # outputs
        out_h_ref, out_la_ref, out_ga_ref,
        *, lamda, n_steps, B, L, S, T, H):
    f32 = jnp.float32

    # ---- loop-invariant work (done once per kernel invocation) -----------------
    # Folded convolutions -> lane-dense conv features f2l: [B, T*L], f2g: [B, T*S].
    f2l = jnp.dot(a_local_ref[...], m_local_ref[...],
                  preferred_element_type=f32) + b2_local_ref[...]
    f2g = jnp.dot(a_global_ref[...], m_global_ref[...],
                  preferred_element_type=f32) + b2_global_ref[...]

    wq_cat = wq_cat_ref[...]            # [H, 2T]
    bq_cat = bq_cat_ref[...]            # [1, 2T]
    v_l = v_l_ref[...]                  # [1, T]
    v_g = v_g_ref[...]                  # [1, T]
    w_cell = w_cell_ref[...]            # [L+S+H, H]
    b_cell = b_cell_ref[...]            # [1, H]
    sum_l = sum_l_ref[...]              # [T*L, L]
    sum_g = sum_g_ref[...]              # [T*S, S]
    dist_mix = lamda * dist_ref[...]    # [B, S]  (lamda * distmat, hoisted)
    local_all = local_all_ref[...]      # [B, NS*L]
    global_all = global_all_ref[...]    # [B, NS*S]

    one_m_lamda = 1.0 - lamda
    state = jnp.zeros((B, H), f32)
    la = la_init_ref[...]               # [B, L]
    ga = ga_init_ref[...]               # [B, S]

    h_steps, la_steps, ga_steps = [], [], []

    # ---- recurrence: fully unrolled, no per-step grid/pipeline overhead --------
    for t in range(n_steps):
        # gate raw inputs with previous attention weights
        lx = la * local_all[:, t * L:(t + 1) * L]          # [B, L]
        gx = ga * global_all[:, t * S:(t + 1) * S]         # [B, S]

        # merged tanh-RNN cell: one MXU dot on the stacked weights
        x_cat = jnp.concatenate([lx, gx, state], axis=1)   # [B, L+S+H]
        state = jnp.tanh(
            jnp.dot(x_cat, w_cell, preferred_element_type=f32) + b_cell)
        h_steps.append(state)

        # merged query projection for both attention branches: [B, 2T]
        yy = jnp.dot(state, wq_cat, preferred_element_type=f32) + bq_cat

        # ---- local spatial attention (lane-dense 2-D score) ----
        acc_l = v_l[:, 0:1] * jnp.tanh(f2l + yy[:, 0:1])
        for j in range(1, T):
            acc_l = acc_l + v_l[:, j:j + 1] * jnp.tanh(f2l + yy[:, j:j + 1])
        s_l = jnp.dot(acc_l, sum_l, preferred_element_type=f32)     # [B, L]
        m_l = jnp.max(s_l, axis=1, keepdims=True)
        e_l = jnp.exp(s_l - m_l)
        # exact normalization (approx reciprocal compounded error over the recurrence)
        la = e_l / jnp.sum(e_l, axis=1, keepdims=True)
        la_steps.append(la)

        # ---- global spatial attention ----
        acc_g = v_g[:, 0:1] * jnp.tanh(f2g + yy[:, T:T + 1])
        for j in range(1, T):
            acc_g = acc_g + v_g[:, j:j + 1] * jnp.tanh(f2g + yy[:, T + j:T + j + 1])
        s_g = one_m_lamda * jnp.dot(acc_g, sum_g,
                                    preferred_element_type=f32) + dist_mix   # [B, S]
        m_g = jnp.max(s_g, axis=1, keepdims=True)
        e_g = jnp.exp(s_g - m_g)
        ga = e_g / jnp.sum(e_g, axis=1, keepdims=True)
        ga_steps.append(ga)

    # ---- single lane-dense writeback --------------------------------------
    out_h_ref[...] = jnp.concatenate(h_steps, axis=1)     # [B, NS*H]
    out_la_ref[...] = jnp.concatenate(la_steps, axis=1)   # [B, NS*L]
    out_ga_ref[...] = jnp.concatenate(ga_steps, axis=1)   # [B, NS*S]


# ----------------------------------------------------------------------------
# Wrapper: layout glue + parameter restructuring (all loop-invariant, done once)
# ----------------------------------------------------------------------------
@functools.partial(jax.jit, static_argnames=("lamda",))
def spatial_attention_forward(params, local_inputs, global_inputs,
                              local_attention_states, global_attention_states,
                              distmat, *, lamda):
    B, L, T = local_attention_states.shape
    S = global_attention_states.shape[1]
    NS = local_inputs.shape[0]
    H = params["whh"].shape[0]
    f32 = jnp.float32

    # raw encoder inputs, lane-dense per batch row: [B, NS*L], [B, NS*S]
    local_all = jnp.transpose(local_inputs, (1, 0, 2)).reshape(B, NS * L)
    global_all = jnp.transpose(global_inputs, (1, 0, 2)).reshape(B, NS * S)

    # flattened attention states (pure row-major reinterpretation, same as torch .view)
    a_local = local_attention_states.reshape(B, T * L)           # A[b, c*L+l]
    a_global = global_attention_states.reshape(B, T * S * L)     # A[b, c*S*L+s*L+l]

    # Fold the 1x1 conv into M_l so that  f2l = a_local @ M_l + b2_l  gives
    #   f2l[b, o*L+l] = sum_c W_l[o,c] * hidden[b,c,l] + b_l[o]
    W_l = params["conv_local_w"]                                  # [T(out), T(in)]
    m_local = (W_l.T[:, None, :, None]
               * jnp.eye(L, dtype=f32)[None, :, None, :]).reshape(T * L, T * L)
    b2_local = jnp.repeat(params["conv_local_b"], L).reshape(1, T * L)

    # Fold the (1, L) conv into M_g so that  f2g = a_global @ M_g + b2_g  gives
    #   f2g[b, o*S+s] = sum_{c,l} Wg[o,c,0,l] * hidden[b,c,s,l] + b_g[o]
    Wg3 = params["conv_global_w"][:, :, 0, :]                     # [o, c, l]
    m_global = (jnp.transpose(Wg3, (1, 2, 0))[:, None, :, :, None]
                * jnp.eye(S, dtype=f32)[None, :, None, None, :]
                ).reshape(T * S * L, T * S)
    b2_global = jnp.repeat(params["conv_global_b"], S).reshape(1, T * S)

    # merged query projections and merged RNN-cell weights (one MXU dot each per step)
    wq_cat = jnp.concatenate([params["wq_l"], params["wq_g"]], axis=1)       # [H, 2T]
    bq_cat = jnp.concatenate([params["bq_l"], params["bq_g"]]).reshape(1, 2 * T)
    w_cell = jnp.concatenate([params["wih"], params["whh"]], axis=0)         # [L+S+H, H]
    b_cell = params["b_cell"].reshape(1, H)

    # tiled-identity matrices summing over the T conv output channels via one MXU dot
    sum_l = jnp.tile(jnp.eye(L, dtype=f32), (T, 1))               # [T*L, L]
    sum_g = jnp.tile(jnp.eye(S, dtype=f32), (T, 1))               # [T*S, S]

    kernel = functools.partial(_geoman_spatial_attention_kernel,
                               lamda=float(lamda), n_steps=NS,
                               B=B, L=L, S=S, T=T, H=H)
    out_h, out_la, out_ga = pl.pallas_call(
        kernel,
        out_shape=(jax.ShapeDtypeStruct((B, NS * H), f32),
                   jax.ShapeDtypeStruct((B, NS * L), f32),
                   jax.ShapeDtypeStruct((B, NS * S), f32)),
    )(local_all, global_all,
      a_local, m_local, b2_local,
      a_global, m_global, b2_global,
      wq_cat, bq_cat,
      params["v_l"].reshape(1, T), params["v_g"].reshape(1, T),
      w_cell, b_cell, sum_l, sum_g,
      distmat, params["la_init"], params["ga_init"])

    outputs = out_h.reshape(B, NS, H).transpose(1, 0, 2)          # [NS, B, H]
    la_w = out_la.reshape(B, NS, L).transpose(1, 0, 2)            # [NS, B, L]
    ga_w = out_ga.reshape(B, NS, S).transpose(1, 0, 2)            # [NS, B, S]
    return outputs, outputs[-1], (la_w, ga_w)


# ----------------------------------------------------------------------------
# Pure-JAX reference (mirrors the PyTorch forward exactly, same cell choice)
# ----------------------------------------------------------------------------
def reference_forward(params, local_inputs, global_inputs,
                      local_attention_states, global_attention_states,
                      distmat, lamda):
    B, L, T = local_attention_states.shape
    S = global_attention_states.shape[1]
    NS = local_inputs.shape[0]
    H = params["whh"].shape[0]
    local_hidden = local_attention_states.reshape(B, T, L)
    global_hidden = global_attention_states.reshape(B, T, S, L)
    fl = jnp.einsum("oc,bcl->bol", params["conv_local_w"], local_hidden) \
        + params["conv_local_b"][None, :, None]
    Wg3 = params["conv_global_w"][:, :, 0, :]
    fg = jnp.einsum("ocl,bcsl->bos", Wg3, global_hidden) \
        + params["conv_global_b"][None, :, None]
    wih_l, wih_g = params["wih"][:L], params["wih"][L:]
    state = jnp.zeros((B, H), jnp.float32)
    la, ga = params["la_init"], params["ga_init"]
    outs, lws, gws = [], [], []
    for t in range(NS):
        lx = la * local_inputs[t]
        gx = ga * global_inputs[t]
        state = jnp.tanh(lx @ wih_l + gx @ wih_g + state @ params["whh"] + params["b_cell"])
        outs.append(state)
        y = state @ params["wq_l"] + params["bq_l"]
        z = jnp.tanh(fl[:, :, :, None] + y[:, None, None, :])
        s = jnp.sum(params["v_l"] * z, axis=(1, 3))
        la = jax.nn.softmax(s, axis=1)
        yg = state @ params["wq_g"] + params["bq_g"]
        zg = jnp.tanh(fg[:, :, :, None] + yg[:, None, None, :])
        g = jnp.sum(params["v_g"] * zg, axis=(1, 3))
        g = (1.0 - lamda) * g + lamda * distmat
        ga = jax.nn.softmax(g, axis=1)
        lws.append(la)
        gws.append(ga)
    return jnp.stack(outs), state, (jnp.stack(lws), jnp.stack(gws))


if __name__ == "__main__":
    # config: batch=2, input_features=4 (L), input_len=8 (T), num_station=6 (S),
    # n_hidden_encoder=32 (H), n_steps=8, lamda=0.3
    B, L, T, S, H, NS = 2, 4, 8, 6, 32, 8
    LAMDA = 0.3

    key = jax.random.PRNGKey(0)
    ks = jax.random.split(key, 20)
    f32 = jnp.float32
    params = {
        "conv_local_w": 0.2 * jax.random.normal(ks[0], (T, T), f32),         # Conv2d(T,T,(1,1)) weight squeezed
        "conv_local_b": 0.1 * jax.random.normal(ks[1], (T,), f32),
        "wq_l": 0.2 * jax.random.normal(ks[2], (H, T), f32),                 # linear_local weight^T
        "bq_l": 0.1 * jax.random.normal(ks[3], (T,), f32),
        "v_l": jax.random.normal(ks[4], (T,), f32),                          # local_v ~ N(0,1)
        "conv_global_w": 0.2 * jax.random.normal(ks[5], (T, T, 1, L), f32),  # Conv2d(T,T,(1,L)) weight
        "conv_global_b": 0.1 * jax.random.normal(ks[6], (T,), f32),
        "wq_g": 0.2 * jax.random.normal(ks[7], (H, T), f32),                 # linear_global weight^T
        "bq_g": 0.1 * jax.random.normal(ks[8], (T,), f32),
        "v_g": jax.random.normal(ks[9], (T,), f32),                          # global_v ~ N(0,1)
        "wih": 0.2 * jax.random.normal(ks[10], (L + S, H), f32),             # tanh RNN cell input weight
        "whh": 0.2 * jax.random.normal(ks[11], (H, H), f32),                 # tanh RNN cell hidden weight
        "b_cell": 0.1 * jax.random.normal(ks[12], (H,), f32),
        # deterministic replacement for the xavier_uniform_ initial attention weights
        "la_init": jax.random.uniform(ks[13], (B, L), f32, minval=-0.5, maxval=0.5),
        "ga_init": jax.random.uniform(ks[14], (B, S), f32, minval=-0.5, maxval=0.5),
    }

    local_inputs = jax.random.normal(ks[15], (NS, B, L), f32)                # list of [B, L] per step
    global_inputs = jax.random.normal(ks[16], (NS, B, S), f32)               # list of [B, S] per step
    local_attention_states = jax.random.normal(ks[17], (B, L, T), f32)
    global_attention_states = jax.random.normal(ks[18], (B, S, L, T), f32)
    distmat = jax.random.normal(ks[19], (B, S), f32)

    outputs, state, (la_w, ga_w) = spatial_attention_forward(
        params, local_inputs, global_inputs,
        local_attention_states, global_attention_states, distmat, lamda=LAMDA)
    jax.block_until_ready((outputs, state, la_w, ga_w))

    ref_out, ref_state, (ref_la, ref_ga) = reference_forward(
        params, local_inputs, global_inputs,
        local_attention_states, global_attention_states, distmat, LAMDA)
    np.testing.assert_allclose(np.asarray(outputs), np.asarray(ref_out), rtol=3e-3, atol=3e-3)
    np.testing.assert_allclose(np.asarray(state), np.asarray(ref_state), rtol=3e-3, atol=3e-3)
    np.testing.assert_allclose(np.asarray(la_w), np.asarray(ref_la), rtol=3e-3, atol=3e-3)
    np.testing.assert_allclose(np.asarray(ga_w), np.asarray(ref_ga), rtol=3e-3, atol=3e-3)

    print("KERNEL_OK")
</pallas_src>

<mosaic_0001>
module attributes {stable_mosaic.version = 11 : i64} {
  func.func @_geoman_spatial_attention_kernel(%arg0: memref<2x32xf32, #tpu.memory_space<vmem>>, %arg1: memref<2x48xf32, #tpu.memory_space<vmem>>, %arg2: memref<2x32xf32, #tpu.memory_space<vmem>>, %arg3: memref<32x32xf32, #tpu.memory_space<vmem>>, %arg4: memref<1x32xf32, #tpu.memory_space<vmem>>, %arg5: memref<2x192xf32, #tpu.memory_space<vmem>>, %arg6: memref<192x48xf32, #tpu.memory_space<vmem>>, %arg7: memref<1x48xf32, #tpu.memory_space<vmem>>, %arg8: memref<32x16xf32, #tpu.memory_space<vmem>>, %arg9: memref<1x16xf32, #tpu.memory_space<vmem>>, %arg10: memref<1x8xf32, #tpu.memory_space<vmem>>, %arg11: memref<1x8xf32, #tpu.memory_space<vmem>>, %arg12: memref<42x32xf32, #tpu.memory_space<vmem>>, %arg13: memref<1x32xf32, #tpu.memory_space<vmem>>, %arg14: memref<32x4xf32, #tpu.memory_space<vmem>>, %arg15: memref<48x6xf32, #tpu.memory_space<vmem>>, %arg16: memref<2x6xf32, #tpu.memory_space<vmem>>, %arg17: memref<2x4xf32, #tpu.memory_space<vmem>>, %arg18: memref<2x6xf32, #tpu.memory_space<vmem>>, %arg19: memref<2x256xf32, #tpu.memory_space<vmem>>, %arg20: memref<2x32xf32, #tpu.memory_space<vmem>>, %arg21: memref<2x48xf32, #tpu.memory_space<vmem>>) attributes {dimension_semantics = [], scalar_prefetch = 0 : i64, scratch_operands = 0 : i64, tpu.core_type = #tpu.core_type<tc>} {
    %c0 = arith.constant 0 : index
    %c0_0 = arith.constant 0 : index
    %0 = vector.load %arg2[%c0, %c0_0] : memref<2x32xf32, #tpu.memory_space<vmem>>, vector<2x32xf32>
    %c0_1 = arith.constant 0 : index
    %c0_2 = arith.constant 0 : index
    %1 = vector.load %arg3[%c0_1, %c0_2] : memref<32x32xf32, #tpu.memory_space<vmem>>, vector<32x32xf32>
    %cst = arith.constant dense<0.000000e+00> : vector<2x32xf32>
    %2 = tpu.matmul %0, %1, %cst {dimension_numbers = #tpu.dot_dimension_numbers<[1], [0], [0], [1], [0, 0, 1, 1], [], []>} : vector<2x32xf32>, vector<32x32xf32>, vector<2x32xf32> -> vector<2x32xf32>
    %c0_3 = arith.constant 0 : index
    %c0_4 = arith.constant 0 : index
    %3 = vector.load %arg4[%c0_3, %c0_4] : memref<1x32xf32, #tpu.memory_space<vmem>>, vector<1x32xf32>
    %4 = vector.broadcast %3 : vector<1x32xf32> to vector<2x32xf32>
    %5 = arith.addf %2, %4 : vector<2x32xf32>
    %c0_5 = arith.constant 0 : index
    %c0_6 = arith.constant 0 : index
    %6 = vector.load %arg5[%c0_5, %c0_6] : memref<2x192xf32, #tpu.memory_space<vmem>>, vector<2x192xf32>
    %c0_7 = arith.constant 0 : index
    %c0_8 = arith.constant 0 : index
    %7 = vector.load %arg6[%c0_7, %c0_8] : memref<192x48xf32, #tpu.memory_space<vmem>>, vector<192x48xf32>
    %cst_9 = arith.constant dense<0.000000e+00> : vector<2x48xf32>
    %8 = tpu.matmul %6, %7, %cst_9 {dimension_numbers = #tpu.dot_dimension_numbers<[1], [0], [0], [1], [0, 0, 1, 1], [], []>} : vector<2x192xf32>, vector<192x48xf32>, vector<2x48xf32> -> vector<2x48xf32>
    %c0_10 = arith.constant 0 : index
    %c0_11 = arith.constant 0 : index
    %9 = vector.load %arg7[%c0_10, %c0_11] : memref<1x48xf32, #tpu.memory_space<vmem>>, vector<1x48xf32>
    %10 = vector.broadcast %9 : vector<1x48xf32> to vector<2x48xf32>
    %11 = arith.addf %8, %10 : vector<2x48xf32>
    %c0_12 = arith.constant 0 : index
    %c0_13 = arith.constant 0 : index
    %12 = vector.load %arg8[%c0_12, %c0_13] : memref<32x16xf32, #tpu.memory_space<vmem>>, vector<32x16xf32>
    %c0_14 = arith.constant 0 : index
    %c0_15 = arith.constant 0 : index
    %13 = vector.load %arg9[%c0_14, %c0_15] : memref<1x16xf32, #tpu.memory_space<vmem>>, vector<1x16xf32>
    %c0_16 = arith.constant 0 : index
    %c0_17 = arith.constant 0 : index
    %14 = vector.load %arg10[%c0_16, %c0_17] : memref<1x8xf32, #tpu.memory_space<vmem>>, vector<1x8xf32>
    %c0_18 = arith.constant 0 : index
    %c0_19 = arith.constant 0 : index
    %15 = vector.load %arg11[%c0_18, %c0_19] : memref<1x8xf32, #tpu.memory_space<vmem>>, vector<1x8xf32>
    %c0_20 = arith.constant 0 : index
    %c0_21 = arith.constant 0 : index
    %16 = vector.load %arg12[%c0_20, %c0_21] : memref<42x32xf32, #tpu.memory_space<vmem>>, vector<42x32xf32>
    %c0_22 = arith.constant 0 : index
    %c0_23 = arith.constant 0 : index
    %17 = vector.load %arg13[%c0_22, %c0_23] : memref<1x32xf32, #tpu.memory_space<vmem>>, vector<1x32xf32>
    %c0_24 = arith.constant 0 : index
    %c0_25 = arith.constant 0 : index
    %18 = vector.load %arg14[%c0_24, %c0_25] : memref<32x4xf32, #tpu.memory_space<vmem>>, vector<32x4xf32>
    %c0_26 = arith.constant 0 : index
    %c0_27 = arith.constant 0 : index
    %19 = vector.load %arg15[%c0_26, %c0_27] : memref<48x6xf32, #tpu.memory_space<vmem>>, vector<48x6xf32>
    %c0_28 = arith.constant 0 : index
    %c0_29 = arith.constant 0 : index
    %20 = vector.load %arg16[%c0_28, %c0_29] : memref<2x6xf32, #tpu.memory_space<vmem>>, vector<2x6xf32>
    %cst_30 = arith.constant 3.000000e-01 : f32
    %21 = vector.broadcast %cst_30 : f32 to vector<2x6xf32>
    %22 = arith.mulf %21, %20 : vector<2x6xf32>
    %c0_31 = arith.constant 0 : index
    %c0_32 = arith.constant 0 : index
    %23 = vector.load %arg0[%c0_31, %c0_32] : memref<2x32xf32, #tpu.memory_space<vmem>>, vector<2x32xf32>
    %c0_33 = arith.constant 0 : index
    %c0_34 = arith.constant 0 : index
    %24 = vector.load %arg1[%c0_33, %c0_34] : memref<2x48xf32, #tpu.memory_space<vmem>>, vector<2x48xf32>
    %cst_35 = arith.constant 0.000000e+00 : f32
    %25 = vector.broadcast %cst_35 : f32 to vector<2x32xf32>
    %c0_36 = arith.constant 0 : index
    %c0_37 = arith.constant 0 : index
    %26 = vector.load %arg17[%c0_36, %c0_37] : memref<2x4xf32, #tpu.memory_space<vmem>>, vector<2x4xf32>
    %c0_38 = arith.constant 0 : index
    %c0_39 = arith.constant 0 : index
    %27 = vector.load %arg18[%c0_38, %c0_39] : memref<2x6xf32, #tpu.memory_space<vmem>>, vector<2x6xf32>
    %28 = vector.extract_strided_slice %23 {offsets = [0, 0], sizes = [2, 4], strides = [1, 1]} : vector<2x32xf32> to vector<2x4xf32>
    %29 = arith.mulf %26, %28 : vector<2x4xf32>
    %30 = vector.extract_strided_slice %24 {offsets = [0, 0], sizes = [2, 6], strides = [1, 1]} : vector<2x48xf32> to vector<2x6xf32>
    %31 = arith.mulf %27, %30 : vector<2x6xf32>
    %32 = tpu.concatenate %29, %31, %25 in 1 : vector<2x4xf32>, vector<2x6xf32>, vector<2x32xf32> -> vector<2x42xf32>
    %cst_40 = arith.constant dense<0.000000e+00> : vector<2x32xf32>
    %33 = tpu.matmul %32, %16, %cst_40 {dimension_numbers = #tpu.dot_dimension_numbers<[1], [0], [0], [1], [0, 0, 1, 1], [], []>} : vector<2x42xf32>, vector<42x32xf32>, vector<2x32xf32> -> vector<2x32xf32>
    %34 = vector.broadcast %17 : vector<1x32xf32> to vector<2x32xf32>
    %35 = arith.addf %33, %34 : vector<2x32xf32>
    %36 = math.tanh %35 : vector<2x32xf32>
    %cst_41 = arith.constant dense<0.000000e+00> : vector<2x16xf32>
    %37 = tpu.matmul %36, %12, %cst_41 {dimension_numbers = #tpu.dot_dimension_numbers<[1], [0], [0], [1], [0, 0, 1, 1], [], []>} : vector<2x32xf32>, vector<32x16xf32>, vector<2x16xf32> -> vector<2x16xf32>
    %38 = vector.broadcast %13 : vector<1x16xf32> to vector<2x16xf32>
    %39 = arith.addf %37, %38 : vector<2x16xf32>
    %40 = vector.extract_strided_slice %14 {offsets = [0, 0], sizes = [1, 1], strides = [1, 1]} : vector<1x8xf32> to vector<1x1xf32>
    %41 = vector.extract_strided_slice %39 {offsets = [0, 0], sizes = [2, 1], strides = [1, 1]} : vector<2x16xf32> to vector<2x1xf32>
    %42 = vector.broadcast %41 : vector<2x1xf32> to vector<2x32xf32>
    %43 = arith.addf %5, %42 : vector<2x32xf32>
    %44 = math.tanh %43 : vector<2x32xf32>
    %45 = vector.broadcast %40 : vector<1x1xf32> to vector<2x32xf32>
    %46 = arith.mulf %45, %44 : vector<2x32xf32>
    %47 = vector.extract_strided_slice %14 {offsets = [0, 1], sizes = [1, 1], strides = [1, 1]} : vector<1x8xf32> to vector<1x1xf32>
    %48 = vector.extract_strided_slice %39 {offsets = [0, 1], sizes = [2, 1], strides = [1, 1]} : vector<2x16xf32> to vector<2x1xf32>
    %49 = vector.broadcast %48 : vector<2x1xf32> to vector<2x32xf32>
    %50 = arith.addf %5, %49 : vector<2x32xf32>
    %51 = math.tanh %50 : vector<2x32xf32>
    %52 = vector.broadcast %47 : vector<1x1xf32> to vector<2x32xf32>
    %53 = arith.mulf %52, %51 : vector<2x32xf32>
    %54 = arith.addf %46, %53 : vector<2x32xf32>
    %55 = vector.extract_strided_slice %14 {offsets = [0, 2], sizes = [1, 1], strides = [1, 1]} : vector<1x8xf32> to vector<1x1xf32>
    %56 = vector.extract_strided_slice %39 {offsets = [0, 2], sizes = [2, 1], strides = [1, 1]} : vector<2x16xf32> to vector<2x1xf32>
    %57 = vector.broadcast %56 : vector<2x1xf32> to vector<2x32xf32>
    %58 = arith.addf %5, %57 : vector<2x32xf32>
    %59 = math.tanh %58 : vector<2x32xf32>
    %60 = vector.broadcast %55 : vector<1x1xf32> to vector<2x32xf32>
    %61 = arith.mulf %60, %59 : vector<2x32xf32>
    %62 = arith.addf %54, %61 : vector<2x32xf32>
    %63 = vector.extract_strided_slice %14 {offsets = [0, 3], sizes = [1, 1], strides = [1, 1]} : vector<1x8xf32> to vector<1x1xf32>
    %64 = vector.extract_strided_slice %39 {offsets = [0, 3], sizes = [2, 1], strides = [1, 1]} : vector<2x16xf32> to vector<2x1xf32>
    %65 = vector.broadcast %64 : vector<2x1xf32> to vector<2x32xf32>
    %66 = arith.addf %5, %65 : vector<2x32xf32>
    %67 = math.tanh %66 : vector<2x32xf32>
    %68 = vector.broadcast %63 : vector<1x1xf32> to vector<2x32xf32>
    %69 = arith.mulf %68, %67 : vector<2x32xf32>
    %70 = arith.addf %62, %69 : vector<2x32xf32>
    %71 = vector.extract_strided_slice %14 {offsets = [0, 4], sizes = [1, 1], strides = [1, 1]} : vector<1x8xf32> to vector<1x1xf32>
    %72 = vector.extract_strided_slice %39 {offsets = [0, 4], sizes = [2, 1], strides = [1, 1]} : vector<2x16xf32> to vector<2x1xf32>
    %73 = vector.broadcast %72 : vector<2x1xf32> to vector<2x32xf32>
    %74 = arith.addf %5, %73 : vector<2x32xf32>
    %75 = math.tanh %74 : vector<2x32xf32>
    %76 = vector.broadcast %71 : vector<1x1xf32> to vector<2x32xf32>
    %77 = arith.mulf %76, %75 : vector<2x32xf32>
    %78 = arith.addf %70, %77 : vector<2x32xf32>
    %79 = vector.extract_strided_slice %14 {offsets = [0, 5], sizes = [1, 1], strides = [1, 1]} : vector<1x8xf32> to vector<1x1xf32>
    %80 = vector.extract_strided_slice %39 {offsets = [0, 5], sizes = [2, 1], strides = [1, 1]} : vector<2x16xf32> to vector<2x1xf32>
    %81 = vector.broadcast %80 : vector<2x1xf32> to vector<2x32xf32>
    %82 = arith.addf %5, %81 : vector<2x32xf32>
    %83 = math.tanh %82 : vector<2x32xf32>
    %84 = vector.broadcast %79 : vector<1x1xf32> to vector<2x32xf32>
    %85 = arith.mulf %84, %83 : vector<2x32xf32>
    %86 = arith.addf %78, %85 : vector<2x32xf32>
    %87 = vector.extract_strided_slice %14 {offsets = [0, 6], sizes = [1, 1], strides = [1, 1]} : vector<1x8xf32> to vector<1x1xf32>
    %88 = vector.extract_strided_slice %39 {offsets = [0, 6], sizes = [2, 1], strides = [1, 1]} : vector<2x16xf32> to vector<2x1xf32>
    %89 = vector.broadcast %88 : vector<2x1xf32> to vector<2x32xf32>
    %90 = arith.addf %5, %89 : vector<2x32xf32>
    %91 = math.tanh %90 : vector<2x32xf32>
    %92 = vector.broadcast %87 : vector<1x1xf32> to vector<2x32xf32>
    %93 = arith.mulf %92, %91 : vector<2x32xf32>
    %94 = arith.addf %86, %93 : vector<2x32xf32>
    %95 = vector.extract_strided_slice %14 {offsets = [0, 7], sizes = [1, 1], strides = [1, 1]} : vector<1x8xf32> to vector<1x1xf32>
    %96 = vector.extract_strided_slice %39 {offsets = [0, 7], sizes = [2, 1], strides = [1, 1]} : vector<2x16xf32> to vector<2x1xf32>
    %97 = vector.broadcast %96 : vector<2x1xf32> to vector<2x32xf32>
    %98 = arith.addf %5, %97 : vector<2x32xf32>
    %99 = math.tanh %98 : vector<2x32xf32>
    %100 = vector.broadcast %95 : vector<1x1xf32> to vector<2x32xf32>
    %101 = arith.mulf %100, %99 : vector<2x32xf32>
    %102 = arith.addf %94, %101 : vector<2x32xf32>
    %cst_42 = arith.constant dense<0.000000e+00> : vector<2x4xf32>
    %103 = tpu.matmul %102, %18, %cst_42 {dimension_numbers = #tpu.dot_dimension_numbers<[1], [0], [0], [1], [0, 0, 1, 1], [], []>} : vector<2x32xf32>, vector<32x4xf32>, vector<2x4xf32> -> vector<2x4xf32>
    %cst_43 = arith.constant dense<0xFF800000> : vector<2xf32>
    %104 = vector.multi_reduction <maximumf>, %103, %cst_43 [1] : vector<2x4xf32> to vector<2xf32>
    %105 = vector.shape_cast %104 : vector<2xf32> to vector<2x1xf32>
    %106 = vector.broadcast %105 : vector<2x1xf32> to vector<2x4xf32>
    %107 = arith.subf %103, %106 : vector<2x4xf32>
    %108 = math.exp %107 : vector<2x4xf32>
    %cst_44 = arith.constant dense<0.000000e+00> : vector<2xf32>
    %109 = vector.multi_reduction <add>, %108, %cst_44 [1] : vector<2x4xf32> to vector<2xf32>
    %110 = vector.shape_cast %109 : vector<2xf32> to vector<2x1xf32>
    %111 = vector.broadcast %110 : vector<2x1xf32> to vector<2x4xf32>
    %112 = arith.divf %108, %111 : vector<2x4xf32>
    %113 = vector.extract_strided_slice %15 {offsets = [0, 0], sizes = [1, 1], strides = [1, 1]} : vector<1x8xf32> to vector<1x1xf32>
    %114 = vector.extract_strided_slice %39 {offsets = [0, 8], sizes = [2, 1], strides = [1, 1]} : vector<2x16xf32> to vector<2x1xf32>
    %115 = vector.broadcast %114 : vector<2x1xf32> to vector<2x48xf32>
    %116 = arith.addf %11, %115 : vector<2x48xf32>
    %117 = math.tanh %116 : vector<2x48xf32>
    %118 = vector.broadcast %113 : vector<1x1xf32> to vector<2x48xf32>
    %119 = arith.mulf %118, %117 : vector<2x48xf32>
    %120 = vector.extract_strided_slice %15 {offsets = [0, 1], sizes = [1, 1], strides = [1, 1]} : vector<1x8xf32> to vector<1x1xf32>
    %121 = vector.extract_strided_slice %39 {offsets = [0, 9], sizes = [2, 1], strides = [1, 1]} : vector<2x16xf32> to vector<2x1xf32>
    %122 = vector.broadcast %121 : vector<2x1xf32> to vector<2x48xf32>
    %123 = arith.addf %11, %122 : vector<2x48xf32>
    %124 = math.tanh %123 : vector<2x48xf32>
    %125 = vector.broadcast %120 : vector<1x1xf32> to vector<2x48xf32>
    %126 = arith.mulf %125, %124 : vector<2x48xf32>
    %127 = arith.addf %119, %126 : vector<2x48xf32>
    %128 = vector.extract_strided_slice %15 {offsets = [0, 2], sizes = [1, 1], strides = [1, 1]} : vector<1x8xf32> to vector<1x1xf32>
    %129 = vector.extract_strided_slice %39 {offsets = [0, 10], sizes = [2, 1], strides = [1, 1]} : vector<2x16xf32> to vector<2x1xf32>
    %130 = vector.broadcast %129 : vector<2x1xf32> to vector<2x48xf32>
    %131 = arith.addf %11, %130 : vector<2x48xf32>
    %132 = math.tanh %131 : vector<2x48xf32>
    %133 = vector.broadcast %128 : vector<1x1xf32> to vector<2x48xf32>
    %134 = arith.mulf %133, %132 : vector<2x48xf32>
    %135 = arith.addf %127, %134 : vector<2x48xf32>
    %136 = vector.extract_strided_slice %15 {offsets = [0, 3], sizes = [1, 1], strides = [1, 1]} : vector<1x8xf32> to vector<1x1xf32>
    %137 = vector.extract_strided_slice %39 {offsets = [0, 11], sizes = [2, 1], strides = [1, 1]} : vector<2x16xf32> to vector<2x1xf32>
    %138 = vector.broadcast %137 : vector<2x1xf32> to vector<2x48xf32>
    %139 = arith.addf %11, %138 : vector<2x48xf32>
    %140 = math.tanh %139 : vector<2x48xf32>
    %141 = vector.broadcast %136 : vector<1x1xf32> to vector<2x48xf32>
    %142 = arith.mulf %141, %140 : vector<2x48xf32>
    %143 = arith.addf %135, %142 : vector<2x48xf32>
    %144 = vector.extract_strided_slice %15 {offsets = [0, 4], sizes = [1, 1], strides = [1, 1]} : vector<1x8xf32> to vector<1x1xf32>
    %145 = vector.extract_strided_slice %39 {offsets = [0, 12], sizes = [2, 1], strides = [1, 1]} : vector<2x16xf32> to vector<2x1xf32>
    %146 = vector.broadcast %145 : vector<2x1xf32> to vector<2x48xf32>
    %147 = arith.addf %11, %146 : vector<2x48xf32>
    %148 = math.tanh %147 : vector<2x48xf32>
    %149 = vector.broadcast %144 : vector<1x1xf32> to vector<2x48xf32>
    %150 = arith.mulf %149, %148 : vector<2x48xf32>
    %151 = arith.addf %143, %150 : vector<2x48xf32>
    %152 = vector.extract_strided_slice %15 {offsets = [0, 5], sizes = [1, 1], strides = [1, 1]} : vector<1x8xf32> to vector<1x1xf32>
    %153 = vector.extract_strided_slice %39 {offsets = [0, 13], sizes = [2, 1], strides = [1, 1]} : vector<2x16xf32> to vector<2x1xf32>
    %154 = vector.broadcast %153 : vector<2x1xf32> to vector<2x48xf32>
    %155 = arith.addf %11, %154 : vector<2x48xf32>
    %156 = math.tanh %155 : vector<2x48xf32>
    %157 = vector.broadcast %152 : vector<1x1xf32> to vector<2x48xf32>
    %158 = arith.mulf %157, %156 : vector<2x48xf32>
    %159 = arith.addf %151, %158 : vector<2x48xf32>
    %160 = vector.extract_strided_slice %15 {offsets = [0, 6], sizes = [1, 1], strides = [1, 1]} : vector<1x8xf32> to vector<1x1xf32>
    %161 = vector.extract_strided_slice %39 {offsets = [0, 14], sizes = [2, 1], strides = [1, 1]} : vector<2x16xf32> to vector<2x1xf32>
    %162 = vector.broadcast %161 : vector<2x1xf32> to vector<2x48xf32>
    %163 = arith.addf %11, %162 : vector<2x48xf32>
    %164 = math.tanh %163 : vector<2x48xf32>
    %165 = vector.broadcast %160 : vector<1x1xf32> to vector<2x48xf32>
    %166 = arith.mulf %165, %164 : vector<2x48xf32>
    %167 = arith.addf %159, %166 : vector<2x48xf32>
    %168 = vector.extract_strided_slice %15 {offsets = [0, 7], sizes = [1, 1], strides = [1, 1]} : vector<1x8xf32> to vector<1x1xf32>
    %169 = vector.extract_strided_slice %39 {offsets = [0, 15], sizes = [2, 1], strides = [1, 1]} : vector<2x16xf32> to vector<2x1xf32>
    %170 = vector.broadcast %169 : vector<2x1xf32> to vector<2x48xf32>
    %171 = arith.addf %11, %170 : vector<2x48xf32>
    %172 = math.tanh %171 : vector<2x48xf32>
    %173 = vector.broadcast %168 : vector<1x1xf32> to vector<2x48xf32>
    %174 = arith.mulf %173, %172 : vector<2x48xf32>
    %175 = arith.addf %167, %174 : vector<2x48xf32>
    %cst_45 = arith.constant dense<0.000000e+00> : vector<2x6xf32>
    %176 = tpu.matmul %175, %19, %cst_45 {dimension_numbers = #tpu.dot_dimension_numbers<[1], [0], [0], [1], [0, 0, 1, 1], [], []>} : vector<2x48xf32>, vector<48x6xf32>, vector<2x6xf32> -> vector<2x6xf32>
    %cst_46 = arith.constant 0.699999988 : f32
    %177 = vector.broadcast %cst_46 : f32 to vector<2x6xf32>
    %178 = arith.mulf %177, %176 : vector<2x6xf32>
    %179 = arith.addf %178, %22 : vector<2x6xf32>
    %cst_47 = arith.constant dense<0xFF800000> : vector<2xf32>
    %180 = vector.multi_reduction <maximumf>, %179, %cst_47 [1] : vector<2x6xf32> to vector<2xf32>
    %181 = vector.shape_cast %180 : vector<2xf32> to vector<2x1xf32>
    %182 = vector.broadcast %181 : vector<2x1xf32> to vector<2x6xf32>
    %183 = arith.subf %179, %182 : vector<2x6xf32>
    %184 = math.exp %183 : vector<2x6xf32>
    %cst_48 = arith.constant dense<0.000000e+00> : vector<2xf32>
    %185 = vector.multi_reduction <add>, %184, %cst_48 [1] : vector<2x6xf32> to vector<2xf32>
    %186 = vector.shape_cast %185 : vector<2xf32> to vector<2x1xf32>
    %187 = vector.broadcast %186 : vector<2x1xf32> to vector<2x6xf32>
    %188 = arith.divf %184, %187 : vector<2x6xf32>
    %189 = vector.extract_strided_slice %23 {offsets = [0, 4], sizes = [2, 4], strides = [1, 1]} : vector<2x32xf32> to vector<2x4xf32>
    %190 = arith.mulf %112, %189 : vector<2x4xf32>
    %191 = vector.extract_strided_slice %24 {offsets = [0, 6], sizes = [2, 6], strides = [1, 1]} : vector<2x48xf32> to vector<2x6xf32>
    %192 = arith.mulf %188, %191 : vector<2x6xf32>
    %193 = tpu.concatenate %190, %192, %36 in 1 : vector<2x4xf32>, vector<2x6xf32>, vector<2x32xf32> -> vector<2x42xf32>
    %cst_49 = arith.constant dense<0.000000e+00> : vector<2x32xf32>
    %194 = tpu.matmul %193, %16, %cst_49 {dimension_numbers = #tpu.dot_dimension_numbers<[1], [0], [0], [1], [0, 0, 1, 1], [], []>} : vector<2x42xf32>, vector<42x32xf32>, vector<2x32xf32> -> vector<2x32xf32>
    %195 = vector.broadcast %17 : vector<1x32xf32> to vector<2x32xf32>
    %196 = arith.addf %194, %195 : vector<2x32xf32>
    %197 = math.tanh %196 : vector<2x32xf32>
    %cst_50 = arith.constant dense<0.000000e+00> : vector<2x16xf32>
    %198 = tpu.matmul %197, %12, %cst_50 {dimension_numbers = #tpu.dot_dimension_numbers<[1], [0], [0], [1], [0, 0, 1, 1], [], []>} : vector<2x32xf32>, vector<32x16xf32>, vector<2x16xf32> -> vector<2x16xf32>
    %199 = vector.broadcast %13 : vector<1x16xf32> to vector<2x16xf32>
    %200 = arith.addf %198, %199 : vector<2x16xf32>
    %201 = vector.extract_strided_slice %14 {offsets = [0, 0], sizes = [1, 1], strides = [1, 1]} : vector<1x8xf32> to vector<1x1xf32>
    %202 = vector.extract_strided_slice %200 {offsets = [0, 0], sizes = [2, 1], strides = [1, 1]} : vector<2x16xf32> to vector<2x1xf32>
    %203 = vector.broadcast %202 : vector<2x1xf32> to vector<2x32xf32>
    %204 = arith.addf %5, %203 : vector<2x32xf32>
    %205 = math.tanh %204 : vector<2x32xf32>
    %206 = vector.broadcast %201 : vector<1x1xf32> to vector<2x32xf32>
    %207 = arith.mulf %206, %205 : vector<2x32xf32>
    %208 = vector.extract_strided_slice %14 {offsets = [0, 1], sizes = [1, 1], strides = [1, 1]} : vector<1x8xf32> to vector<1x1xf32>
    %209 = vector.extract_strided_slice %200 {offsets = [0, 1], sizes = [2, 1], strides = [1, 1]} : vector<2x16xf32> to vector<2x1xf32>
    %210 = vector.broadcast %209 : vector<2x1xf32> to vector<2x32xf32>
    %211 = arith.addf %5, %210 : vector<2x32xf32>
    %212 = math.tanh %211 : vector<2x32xf32>
    %213 = vector.broadcast %208 : vector<1x1xf32> to vector<2x32xf32>
    %214 = arith.mulf %213, %212 : vector<2x32xf32>
    %215 = arith.addf %207, %214 : vector<2x32xf32>
    %216 = vector.extract_strided_slice %14 {offsets = [0, 2], sizes = [1, 1], strides = [1, 1]} : vector<1x8xf32> to vector<1x1xf32>
    %217 = vector.extract_strided_slice %200 {offsets = [0, 2], sizes = [2, 1], strides = [1, 1]} : vector<2x16xf32> to vector<2x1xf32>
    %218 = vector.broadcast %217 : vector<2x1xf32> to vector<2x32xf32>
    %219 = arith.addf %5, %218 : vector<2x32xf32>
    %220 = math.tanh %219 : vector<2x32xf32>
    %221 = vector.broadcast %216 : vector<1x1xf32> to vector<2x32xf32>
    %222 = arith.mulf %221, %220 : vector<2x32xf32>
    %223 = arith.addf %215, %222 : vector<2x32xf32>
    %224 = vector.extract_strided_slice %14 {offsets = [0, 3], sizes = [1, 1], strides = [1, 1]} : vector<1x8xf32> to vector<1x1xf32>
    %225 = vector.extract_strided_slice %200 {offsets = [0, 3], sizes = [2, 1], strides = [1, 1]} : vector<2x16xf32> to vector<2x1xf32>
    %226 = vector.broadcast %225 : vector<2x1xf32> to vector<2x32xf32>
    %227 = arith.addf %5, %226 : vector<2x32xf32>
    %228 = math.tanh %227 : vector<2x32xf32>
    %229 = vector.broadcast %224 : vector<1x1xf32> to vector<2x32xf32>
    %230 = arith.mulf %229, %228 : vector<2x32xf32>
    %231 = arith.addf %223, %230 : vector<2x32xf32>
    %232 = vector.extract_strided_slice %14 {offsets = [0, 4], sizes = [1, 1], strides = [1, 1]} : vector<1x8xf32> to vector<1x1xf32>
    %233 = vector.extract_strided_slice %200 {offsets = [0, 4], sizes = [2, 1], strides = [1, 1]} : vector<2x16xf32> to vector<2x1xf32>
    %234 = vector.broadcast %233 : vector<2x1xf32> to vector<2x32xf32>
    %235 = arith.addf %5, %234 : vector<2x32xf32>
    %236 = math.tanh %235 : vector<2x32xf32>
    %237 = vector.broadcast %232 : vector<1x1xf32> to vector<2x32xf32>
    %238 = arith.mulf %237, %236 : vector<2x32xf32>
    %239 = arith.addf %231, %238 : vector<2x32xf32>
    %240 = vector.extract_strided_slice %14 {offsets = [0, 5], sizes = [1, 1], strides = [1, 1]} : vector<1x8xf32> to vector<1x1xf32>
    %241 = vector.extract_strided_slice %200 {offsets = [0, 5], sizes = [2, 1], strides = [1, 1]} : vector<2x16xf32> to vector<2x1xf32>
    %242 = vector.broadcast %241 : vector<2x1xf32> to vector<2x32xf32>
    %243 = arith.addf %5, %242 : vector<2x32xf32>
    %244 = math.tanh %243 : vector<2x32xf32>
    %245 = vector.broadcast %240 : vector<1x1xf32> to vector<2x32xf32>
    %246 = arith.mulf %245, %244 : vector<2x32xf32>
    %247 = arith.addf %239, %246 : vector<2x32xf32>
    %248 = vector.extract_strided_slice %14 {offsets = [0, 6], sizes = [1, 1], strides = [1, 1]} : vector<1x8xf32> to vector<1x1xf32>
    %249 = vector.extract_strided_slice %200 {offsets = [0, 6], sizes = [2, 1], strides = [1, 1]} : vector<2x16xf32> to vector<2x1xf32>
    %250 = vector.broadcast %249 : vector<2x1xf32> to vector<2x32xf32>
    %251 = arith.addf %5, %250 : vector<2x32xf32>
    %252 = math.tanh %251 : vector<2x32xf32>
    %253 = vector.broadcast %248 : vector<1x1xf32> to vector<2x32xf32>
    %254 = arith.mulf %253, %252 : vector<2x32xf32>
    %255 = arith.addf %247, %254 : vector<2x32xf32>
    %256 = vector.extract_strided_slice %14 {offsets = [0, 7], sizes = [1, 1], strides = [1, 1]} : vector<1x8xf32> to vector<1x1xf32>
    %257 = vector.extract_strided_slice %200 {offsets = [0, 7], sizes = [2, 1], strides = [1, 1]} : vector<2x16xf32> to vector<2x1xf32>
    %258 = vector.broadcast %257 : vector<2x1xf32> to vector<2x32xf32>
    %259 = arith.addf %5, %258 : vector<2x32xf32>
    %260 = math.tanh %259 : vector<2x32xf32>
    %261 = vector.broadcast %256 : vector<1x1xf32> to vector<2x32xf32>
    %262 = arith.mulf %261, %260 : vector<2x32xf32>
    %263 = arith.addf %255, %262 : vector<2x32xf32>
    %cst_51 = arith.constant dense<0.000000e+00> : vector<2x4xf32>
    %264 = tpu.matmul %263, %18, %cst_51 {dimension_numbers = #tpu.dot_dimension_numbers<[1], [0], [0], [1], [0, 0, 1, 1], [], []>} : vector<2x32xf32>, vector<32x4xf32>, vector<2x4xf32> -> vector<2x4xf32>
    %cst_52 = arith.constant dense<0xFF800000> : vector<2xf32>
    %265 = vector.multi_reduction <maximumf>, %264, %cst_52 [1] : vector<2x4xf32> to vector<2xf32>
    %266 = vector.shape_cast %265 : vector<2xf32> to vector<2x1xf32>
    %267 = vector.broadcast %266 : vector<2x1xf32> to vector<2x4xf32>
    %268 = arith.subf %264, %267 : vector<2x4xf32>
    %269 = math.exp %268 : vector<2x4xf32>
    %cst_53 = arith.constant dense<0.000000e+00> : vector<2xf32>
    %270 = vector.multi_reduction <add>, %269, %cst_53 [1] : vector<2x4xf32> to vector<2xf32>
    %271 = vector.shape_cast %270 : vector<2xf32> to vector<2x1xf32>
    %272 = vector.broadcast %271 : vector<2x1xf32> to vector<2x4xf32>
    %273 = arith.divf %269, %272 : vector<2x4xf32>
    %274 = vector.extract_strided_slice %15 {offsets = [0, 0], sizes = [1, 1], strides = [1, 1]} : vector<1x8xf32> to vector<1x1xf32>
    %275 = vector.extract_strided_slice %200 {offsets = [0, 8], sizes = [2, 1], strides = [1, 1]} : vector<2x16xf32> to vector<2x1xf32>
    %276 = vector.broadcast %275 : vector<2x1xf32> to vector<2x48xf32>
    %277 = arith.addf %11, %276 : vector<2x48xf32>
    %278 = math.tanh %277 : vector<2x48xf32>
    %279 = vector.broadcast %274 : vector<1x1xf32> to vector<2x48xf32>
    %280 = arith.mulf %279, %278 : vector<2x48xf32>
    %281 = vector.extract_strided_slice %15 {offsets = [0, 1], sizes = [1, 1], strides = [1, 1]} : vector<1x8xf32> to vector<1x1xf32>
    %282 = vector.extract_strided_slice %200 {offsets = [0, 9], sizes = [2, 1], strides = [1, 1]} : vector<2x16xf32> to vector<2x1xf32>
    %283 = vector.broadcast %282 : vector<2x1xf32> to vector<2x48xf32>
    %284 = arith.addf %11, %283 : vector<2x48xf32>
    %285 = math.tanh %284 : vector<2x48xf32>
    %286 = vector.broadcast %281 : vector<1x1xf32> to vector<2x48xf32>
    %287 = arith.mulf %286, %285 : vector<2x48xf32>
    %288 = arith.addf %280, %287 : vector<2x48xf32>
    %289 = vector.extract_strided_slice %15 {offsets = [0, 2], sizes = [1, 1], strides = [1, 1]} : vector<1x8xf32> to vector<1x1xf32>
    %290 = vector.extract_strided_slice %200 {offsets = [0, 10], sizes = [2, 1], strides = [1, 1]} : vector<2x16xf32> to vector<2x1xf32>
    %291 = vector.broadcast %290 : vector<2x1xf32> to vector<2x48xf32>
    %292 = arith.addf %11, %291 : vector<2x48xf32>
    %293 = math.tanh %292 : vector<2x48xf32>
    %294 = vector.broadcast %289 : vector<1x1xf32> to vector<2x48xf32>
    %295 = arith.mulf %294, %293 : vector<2x48xf32>
    %296 = arith.addf %288, %295 : vector<2x48xf32>
    %297 = vector.extract_strided_slice %15 {offsets = [0, 3], sizes = [1, 1], strides = [1, 1]} : vector<1x8xf32> to vector<1x1xf32>
    %298 = vector.extract_strided_slice %200 {offsets = [0, 11], sizes = [2, 1], strides = [1, 1]} : vector<2x16xf32> to vector<2x1xf32>
    %299 = vector.broadcast %298 : vector<2x1xf32> to vector<2x48xf32>
    %300 = arith.addf %11, %299 : vector<2x48xf32>
    %301 = math.tanh %300 : vector<2x48xf32>
    %302 = vector.broadcast %297 : vector<1x1xf32> to vector<2x48xf32>
    %303 = arith.mulf %302, %301 : vector<2x48xf32>
    %304 = arith.addf %296, %303 : vector<2x48xf32>
    %305 = vector.extract_strided_slice %15 {offsets = [0, 4], sizes = [1, 1], strides = [1, 1]} : vector<1x8xf32> to vector<1x1xf32>
    %306 = vector.extract_strided_slice %200 {offsets = [0, 12], sizes = [2, 1], strides = [1, 1]} : vector<2x16xf32> to vector<2x1xf32>
    %307 = vector.broadcast %306 : vector<2x1xf32> to vector<2x48xf32>
    %308 = arith.addf %11, %307 : vector<2x48xf32>
    %309 = math.tanh %308 : vector<2x48xf32>
    %310 = vector.broadcast %305 : vector<1x1xf32> to vector<2x48xf32>
    %311 = arith.mulf %310, %309 : vector<2x48xf32>
    %312 = arith.addf %304, %311 : vector<2x48xf32>
    %313 = vector.extract_strided_slice %15 {offsets = [0, 5], sizes = [1, 1], strides = [1, 1]} : vector<1x8xf32> to vector<1x1xf32>
    %314 = vector.extract_strided_slice %200 {offsets = [0, 13], sizes = [2, 1], strides = [1, 1]} : vector<2x16xf32> to vector<2x1xf32>
    %315 = vector.broadcast %314 : vector<2x1xf32> to vector<2x48xf32>
    %316 = arith.addf %11, %315 : vector<2x48xf32>
    %317 = math.tanh %316 : vector<2x48xf32>
    %318 = vector.broadcast %313 : vector<1x1xf32> to vector<2x48xf32>
    %319 = arith.mulf %318, %317 : vector<2x48xf32>
    %320 = arith.addf %312, %319 : vector<2x48xf32>
    %321 = vector.extract_strided_slice %15 {offsets = [0, 6], sizes = [1, 1], strides = [1, 1]} : vector<1x8xf32> to vector<1x1xf32>
    %322 = vector.extract_strided_slice %200 {offsets = [0, 14], sizes = [2, 1], strides = [1, 1]} : vector<2x16xf32> to vector<2x1xf32>
    %323 = vector.broadcast %322 : vector<2x1xf32> to vector<2x48xf32>
    %324 = arith.addf %11, %323 : vector<2x48xf32>
    %325 = math.tanh %324 : vector<2x48xf32>
    %326 = vector.broadcast %321 : vector<1x1xf32> to vector<2x48xf32>
    %327 = arith.mulf %326, %325 : vector<2x48xf32>
    %328 = arith.addf %320, %327 : vector<2x48xf32>
    %329 = vector.extract_strided_slice %15 {offsets = [0, 7], sizes = [1, 1], strides = [1, 1]} : vector<1x8xf32> to vector<1x1xf32>
    %330 = vector.extract_strided_slice %200 {offsets = [0, 15], sizes = [2, 1], strides = [1, 1]} : vector<2x16xf32> to vector<2x1xf32>
    %331 = vector.broadcast %330 : vector<2x1xf32> to vector<2x48xf32>
    %332 = arith.addf %11, %331 : vector<2x48xf32>
    %333 = math.tanh %332 : vector<2x48xf32>
    %334 = vector.broadcast %329 : vector<1x1xf32> to vector<2x48xf32>
    %335 = arith.mulf %334, %333 : vector<2x48xf32>
    %336 = arith.addf %328, %335 : vector<2x48xf32>
    %cst_54 = arith.constant dense<0.000000e+00> : vector<2x6xf32>
    %337 = tpu.matmul %336, %19, %cst_54 {dimension_numbers = #tpu.dot_dimension_numbers<[1], [0], [0], [1], [0, 0, 1, 1], [], []>} : vector<2x48xf32>, vector<48x6xf32>, vector<2x6xf32> -> vector<2x6xf32>
    %cst_55 = arith.constant 0.699999988 : f32
    %338 = vector.broadcast %cst_55 : f32 to vector<2x6xf32>
    %339 = arith.mulf %338, %337 : vector<2x6xf32>
    %340 = arith.addf %339, %22 : vector<2x6xf32>
    %cst_56 = arith.constant dense<0xFF800000> : vector<2xf32>
    %341 = vector.multi_reduction <maximumf>, %340, %cst_56 [1] : vector<2x6xf32> to vector<2xf32>
    %342 = vector.shape_cast %341 : vector<2xf32> to vector<2x1xf32>
    %343 = vector.broadcast %342 : vector<2x1xf32> to vector<2x6xf32>
    %344 = arith.subf %340, %343 : vector<2x6xf32>
    %345 = math.exp %344 : vector<2x6xf32>
    %cst_57 = arith.constant dense<0.000000e+00> : vector<2xf32>
    %346 = vector.multi_reduction <add>, %345, %cst_57 [1] : vector<2x6xf32> to vector<2xf32>
    %347 = vector.shape_cast %346 : vector<2xf32> to vector<2x1xf32>
    %348 = vector.broadcast %347 : vector<2x1xf32> to vector<2x6xf32>
    %349 = arith.divf %345, %348 : vector<2x6xf32>
    %350 = vector.extract_strided_slice %23 {offsets = [0, 8], sizes = [2, 4], strides = [1, 1]} : vector<2x32xf32> to vector<2x4xf32>
    %351 = arith.mulf %273, %350 : vector<2x4xf32>
    %352 = vector.extract_strided_slice %24 {offsets = [0, 12], sizes = [2, 6], strides = [1, 1]} : vector<2x48xf32> to vector<2x6xf32>
    %353 = arith.mulf %349, %352 : vector<2x6xf32>
    %354 = tpu.concatenate %351, %353, %197 in 1 : vector<2x4xf32>, vector<2x6xf32>, vector<2x32xf32> -> vector<2x42xf32>
    %cst_58 = arith.constant dense<0.000000e+00> : vector<2x32xf32>
    %355 = tpu.matmul %354, %16, %cst_58 {dimension_numbers = #tpu.dot_dimension_numbers<[1], [0], [0], [1], [0, 0, 1, 1], [], []>} : vector<2x42xf32>, vector<42x32xf32>, vector<2x32xf32> -> vector<2x32xf32>
    %356 = vector.broadcast %17 : vector<1x32xf32> to vector<2x32xf32>
    %357 = arith.addf %355, %356 : vector<2x32xf32>
    %358 = math.tanh %357 : vector<2x32xf32>
    %cst_59 = arith.constant dense<0.000000e+00> : vector<2x16xf32>
    %359 = tpu.matmul %358, %12, %cst_59 {dimension_numbers = #tpu.dot_dimension_numbers<[1], [0], [0], [1], [0, 0, 1, 1], [], []>} : vector<2x32xf32>, vector<32x16xf32>, vector<2x16xf32> -> vector<2x16xf32>
    %360 = vector.broadcast %13 : vector<1x16xf32> to vector<2x16xf32>
    %361 = arith.addf %359, %360 : vector<2x16xf32>
    %362 = vector.extract_strided_slice %14 {offsets = [0, 0], sizes = [1, 1], strides = [1, 1]} : vector<1x8xf32> to vector<1x1xf32>
    %363 = vector.extract_strided_slice %361 {offsets = [0, 0], sizes = [2, 1], strides = [1, 1]} : vector<2x16xf32> to vector<2x1xf32>
    %364 = vector.broadcast %363 : vector<2x1xf32> to vector<2x32xf32>
    %365 = arith.addf %5, %364 : vector<2x32xf32>
    %366 = math.tanh %365 : vector<2x32xf32>
    %367 = vector.broadcast %362 : vector<1x1xf32> to vector<2x32xf32>
    %368 = arith.mulf %367, %366 : vector<2x32xf32>
    %369 = vector.extract_strided_slice %14 {offsets = [0, 1], sizes = [1, 1], strides = [1, 1]} : vector<1x8xf32> to vector<1x1xf32>
    %370 = vector.extract_strided_slice %361 {offsets = [0, 1], sizes = [2, 1], strides = [1, 1]} : vector<2x16xf32> to vector<2x1xf32>
    %371 = vector.broadcast %370 : vector<2x1xf32> to vector<2x32xf32>
    %372 = arith.addf %5, %371 : vector<2x32xf32>
    %373 = math.tanh %372 : vector<2x32xf32>
    %374 = vector.broadcast %369 : vector<1x1xf32> to vector<2x32xf32>
    %375 = arith.mulf %374, %373 : vector<2x32xf32>
    %376 = arith.addf %368, %375 : vector<2x32xf32>
    %377 = vector.extract_strided_slice %14 {offsets = [0, 2], sizes = [1, 1], strides = [1, 1]} : vector<1x8xf32> to vector<1x1xf32>
    %378 = vector.extract_strided_slice %361 {offsets = [0, 2], sizes = [2, 1], strides = [1, 1]} : vector<2x16xf32> to vector<2x1xf32>
    %379 = vector.broadcast %378 : vector<2x1xf32> to vector<2x32xf32>
    %380 = arith.addf %5, %379 : vector<2x32xf32>
    %381 = math.tanh %380 : vector<2x32xf32>
    %382 = vector.broadcast %377 : vector<1x1xf32> to vector<2x32xf32>
    %383 = arith.mulf %382, %381 : vector<2x32xf32>
    %384 = arith.addf %376, %383 : vector<2x32xf32>
    %385 = vector.extract_strided_slice %14 {offsets = [0, 3], sizes = [1, 1], strides = [1, 1]} : vector<1x8xf32> to vector<1x1xf32>
    %386 = vector.extract_strided_slice %361 {offsets = [0, 3], sizes = [2, 1], strides = [1, 1]} : vector<2x16xf32> to vector<2x1xf32>
    %387 = vector.broadcast %386 : vector<2x1xf32> to vector<2x32xf32>
    %388 = arith.addf %5, %387 : vector<2x32xf32>
    %389 = math.tanh %388 : vector<2x32xf32>
    %390 = vector.broadcast %385 : vector<1x1xf32> to vector<2x32xf32>
    %391 = arith.mulf %390, %389 : vector<2x32xf32>
    %392 = arith.addf %384, %391 : vector<2x32xf32>
    %393 = vector.extract_strided_slice %14 {offsets = [0, 4], sizes = [1, 1], strides = [1, 1]} : vector<1x8xf32> to vector<1x1xf32>
    %394 = vector.extract_strided_slice %361 {offsets = [0, 4], sizes = [2, 1], strides = [1, 1]} : vector<2x16xf32> to vector<2x1xf32>
    %395 = vector.broadcast %394 : vector<2x1xf32> to vector<2x32xf32>
    %396 = arith.addf %5, %395 : vector<2x32xf32>
    %397 = math.tanh %396 : vector<2x32xf32>
    %398 = vector.broadcast %393 : vector<1x1xf32> to vector<2x32xf32>
    %399 = arith.mulf %398, %397 : vector<2x32xf32>
    %400 = arith.addf %392, %399 : vector<2x32xf32>
    %401 = vector.extract_strided_slice %14 {offsets = [0, 5], sizes = [1, 1], strides = [1, 1]} : vector<1x8xf32> to vector<1x1xf32>
    %402 = vector.extract_strided_slice %361 {offsets = [0, 5], sizes = [2, 1], strides = [1, 1]} : vector<2x16xf32> to vector<2x1xf32>
    %403 = vector.broadcast %402 : vector<2x1xf32> to vector<2x32xf32>
    %404 = arith.addf %5, %403 : vector<2x32xf32>
    %405 = math.tanh %404 : vector<2x32xf32>
    %406 = vector.broadcast %401 : vector<1x1xf32> to vector<2x32xf32>
    %407 = arith.mulf %406, %405 : vector<2x32xf32>
    %408 = arith.addf %400, %407 : vector<2x32xf32>
    %409 = vector.extract_strided_slice %14 {offsets = [0, 6], sizes = [1, 1], strides = [1, 1]} : vector<1x8xf32> to vector<1x1xf32>
    %410 = vector.extract_strided_slice %361 {offsets = [0, 6], sizes = [2, 1], strides = [1, 1]} : vector<2x16xf32> to vector<2x1xf32>
    %411 = vector.broadcast %410 : vector<2x1xf32> to vector<2x32xf32>
    %412 = arith.addf %5, %411 : vector<2x32xf32>
    %413 = math.tanh %412 : vector<2x32xf32>
    %414 = vector.broadcast %409 : vector<1x1xf32> to vector<2x32xf32>
    %415 = arith.mulf %414, %413 : vector<2x32xf32>
    %416 = arith.addf %408, %415 : vector<2x32xf32>
    %417 = vector.extract_strided_slice %14 {offsets = [0, 7], sizes = [1, 1], strides = [1, 1]} : vector<1x8xf32> to vector<1x1xf32>
    %418 = vector.extract_strided_slice %361 {offsets = [0, 7], sizes = [2, 1], strides = [1, 1]} : vector<2x16xf32> to vector<2x1xf32>
    %419 = vector.broadcast %418 : vector<2x1xf32> to vector<2x32xf32>
    %420 = arith.addf %5, %419 : vector<2x32xf32>
    %421 = math.tanh %420 : vector<2x32xf32>
    %422 = vector.broadcast %417 : vector<1x1xf32> to vector<2x32xf32>
    %423 = arith.mulf %422, %421 : vector<2x32xf32>
    %424 = arith.addf %416, %423 : vector<2x32xf32>
    %cst_60 = arith.constant dense<0.000000e+00> : vector<2x4xf32>
    %425 = tpu.matmul %424, %18, %cst_60 {dimension_numbers = #tpu.dot_dimension_numbers<[1], [0], [0], [1], [0, 0, 1, 1], [], []>} : vector<2x32xf32>, vector<32x4xf32>, vector<2x4xf32> -> vector<2x4xf32>
    %cst_61 = arith.constant dense<0xFF800000> : vector<2xf32>
    %426 = vector.multi_reduction <maximumf>, %425, %cst_61 [1] : vector<2x4xf32> to vector<2xf32>
    %427 = vector.shape_cast %426 : vector<2xf32> to vector<2x1xf32>
    %428 = vector.broadcast %427 : vector<2x1xf32> to vector<2x4xf32>
    %429 = arith.subf %425, %428 : vector<2x4xf32>
    %430 = math.exp %429 : vector<2x4xf32>
    %cst_62 = arith.constant dense<0.000000e+00> : vector<2xf32>
    %431 = vector.multi_reduction <add>, %430, %cst_62 [1] : vector<2x4xf32> to vector<2xf32>
    %432 = vector.shape_cast %431 : vector<2xf32> to vector<2x1xf32>
    %433 = vector.broadcast %432 : vector<2x1xf32> to vector<2x4xf32>
    %434 = arith.divf %430, %433 : vector<2x4xf32>
    %435 = vector.extract_strided_slice %15 {offsets = [0, 0], sizes = [1, 1], strides = [1, 1]} : vector<1x8xf32> to vector<1x1xf32>
    %436 = vector.extract_strided_slice %361 {offsets = [0, 8], sizes = [2, 1], strides = [1, 1]} : vector<2x16xf32> to vector<2x1xf32>
    %437 = vector.broadcast %436 : vector<2x1xf32> to vector<2x48xf32>
    %438 = arith.addf %11, %437 : vector<2x48xf32>
    %439 = math.tanh %438 : vector<2x48xf32>
    %440 = vector.broadcast %435 : vector<1x1xf32> to vector<2x48xf32>
    %441 = arith.mulf %440, %439 : vector<2x48xf32>
    %442 = vector.extract_strided_slice %15 {offsets = [0, 1], sizes = [1, 1], strides = [1, 1]} : vector<1x8xf32> to vector<1x1xf32>
    %443 = vector.extract_strided_slice %361 {offsets = [0, 9], sizes = [2, 1], strides = [1, 1]} : vector<2x16xf32> to vector<2x1xf32>
    %444 = vector.broadcast %443 : vector<2x1xf32> to vector<2x48xf32>
    %445 = arith.addf %11, %444 : vector<2x48xf32>
    %446 = math.tanh %445 : vector<2x48xf32>
    %447 = vector.broadcast %442 : vector<1x1xf32> to vector<2x48xf32>
    %448 = arith.mulf %447, %446 : vector<2x48xf32>
    %449 = arith.addf %441, %448 : vector<2x48xf32>
    %450 = vector.extract_strided_slice %15 {offsets = [0, 2], sizes = [1, 1], strides = [1, 1]} : vector<1x8xf32> to vector<1x1xf32>
    %451 = vector.extract_strided_slice %361 {offsets = [0, 10], sizes = [2, 1], strides = [1, 1]} : vector<2x16xf32> to vector<2x1xf32>
    %452 = vector.broadcast %451 : vector<2x1xf32> to vector<2x48xf32>
    %453 = arith.addf %11, %452 : vector<2x48xf32>
    %454 = math.tanh %453 : vector<2x48xf32>
    %455 = vector.broadcast %450 : vector<1x1xf32> to vector<2x48xf32>
    %456 = arith.mulf %455, %454 : vector<2x48xf32>
    %457 = arith.addf %449, %456 : vector<2x48xf32>
    %458 = vector.extract_strided_slice %15 {offsets = [0, 3], sizes = [1, 1], strides = [1, 1]} : vector<1x8xf32> to vector<1x1xf32>
    %459 = vector.extract_strided_slice %361 {offsets = [0, 11], sizes = [2, 1], strides = [1, 1]} : vector<2x16xf32> to vector<2x1xf32>
    %460 = vector.broadcast %459 : vector<2x1xf32> to vector<2x48xf32>
    %461 = arith.addf %11, %460 : vector<2x48xf32>
    %462 = math.tanh %461 : vector<2x48xf32>
    %463 = vector.broadcast %458 : vector<1x1xf32> to vector<2x48xf32>
    %464 = arith.mulf %463, %462 : vector<2x48xf32>
    %465 = arith.addf %457, %464 : vector<2x48xf32>
    %466 = vector.extract_strided_slice %15 {offsets = [0, 4], sizes = [1, 1], strides = [1, 1]} : vector<1x8xf32> to vector<1x1xf32>
    %467 = vector.extract_strided_slice %361 {offsets = [0, 12], sizes = [2, 1], strides = [1, 1]} : vector<2x16xf32> to vector<2x1xf32>
    %468 = vector.broadcast %467 : vector<2x1xf32> to vector<2x48xf32>
    %469 = arith.addf %11, %468 : vector<2x48xf32>
    %470 = math.tanh %469 : vector<2x48xf32>
    %471 = vector.broadcast %466 : vector<1x1xf32> to vector<2x48xf32>
    %472 = arith.mulf %471, %470 : vector<2x48xf32>
    %473 = arith.addf %465, %472 : vector<2x48xf32>
    %474 = vector.extract_strided_slice %15 {offsets = [0, 5], sizes = [1, 1], strides = [1, 1]} : vector<1x8xf32> to vector<1x1xf32>
    %475 = vector.extract_strided_slice %361 {offsets = [0, 13], sizes = [2, 1], strides = [1, 1]} : vector<2x16xf32> to vector<2x1xf32>
    %476 = vector.broadcast %475 : vector<2x1xf32> to vector<2x48xf32>
    %477 = arith.addf %11, %476 : vector<2x48xf32>
    %478 = math.tanh %477 : vector<2x48xf32>
    %479 = vector.broadcast %474 : vector<1x1xf32> to vector<2x48xf32>
    %480 = arith.mulf %479, %478 : vector<2x48xf32>
    %481 = arith.addf %473, %480 : vector<2x48xf32>
    %482 = vector.extract_strided_slice %15 {offsets = [0, 6], sizes = [1, 1], strides = [1, 1]} : vector<1x8xf32> to vector<1x1xf32>
    %483 = vector.extract_strided_slice %361 {offsets = [0, 14], sizes = [2, 1], strides = [1, 1]} : vector<2x16xf32> to vector<2x1xf32>
    %484 = vector.broadcast %483 : vector<2x1xf32> to vector<2x48xf32>
    %485 = arith.addf %11, %484 : vector<2x48xf32>
    %486 = math.tanh %485 : vector<2x48xf32>
    %487 = vector.broadcast %482 : vector<1x1xf32> to vector<2x48xf32>
    %488 = arith.mulf %487, %486 : vector<2x48xf32>
    %489 = arith.addf %481, %488 : vector<2x48xf32>
    %490 = vector.extract_strided_slice %15 {offsets = [0, 7], sizes = [1, 1], strides = [1, 1]} : vector<1x8xf32> to vector<1x1xf32>
    %491 = vector.extract_strided_slice %361 {offsets = [0, 15], sizes = [2, 1], strides = [1, 1]} : vector<2x16xf32> to vector<2x1xf32>
    %492 = vector.broadcast %491 : vector<2x1xf32> to vector<2x48xf32>
    %493 = arith.addf %11, %492 : vector<2x48xf32>
    %494 = math.tanh %493 : vector<2x48xf32>
    %495 = vector.broadcast %490 : vector<1x1xf32> to vector<2x48xf32>
    %496 = arith.mulf %495, %494 : vector<2x48xf32>
    %497 = arith.addf %489, %496 : vector<2x48xf32>
    %cst_63 = arith.constant dense<0.000000e+00> : vector<2x6xf32>
    %498 = tpu.matmul %497, %19, %cst_63 {dimension_numbers = #tpu.dot_dimension_numbers<[1], [0], [0], [1], [0, 0, 1, 1], [], []>} : vector<2x48xf32>, vector<48x6xf32>, vector<2x6xf32> -> vector<2x6xf32>
    %cst_64 = arith.constant 0.699999988 : f32
    %499 = vector.broadcast %cst_64 : f32 to vector<2x6xf32>
    %500 = arith.mulf %499, %498 : vector<2x6xf32>
    %501 = arith.addf %500, %22 : vector<2x6xf32>
    %cst_65 = arith.constant dense<0xFF800000> : vector<2xf32>
    %502 = vector.multi_reduction <maximumf>, %501, %cst_65 [1] : vector<2x6xf32> to vector<2xf32>
    %503 = vector.shape_cast %502 : vector<2xf32> to vector<2x1xf32>
    %504 = vector.broadcast %503 : vector<2x1xf32> to vector<2x6xf32>
    %505 = arith.subf %501, %504 : vector<2x6xf32>
    %506 = math.exp %505 : vector<2x6xf32>
    %cst_66 = arith.constant dense<0.000000e+00> : vector<2xf32>
    %507 = vector.multi_reduction <add>, %506, %cst_66 [1] : vector<2x6xf32> to vector<2xf32>
    %508 = vector.shape_cast %507 : vector<2xf32> to vector<2x1xf32>
    %509 = vector.broadcast %508 : vector<2x1xf32> to vector<2x6xf32>
    %510 = arith.divf %506, %509 : vector<2x6xf32>
    %511 = vector.extract_strided_slice %23 {offsets = [0, 12], sizes = [2, 4], strides = [1, 1]} : vector<2x32xf32> to vector<2x4xf32>
    %512 = arith.mulf %434, %511 : vector<2x4xf32>
    %513 = vector.extract_strided_slice %24 {offsets = [0, 18], sizes = [2, 6], strides = [1, 1]} : vector<2x48xf32> to vector<2x6xf32>
    %514 = arith.mulf %510, %513 : vector<2x6xf32>
    %515 = tpu.concatenate %512, %514, %358 in 1 : vector<2x4xf32>, vector<2x6xf32>, vector<2x32xf32> -> vector<2x42xf32>
    %cst_67 = arith.constant dense<0.000000e+00> : vector<2x32xf32>
    %516 = tpu.matmul %515, %16, %cst_67 {dimension_numbers = #tpu.dot_dimension_numbers<[1], [0], [0], [1], [0, 0, 1, 1], [], []>} : vector<2x42xf32>, vector<42x32xf32>, vector<2x32xf32> -> vector<2x32xf32>
    %517 = vector.broadcast %17 : vector<1x32xf32> to vector<2x32xf32>
    %518 = arith.addf %516, %517 : vector<2x32xf32>
    %519 = math.tanh %518 : vector<2x32xf32>
    %cst_68 = arith.constant dense<0.000000e+00> : vector<2x16xf32>
    %520 = tpu.matmul %519, %12, %cst_68 {dimension_numbers = #tpu.dot_dimension_numbers<[1], [0], [0], [1], [0, 0, 1, 1], [], []>} : vector<2x32xf32>, vector<32x16xf32>, vector<2x16xf32> -> vector<2x16xf32>
    %521 = vector.broadcast %13 : vector<1x16xf32> to vector<2x16xf32>
    %522 = arith.addf %520, %521 : vector<2x16xf32>
    %523 = vector.extract_strided_slice %14 {offsets = [0, 0], sizes = [1, 1], strides = [1, 1]} : vector<1x8xf32> to vector<1x1xf32>
    %524 = vector.extract_strided_slice %522 {offsets = [0, 0], sizes = [2, 1], strides = [1, 1]} : vector<2x16xf32> to vector<2x1xf32>
    %525 = vector.broadcast %524 : vector<2x1xf32> to vector<2x32xf32>
    %526 = arith.addf %5, %525 : vector<2x32xf32>
    %527 = math.tanh %526 : vector<2x32xf32>
    %528 = vector.broadcast %523 : vector<1x1xf32> to vector<2x32xf32>
    %529 = arith.mulf %528, %527 : vector<2x32xf32>
    %530 = vector.extract_strided_slice %14 {offsets = [0, 1], sizes = [1, 1], strides = [1, 1]} : vector<1x8xf32> to vector<1x1xf32>
    %531 = vector.extract_strided_slice %522 {offsets = [0, 1], sizes = [2, 1], strides = [1, 1]} : vector<2x16xf32> to vector<2x1xf32>
    %532 = vector.broadcast %531 : vector<2x1xf32> to vector<2x32xf32>
    %533 = arith.addf %5, %532 : vector<2x32xf32>
    %534 = math.tanh %533 : vector<2x32xf32>
    %535 = vector.broadcast %530 : vector<1x1xf32> to vector<2x32xf32>
    %536 = arith.mulf %535, %534 : vector<2x32xf32>
    %537 = arith.addf %529, %536 : vector<2x32xf32>
    %538 = vector.extract_strided_slice %14 {offsets = [0, 2], sizes = [1, 1], strides = [1, 1]} : vector<1x8xf32> to vector<1x1xf32>
    %539 = vector.extract_strided_slice %522 {offsets = [0, 2], sizes = [2, 1], strides = [1, 1]} : vector<2x16xf32> to vector<2x1xf32>
    %540 = vector.broadcast %539 : vector<2x1xf32> to vector<2x32xf32>
    %541 = arith.addf %5, %540 : vector<2x32xf32>
    %542 = math.tanh %541 : vector<2x32xf32>
    %543 = vector.broadcast %538 : vector<1x1xf32> to vector<2x32xf32>
    %544 = arith.mulf %543, %542 : vector<2x32xf32>
    %545 = arith.addf %537, %544 : vector<2x32xf32>
    %546 = vector.extract_strided_slice %14 {offsets = [0, 3], sizes = [1, 1], strides = [1, 1]} : vector<1x8xf32> to vector<1x1xf32>
    %547 = vector.extract_strided_slice %522 {offsets = [0, 3], sizes = [2, 1], strides = [1, 1]} : vector<2x16xf32> to vector<2x1xf32>
    %548 = vector.broadcast %547 : vector<2x1xf32> to vector<2x32xf32>
    %549 = arith.addf %5, %548 : vector<2x32xf32>
    %550 = math.tanh %549 : vector<2x32xf32>
    %551 = vector.broadcast %546 : vector<1x1xf32> to vector<2x32xf32>
    %552 = arith.mulf %551, %550 : vector<2x32xf32>
    %553 = arith.addf %545, %552 : vector<2x32xf32>
    %554 = vector.extract_strided_slice %14 {offsets = [0, 4], sizes = [1, 1], strides = [1, 1]} : vector<1x8xf32> to vector<1x1xf32>
    %555 = vector.extract_strided_slice %522 {offsets = [0, 4], sizes = [2, 1], strides = [1, 1]} : vector<2x16xf32> to vector<2x1xf32>
    %556 = vector.broadcast %555 : vector<2x1xf32> to vector<2x32xf32>
    %557 = arith.addf %5, %556 : vector<2x32xf32>
    %558 = math.tanh %557 : vector<2x32xf32>
    %559 = vector.broadcast %554 : vector<1x1xf32> to vector<2x32xf32>
    %560 = arith.mulf %559, %558 : vector<2x32xf32>
    %561 = arith.addf %553, %560 : vector<2x32xf32>
    %562 = vector.extract_strided_slice %14 {offsets = [0, 5], sizes = [1, 1], strides = [1, 1]} : vector<1x8xf32> to vector<1x1xf32>
    %563 = vector.extract_strided_slice %522 {offsets = [0, 5], sizes = [2, 1], strides = [1, 1]} : vector<2x16xf32> to vector<2x1xf32>
    %564 = vector.broadcast %563 : vector<2x1xf32> to vector<2x32xf32>
    %565 = arith.addf %5, %564 : vector<2x32xf32>
    %566 = math.tanh %565 : vector<2x32xf32>
    %567 = vector.broadcast %562 : vector<1x1xf32> to vector<2x32xf32>
    %568 = arith.mulf %567, %566 : vector<2x32xf32>
    %569 = arith.addf %561, %568 : vector<2x32xf32>
    %570 = vector.extract_strided_slice %14 {offsets = [0, 6], sizes = [1, 1], strides = [1, 1]} : vector<1x8xf32> to vector<1x1xf32>
    %571 = vector.extract_strided_slice %522 {offsets = [0, 6], sizes = [2, 1], strides = [1, 1]} : vector<2x16xf32> to vector<2x1xf32>
    %572 = vector.broadcast %571 : vector<2x1xf32> to vector<2x32xf32>
    %573 = arith.addf %5, %572 : vector<2x32xf32>
    %574 = math.tanh %573 : vector<2x32xf32>
    %575 = vector.broadcast %570 : vector<1x1xf32> to vector<2x32xf32>
    %576 = arith.mulf %575, %574 : vector<2x32xf32>
    %577 = arith.addf %569, %576 : vector<2x32xf32>
    %578 = vector.extract_strided_slice %14 {offsets = [0, 7], sizes = [1, 1], strides = [1, 1]} : vector<1x8xf32> to vector<1x1xf32>
    %579 = vector.extract_strided_slice %522 {offsets = [0, 7], sizes = [2, 1], strides = [1, 1]} : vector<2x16xf32> to vector<2x1xf32>
    %580 = vector.broadcast %579 : vector<2x1xf32> to vector<2x32xf32>
    %581 = arith.addf %5, %580 : vector<2x32xf32>
    %582 = math.tanh %581 : vector<2x32xf32>
    %583 = vector.broadcast %578 : vector<1x1xf32> to vector<2x32xf32>
    %584 = arith.mulf %583, %582 : vector<2x32xf32>
    %585 = arith.addf %577, %584 : vector<2x32xf32>
    %cst_69 = arith.constant dense<0.000000e+00> : vector<2x4xf32>
    %586 = tpu.matmul %585, %18, %cst_69 {dimension_numbers = #tpu.dot_dimension_numbers<[1], [0], [0], [1], [0, 0, 1, 1], [], []>} : vector<2x32xf32>, vector<32x4xf32>, vector<2x4xf32> -> vector<2x4xf32>
    %cst_70 = arith.constant dense<0xFF800000> : vector<2xf32>
    %587 = vector.multi_reduction <maximumf>, %586, %cst_70 [1] : vector<2x4xf32> to vector<2xf32>
    %588 = vector.shape_cast %587 : vector<2xf32> to vector<2x1xf32>
    %589 = vector.broadcast %588 : vector<2x1xf32> to vector<2x4xf32>
    %590 = arith.subf %586, %589 : vector<2x4xf32>
    %591 = math.exp %590 : vector<2x4xf32>
    %cst_71 = arith.constant dense<0.000000e+00> : vector<2xf32>
    %592 = vector.multi_reduction <add>, %591, %cst_71 [1] : vector<2x4xf32> to vector<2xf32>
    %593 = vector.shape_cast %592 : vector<2xf32> to vector<2x1xf32>
    %594 = vector.broadcast %593 : vector<2x1xf32> to vector<2x4xf32>
    %595 = arith.divf %591, %594 : vector<2x4xf32>
    %596 = vector.extract_strided_slice %15 {offsets = [0, 0], sizes = [1, 1], strides = [1, 1]} : vector<1x8xf32> to vector<1x1xf32>
    %597 = vector.extract_strided_slice %522 {offsets = [0, 8], sizes = [2, 1], strides = [1, 1]} : vector<2x16xf32> to vector<2x1xf32>
    %598 = vector.broadcast %597 : vector<2x1xf32> to vector<2x48xf32>
    %599 = arith.addf %11, %598 : vector<2x48xf32>
    %600 = math.tanh %599 : vector<2x48xf32>
    %601 = vector.broadcast %596 : vector<1x1xf32> to vector<2x48xf32>
    %602 = arith.mulf %601, %600 : vector<2x48xf32>
    %603 = vector.extract_strided_slice %15 {offsets = [0, 1], sizes = [1, 1], strides = [1, 1]} : vector<1x8xf32> to vector<1x1xf32>
    %604 = vector.extract_strided_slice %522 {offsets = [0, 9], sizes = [2, 1], strides = [1, 1]} : vector<2x16xf32> to vector<2x1xf32>
    %605 = vector.broadcast %604 : vector<2x1xf32> to vector<2x48xf32>
    %606 = arith.addf %11, %605 : vector<2x48xf32>
    %607 = math.tanh %606 : vector<2x48xf32>
    %608 = vector.broadcast %603 : vector<1x1xf32> to vector<2x48xf32>
    %609 = arith.mulf %608, %607 : vector<2x48xf32>
    %610 = arith.addf %602, %609 : vector<2x48xf32>
    %611 = vector.extract_strided_slice %15 {offsets = [0, 2], sizes = [1, 1], strides = [1, 1]} : vector<1x8xf32> to vector<1x1xf32>
    %612 = vector.extract_strided_slice %522 {offsets = [0, 10], sizes = [2, 1], strides = [1, 1]} : vector<2x16xf32> to vector<2x1xf32>
    %613 = vector.broadcast %612 : vector<2x1xf32> to vector<2x48xf32>
    %614 = arith.addf %11, %613 : vector<2x48xf32>
    %615 = math.tanh %614 : vector<2x48xf32>
    %616 = vector.broadcast %611 : vector<1x1xf32> to vector<2x48xf32>
    %617 = arith.mulf %616, %615 : vector<2x48xf32>
    %618 = arith.addf %610, %617 : vector<2x48xf32>
    %619 = vector.extract_strided_slice %15 {offsets = [0, 3], sizes = [1, 1], strides = [1, 1]} : vector<1x8xf32> to vector<1x1xf32>
    %620 = vector.extract_strided_slice %522 {offsets = [0, 11], sizes = [2, 1], strides = [1, 1]} : vector<2x16xf32> to vector<2x1xf32>
    %621 = vector.broadcast %620 : vector<2x1xf32> to vector<2x48xf32>
    %622 = arith.addf %11, %621 : vector<2x48xf32>
    %623 = math.tanh %622 : vector<2x48xf32>
    %624 = vector.broadcast %619 : vector<1x1xf32> to vector<2x48xf32>
    %625 = arith.mulf %624, %623 : vector<2x48xf32>
    %626 = arith.addf %618, %625 : vector<2x48xf32>
    %627 = vector.extract_strided_slice %15 {offsets = [0, 4], sizes = [1, 1], strides = [1, 1]} : vector<1x8xf32> to vector<1x1xf32>
    %628 = vector.extract_strided_slice %522 {offsets = [0, 12], sizes = [2, 1], strides = [1, 1]} : vector<2x16xf32> to vector<2x1xf32>
    %629 = vector.broadcast %628 : vector<2x1xf32> to vector<2x48xf32>
    %630 = arith.addf %11, %629 : vector<2x48xf32>
    %631 = math.tanh %630 : vector<2x48xf32>
    %632 = vector.broadcast %627 : vector<1x1xf32> to vector<2x48xf32>
    %633 = arith.mulf %632, %631 : vector<2x48xf32>
    %634 = arith.addf %626, %633 : vector<2x48xf32>
    %635 = vector.extract_strided_slice %15 {offsets = [0, 5], sizes = [1, 1], strides = [1, 1]} : vector<1x8xf32> to vector<1x1xf32>
    %636 = vector.extract_strided_slice %522 {offsets = [0, 13], sizes = [2, 1], strides = [1, 1]} : vector<2x16xf32> to vector<2x1xf32>
    %637 = vector.broadcast %636 : vector<2x1xf32> to vector<2x48xf32>
    %638 = arith.addf %11, %637 : vector<2x48xf32>
    %639 = math.tanh %638 : vector<2x48xf32>
    %640 = vector.broadcast %635 : vector<1x1xf32> to vector<2x48xf32>
    %641 = arith.mulf %640, %639 : vector<2x48xf32>
    %642 = arith.addf %634, %641 : vector<2x48xf32>
    %643 = vector.extract_strided_slice %15 {offsets = [0, 6], sizes = [1, 1], strides = [1, 1]} : vector<1x8xf32> to vector<1x1xf32>
    %644 = vector.extract_strided_slice %522 {offsets = [0, 14], sizes = [2, 1], strides = [1, 1]} : vector<2x16xf32> to vector<2x1xf32>
    %645 = vector.broadcast %644 : vector<2x1xf32> to vector<2x48xf32>
    %646 = arith.addf %11, %645 : vector<2x48xf32>
    %647 = math.tanh %646 : vector<2x48xf32>
    %648 = vector.broadcast %643 : vector<1x1xf32> to vector<2x48xf32>
    %649 = arith.mulf %648, %647 : vector<2x48xf32>
    %650 = arith.addf %642, %649 : vector<2x48xf32>
    %651 = vector.extract_strided_slice %15 {offsets = [0, 7], sizes = [1, 1], strides = [1, 1]} : vector<1x8xf32> to vector<1x1xf32>
    %652 = vector.extract_strided_slice %522 {offsets = [0, 15], sizes = [2, 1], strides = [1, 1]} : vector<2x16xf32> to vector<2x1xf32>
    %653 = vector.broadcast %652 : vector<2x1xf32> to vector<2x48xf32>
    %654 = arith.addf %11, %653 : vector<2x48xf32>
    %655 = math.tanh %654 : vector<2x48xf32>
    %656 = vector.broadcast %651 : vector<1x1xf32> to vector<2x48xf32>
    %657 = arith.mulf %656, %655 : vector<2x48xf32>
    %658 = arith.addf %650, %657 : vector<2x48xf32>
    %cst_72 = arith.constant dense<0.000000e+00> : vector<2x6xf32>
    %659 = tpu.matmul %658, %19, %cst_72 {dimension_numbers = #tpu.dot_dimension_numbers<[1], [0], [0], [1], [0, 0, 1, 1], [], []>} : vector<2x48xf32>, vector<48x6xf32>, vector<2x6xf32> -> vector<2x6xf32>
    %cst_73 = arith.constant 0.699999988 : f32
    %660 = vector.broadcast %cst_73 : f32 to vector<2x6xf32>
    %661 = arith.mulf %660, %659 : vector<2x6xf32>
    %662 = arith.addf %661, %22 : vector<2x6xf32>
    %cst_74 = arith.constant dense<0xFF800000> : vector<2xf32>
    %663 = vector.multi_reduction <maximumf>, %662, %cst_74 [1] : vector<2x6xf32> to vector<2xf32>
    %664 = vector.shape_cast %663 : vector<2xf32> to vector<2x1xf32>
    %665 = vector.broadcast %664 : vector<2x1xf32> to vector<2x6xf32>
    %666 = arith.subf %662, %665 : vector<2x6xf32>
    %667 = math.exp %666 : vector<2x6xf32>
    %cst_75 = arith.constant dense<0.000000e+00> : vector<2xf32>
    %668 = vector.multi_reduction <add>, %667, %cst_75 [1] : vector<2x6xf32> to vector<2xf32>
    %669 = vector.shape_cast %668 : vector<2xf32> to vector<2x1xf32>
    %670 = vector.broadcast %669 : vector<2x1xf32> to vector<2x6xf32>
    %671 = arith.divf %667, %670 : vector<2x6xf32>
    %672 = vector.extract_strided_slice %23 {offsets = [0, 16], sizes = [2, 4], strides = [1, 1]} : vector<2x32xf32> to vector<2x4xf32>
    %673 = arith.mulf %595, %672 : vector<2x4xf32>
    %674 = vector.extract_strided_slice %24 {offsets = [0, 24], sizes = [2, 6], strides = [1, 1]} : vector<2x48xf32> to vector<2x6xf32>
    %675 = arith.mulf %671, %674 : vector<2x6xf32>
    %676 = tpu.concatenate %673, %675, %519 in 1 : vector<2x4xf32>, vector<2x6xf32>, vector<2x32xf32> -> vector<2x42xf32>
    %cst_76 = arith.constant dense<0.000000e+00> : vector<2x32xf32>
    %677 = tpu.matmul %676, %16, %cst_76 {dimension_numbers = #tpu.dot_dimension_numbers<[1], [0], [0], [1], [0, 0, 1, 1], [], []>} : vector<2x42xf32>, vector<42x32xf32>, vector<2x32xf32> -> vector<2x32xf32>
    %678 = vector.broadcast %17 : vector<1x32xf32> to vector<2x32xf32>
    %679 = arith.addf %677, %678 : vector<2x32xf32>
    %680 = math.tanh %679 : vector<2x32xf32>
    %cst_77 = arith.constant dense<0.000000e+00> : vector<2x16xf32>
    %681 = tpu.matmul %680, %12, %cst_77 {dimension_numbers = #tpu.dot_dimension_numbers<[1], [0], [0], [1], [0, 0, 1, 1], [], []>} : vector<2x32xf32>, vector<32x16xf32>, vector<2x16xf32> -> vector<2x16xf32>
    %682 = vector.broadcast %13 : vector<1x16xf32> to vector<2x16xf32>
    %683 = arith.addf %681, %682 : vector<2x16xf32>
    %684 = vector.extract_strided_slice %14 {offsets = [0, 0], sizes = [1, 1], strides = [1, 1]} : vector<1x8xf32> to vector<1x1xf32>
    %685 = vector.extract_strided_slice %683 {offsets = [0, 0], sizes = [2, 1], strides = [1, 1]} : vector<2x16xf32> to vector<2x1xf32>
    %686 = vector.broadcast %685 : vector<2x1xf32> to vector<2x32xf32>
    %687 = arith.addf %5, %686 : vector<2x32xf32>
    %688 = math.tanh %687 : vector<2x32xf32>
    %689 = vector.broadcast %684 : vector<1x1xf32> to vector<2x32xf32>
    %690 = arith.mulf %689, %688 : vector<2x32xf32>
    %691 = vector.extract_strided_slice %14 {offsets = [0, 1], sizes = [1, 1], strides = [1, 1]} : vector<1x8xf32> to vector<1x1xf32>
    %692 = vector.extract_strided_slice %683 {offsets = [0, 1], sizes = [2, 1], strides = [1, 1]} : vector<2x16xf32> to vector<2x1xf32>
    %693 = vector.broadcast %692 : vector<2x1xf32> to vector<2x32xf32>
    %694 = arith.addf %5, %693 : vector<2x32xf32>
    %695 = math.tanh %694 : vector<2x32xf32>
    %696 = vector.broadcast %691 : vector<1x1xf32> to vector<2x32xf32>
    %697 = arith.mulf %696, %695 : vector<2x32xf32>
    %698 = arith.addf %690, %697 : vector<2x32xf32>
    %699 = vector.extract_strided_slice %14 {offsets = [0, 2], sizes = [1, 1], strides = [1, 1]} : vector<1x8xf32> to vector<1x1xf32>
    %700 = vector.extract_strided_slice %683 {offsets = [0, 2], sizes = [2, 1], strides = [1, 1]} : vector<2x16xf32> to vector<2x1xf32>
    %701 = vector.broadcast %700 : vector<2x1xf32> to vector<2x32xf32>
    %702 = arith.addf %5, %701 : vector<2x32xf32>
    %703 = math.tanh %702 : vector<2x32xf32>
    %704 = vector.broadcast %699 : vector<1x1xf32> to vector<2x32xf32>
    %705 = arith.mulf %704, %703 : vector<2x32xf32>
    %706 = arith.addf %698, %705 : vector<2x32xf32>
    %707 = vector.extract_strided_slice %14 {offsets = [0, 3], sizes = [1, 1], strides = [1, 1]} : vector<1x8xf32> to vector<1x1xf32>
    %708 = vector.extract_strided_slice %683 {offsets = [0, 3], sizes = [2, 1], strides = [1, 1]} : vector<2x16xf32> to vector<2x1xf32>
    %709 = vector.broadcast %708 : vector<2x1xf32> to vector<2x32xf32>
    %710 = arith.addf %5, %709 : vector<2x32xf32>
    %711 = math.tanh %710 : vector<2x32xf32>
    %712 = vector.broadcast %707 : vector<1x1xf32> to vector<2x32xf32>
    %713 = arith.mulf %712, %711 : vector<2x32xf32>
    %714 = arith.addf %706, %713 : vector<2x32xf32>
    %715 = vector.extract_strided_slice %14 {offsets = [0, 4], sizes = [1, 1], strides = [1, 1]} : vector<1x8xf32> to vector<1x1xf32>
    %716 = vector.extract_strided_slice %683 {offsets = [0, 4], sizes = [2, 1], strides = [1, 1]} : vector<2x16xf32> to vector<2x1xf32>
    %717 = vector.broadcast %716 : vector<2x1xf32> to vector<2x32xf32>
    %718 = arith.addf %5, %717 : vector<2x32xf32>
    %719 = math.tanh %718 : vector<2x32xf32>
    %720 = vector.broadcast %715 : vector<1x1xf32> to vector<2x32xf32>
    %721 = arith.mulf %720, %719 : vector<2x32xf32>
    %722 = arith.addf %714, %721 : vector<2x32xf32>
    %723 = vector.extract_strided_slice %14 {offsets = [0, 5], sizes = [1, 1], strides = [1, 1]} : vector<1x8xf32> to vector<1x1xf32>
    %724 = vector.extract_strided_slice %683 {offsets = [0, 5], sizes = [2, 1], strides = [1, 1]} : vector<2x16xf32> to vector<2x1xf32>
    %725 = vector.broadcast %724 : vector<2x1xf32> to vector<2x32xf32>
    %726 = arith.addf %5, %725 : vector<2x32xf32>
    %727 = math.tanh %726 : vector<2x32xf32>
    %728 = vector.broadcast %723 : vector<1x1xf32> to vector<2x32xf32>
    %729 = arith.mulf %728, %727 : vector<2x32xf32>
    %730 = arith.addf %722, %729 : vector<2x32xf32>
    %731 = vector.extract_strided_slice %14 {offsets = [0, 6], sizes = [1, 1], strides = [1, 1]} : vector<1x8xf32> to vector<1x1xf32>
    %732 = vector.extract_strided_slice %683 {offsets = [0, 6], sizes = [2, 1], strides = [1, 1]} : vector<2x16xf32> to vector<2x1xf32>
    %733 = vector.broadcast %732 : vector<2x1xf32> to vector<2x32xf32>
    %734 = arith.addf %5, %733 : vector<2x32xf32>
    %735 = math.tanh %734 : vector<2x32xf32>
    %736 = vector.broadcast %731 : vector<1x1xf32> to vector<2x32xf32>
    %737 = arith.mulf %736, %735 : vector<2x32xf32>
    %738 = arith.addf %730, %737 : vector<2x32xf32>
    %739 = vector.extract_strided_slice %14 {offsets = [0, 7], sizes = [1, 1], strides = [1, 1]} : vector<1x8xf32> to vector<1x1xf32>
    %740 = vector.extract_strided_slice %683 {offsets = [0, 7], sizes = [2, 1], strides = [1, 1]} : vector<2x16xf32> to vector<2x1xf32>
    %741 = vector.broadcast %740 : vector<2x1xf32> to vector<2x32xf32>
    %742 = arith.addf %5, %741 : vector<2x32xf32>
    %743 = math.tanh %742 : vector<2x32xf32>
    %744 = vector.broadcast %739 : vector<1x1xf32> to vector<2x32xf32>
    %745 = arith.mulf %744, %743 : vector<2x32xf32>
    %746 = arith.addf %738, %745 : vector<2x32xf32>
    %cst_78 = arith.constant dense<0.000000e+00> : vector<2x4xf32>
    %747 = tpu.matmul %746, %18, %cst_78 {dimension_numbers = #tpu.dot_dimension_numbers<[1], [0], [0], [1], [0, 0, 1, 1], [], []>} : vector<2x32xf32>, vector<32x4xf32>, vector<2x4xf32> -> vector<2x4xf32>
    %cst_79 = arith.constant dense<0xFF800000> : vector<2xf32>
    %748 = vector.multi_reduction <maximumf>, %747, %cst_79 [1] : vector<2x4xf32> to vector<2xf32>
    %749 = vector.shape_cast %748 : vector<2xf32> to vector<2x1xf32>
    %750 = vector.broadcast %749 : vector<2x1xf32> to vector<2x4xf32>
    %751 = arith.subf %747, %750 : vector<2x4xf32>
    %752 = math.exp %751 : vector<2x4xf32>
    %cst_80 = arith.constant dense<0.000000e+00> : vector<2xf32>
    %753 = vector.multi_reduction <add>, %752, %cst_80 [1] : vector<2x4xf32> to vector<2xf32>
    %754 = vector.shape_cast %753 : vector<2xf32> to vector<2x1xf32>
    %755 = vector.broadcast %754 : vector<2x1xf32> to vector<2x4xf32>
    %756 = arith.divf %752, %755 : vector<2x4xf32>
    %757 = vector.extract_strided_slice %15 {offsets = [0, 0], sizes = [1, 1], strides = [1, 1]} : vector<1x8xf32> to vector<1x1xf32>
    %758 = vector.extract_strided_slice %683 {offsets = [0, 8], sizes = [2, 1], strides = [1, 1]} : vector<2x16xf32> to vector<2x1xf32>
    %759 = vector.broadcast %758 : vector<2x1xf32> to vector<2x48xf32>
    %760 = arith.addf %11, %759 : vector<2x48xf32>
    %761 = math.tanh %760 : vector<2x48xf32>
    %762 = vector.broadcast %757 : vector<1x1xf32> to vector<2x48xf32>
    %763 = arith.mulf %762, %761 : vector<2x48xf32>
    %764 = vector.extract_strided_slice %15 {offsets = [0, 1], sizes = [1, 1], strides = [1, 1]} : vector<1x8xf32> to vector<1x1xf32>
    %765 = vector.extract_strided_slice %683 {offsets = [0, 9], sizes = [2, 1], strides = [1, 1]} : vector<2x16xf32> to vector<2x1xf32>
    %766 = vector.broadcast %765 : vector<2x1xf32> to vector<2x48xf32>
    %767 = arith.addf %11, %766 : vector<2x48xf32>
    %768 = math.tanh %767 : vector<2x48xf32>
    %769 = vector.broadcast %764 : vector<1x1xf32> to vector<2x48xf32>
    %770 = arith.mulf %769, %768 : vector<2x48xf32>
    %771 = arith.addf %763, %770 : vector<2x48xf32>
    %772 = vector.extract_strided_slice %15 {offsets = [0, 2], sizes = [1, 1], strides = [1, 1]} : vector<1x8xf32> to vector<1x1xf32>
    %773 = vector.extract_strided_slice %683 {offsets = [0, 10], sizes = [2, 1], strides = [1, 1]} : vector<2x16xf32> to vector<2x1xf32>
    %774 = vector.broadcast %773 : vector<2x1xf32> to vector<2x48xf32>
    %775 = arith.addf %11, %774 : vector<2x48xf32>
    %776 = math.tanh %775 : vector<2x48xf32>
    %777 = vector.broadcast %772 : vector<1x1xf32> to vector<2x48xf32>
    %778 = arith.mulf %777, %776 : vector<2x48xf32>
    %779 = arith.addf %771, %778 : vector<2x48xf32>
    %780 = vector.extract_strided_slice %15 {offsets = [0, 3], sizes = [1, 1], strides = [1, 1]} : vector<1x8xf32> to vector<1x1xf32>
    %781 = vector.extract_strided_slice %683 {offsets = [0, 11], sizes = [2, 1], strides = [1, 1]} : vector<2x16xf32> to vector<2x1xf32>
    %782 = vector.broadcast %781 : vector<2x1xf32> to vector<2x48xf32>
    %783 = arith.addf %11, %782 : vector<2x48xf32>
    %784 = math.tanh %783 : vector<2x48xf32>
    %785 = vector.broadcast %780 : vector<1x1xf32> to vector<2x48xf32>
    %786 = arith.mulf %785, %784 : vector<2x48xf32>
    %787 = arith.addf %779, %786 : vector<2x48xf32>
    %788 = vector.extract_strided_slice %15 {offsets = [0, 4], sizes = [1, 1], strides = [1, 1]} : vector<1x8xf32> to vector<1x1xf32>
    %789 = vector.extract_strided_slice %683 {offsets = [0, 12], sizes = [2, 1], strides = [1, 1]} : vector<2x16xf32> to vector<2x1xf32>
    %790 = vector.broadcast %789 : vector<2x1xf32> to vector<2x48xf32>
    %791 = arith.addf %11, %790 : vector<2x48xf32>
    %792 = math.tanh %791 : vector<2x48xf32>
    %793 = vector.broadcast %788 : vector<1x1xf32> to vector<2x48xf32>
    %794 = arith.mulf %793, %792 : vector<2x48xf32>
    %795 = arith.addf %787, %794 : vector<2x48xf32>
    %796 = vector.extract_strided_slice %15 {offsets = [0, 5], sizes = [1, 1], strides = [1, 1]} : vector<1x8xf32> to vector<1x1xf32>
    %797 = vector.extract_strided_slice %683 {offsets = [0, 13], sizes = [2, 1], strides = [1, 1]} : vector<2x16xf32> to vector<2x1xf32>
    %798 = vector.broadcast %797 : vector<2x1xf32> to vector<2x48xf32>
    %799 = arith.addf %11, %798 : vector<2x48xf32>
    %800 = math.tanh %799 : vector<2x48xf32>
    %801 = vector.broadcast %796 : vector<1x1xf32> to vector<2x48xf32>
    %802 = arith.mulf %801, %800 : vector<2x48xf32>
    %803 = arith.addf %795, %802 : vector<2x48xf32>
    %804 = vector.extract_strided_slice %15 {offsets = [0, 6], sizes = [1, 1], strides = [1, 1]} : vector<1x8xf32> to vector<1x1xf32>
    %805 = vector.extract_strided_slice %683 {offsets = [0, 14], sizes = [2, 1], strides = [1, 1]} : vector<2x16xf32> to vector<2x1xf32>
    %806 = vector.broadcast %805 : vector<2x1xf32> to vector<2x48xf32>
    %807 = arith.addf %11, %806 : vector<2x48xf32>
    %808 = math.tanh %807 : vector<2x48xf32>
    %809 = vector.broadcast %804 : vector<1x1xf32> to vector<2x48xf32>
    %810 = arith.mulf %809, %808 : vector<2x48xf32>
    %811 = arith.addf %803, %810 : vector<2x48xf32>
    %812 = vector.extract_strided_slice %15 {offsets = [0, 7], sizes = [1, 1], strides = [1, 1]} : vector<1x8xf32> to vector<1x1xf32>
    %813 = vector.extract_strided_slice %683 {offsets = [0, 15], sizes = [2, 1], strides = [1, 1]} : vector<2x16xf32> to vector<2x1xf32>
    %814 = vector.broadcast %813 : vector<2x1xf32> to vector<2x48xf32>
    %815 = arith.addf %11, %814 : vector<2x48xf32>
    %816 = math.tanh %815 : vector<2x48xf32>
    %817 = vector.broadcast %812 : vector<1x1xf32> to vector<2x48xf32>
    %818 = arith.mulf %817, %816 : vector<2x48xf32>
    %819 = arith.addf %811, %818 : vector<2x48xf32>
    %cst_81 = arith.constant dense<0.000000e+00> : vector<2x6xf32>
    %820 = tpu.matmul %819, %19, %cst_81 {dimension_numbers = #tpu.dot_dimension_numbers<[1], [0], [0], [1], [0, 0, 1, 1], [], []>} : vector<2x48xf32>, vector<48x6xf32>, vector<2x6xf32> -> vector<2x6xf32>
    %cst_82 = arith.constant 0.699999988 : f32
    %821 = vector.broadcast %cst_82 : f32 to vector<2x6xf32>
    %822 = arith.mulf %821, %820 : vector<2x6xf32>
    %823 = arith.addf %822, %22 : vector<2x6xf32>
    %cst_83 = arith.constant dense<0xFF800000> : vector<2xf32>
    %824 = vector.multi_reduction <maximumf>, %823, %cst_83 [1] : vector<2x6xf32> to vector<2xf32>
    %825 = vector.shape_cast %824 : vector<2xf32> to vector<2x1xf32>
    %826 = vector.broadcast %825 : vector<2x1xf32> to vector<2x6xf32>
    %827 = arith.subf %823, %826 : vector<2x6xf32>
    %828 = math.exp %827 : vector<2x6xf32>
    %cst_84 = arith.constant dense<0.000000e+00> : vector<2xf32>
    %829 = vector.multi_reduction <add>, %828, %cst_84 [1] : vector<2x6xf32> to vector<2xf32>
    %830 = vector.shape_cast %829 : vector<2xf32> to vector<2x1xf32>
    %831 = vector.broadcast %830 : vector<2x1xf32> to vector<2x6xf32>
    %832 = arith.divf %828, %831 : vector<2x6xf32>
    %833 = vector.extract_strided_slice %23 {offsets = [0, 20], sizes = [2, 4], strides = [1, 1]} : vector<2x32xf32> to vector<2x4xf32>
    %834 = arith.mulf %756, %833 : vector<2x4xf32>
    %835 = vector.extract_strided_slice %24 {offsets = [0, 30], sizes = [2, 6], strides = [1, 1]} : vector<2x48xf32> to vector<2x6xf32>
    %836 = arith.mulf %832, %835 : vector<2x6xf32>
    %837 = tpu.concatenate %834, %836, %680 in 1 : vector<2x4xf32>, vector<2x6xf32>, vector<2x32xf32> -> vector<2x42xf32>
    %cst_85 = arith.constant dense<0.000000e+00> : vector<2x32xf32>
    %838 = tpu.matmul %837, %16, %cst_85 {dimension_numbers = #tpu.dot_dimension_numbers<[1], [0], [0], [1], [0, 0, 1, 1], [], []>} : vector<2x42xf32>, vector<42x32xf32>, vector<2x32xf32> -> vector<2x32xf32>
    %839 = vector.broadcast %17 : vector<1x32xf32> to vector<2x32xf32>
    %840 = arith.addf %838, %839 : vector<2x32xf32>
    %841 = math.tanh %840 : vector<2x32xf32>
    %cst_86 = arith.constant dense<0.000000e+00> : vector<2x16xf32>
    %842 = tpu.matmul %841, %12, %cst_86 {dimension_numbers = #tpu.dot_dimension_numbers<[1], [0], [0], [1], [0, 0, 1, 1], [], []>} : vector<2x32xf32>, vector<32x16xf32>, vector<2x16xf32> -> vector<2x16xf32>
    %843 = vector.broadcast %13 : vector<1x16xf32> to vector<2x16xf32>
    %844 = arith.addf %842, %843 : vector<2x16xf32>
    %845 = vector.extract_strided_slice %14 {offsets = [0, 0], sizes = [1, 1], strides = [1, 1]} : vector<1x8xf32> to vector<1x1xf32>
    %846 = vector.extract_strided_slice %844 {offsets = [0, 0], sizes = [2, 1], strides = [1, 1]} : vector<2x16xf32> to vector<2x1xf32>
    %847 = vector.broadcast %846 : vector<2x1xf32> to vector<2x32xf32>
    %848 = arith.addf %5, %847 : vector<2x32xf32>
    %849 = math.tanh %848 : vector<2x32xf32>
    %850 = vector.broadcast %845 : vector<1x1xf32> to vector<2x32xf32>
    %851 = arith.mulf %850, %849 : vector<2x32xf32>
    %852 = vector.extract_strided_slice %14 {offsets = [0, 1], sizes = [1, 1], strides = [1, 1]} : vector<1x8xf32> to vector<1x1xf32>
    %853 = vector.extract_strided_slice %844 {offsets = [0, 1], sizes = [2, 1], strides = [1, 1]} : vector<2x16xf32> to vector<2x1xf32>
    %854 = vector.broadcast %853 : vector<2x1xf32> to vector<2x32xf32>
    %855 = arith.addf %5, %854 : vector<2x32xf32>
    %856 = math.tanh %855 : vector<2x32xf32>
    %857 = vector.broadcast %852 : vector<1x1xf32> to vector<2x32xf32>
    %858 = arith.mulf %857, %856 : vector<2x32xf32>
    %859 = arith.addf %851, %858 : vector<2x32xf32>
    %860 = vector.extract_strided_slice %14 {offsets = [0, 2], sizes = [1, 1], strides = [1, 1]} : vector<1x8xf32> to vector<1x1xf32>
    %861 = vector.extract_strided_slice %844 {offsets = [0, 2], sizes = [2, 1], strides = [1, 1]} : vector<2x16xf32> to vector<2x1xf32>
    %862 = vector.broadcast %861 : vector<2x1xf32> to vector<2x32xf32>
    %863 = arith.addf %5, %862 : vector<2x32xf32>
    %864 = math.tanh %863 : vector<2x32xf32>
    %865 = vector.broadcast %860 : vector<1x1xf32> to vector<2x32xf32>
    %866 = arith.mulf %865, %864 : vector<2x32xf32>
    %867 = arith.addf %859, %866 : vector<2x32xf32>
    %868 = vector.extract_strided_slice %14 {offsets = [0, 3], sizes = [1, 1], strides = [1, 1]} : vector<1x8xf32> to vector<1x1xf32>
    %869 = vector.extract_strided_slice %844 {offsets = [0, 3], sizes = [2, 1], strides = [1, 1]} : vector<2x16xf32> to vector<2x1xf32>
    %870 = vector.broadcast %869 : vector<2x1xf32> to vector<2x32xf32>
    %871 = arith.addf %5, %870 : vector<2x32xf32>
    %872 = math.tanh %871 : vector<2x32xf32>
    %873 = vector.broadcast %868 : vector<1x1xf32> to vector<2x32xf32>
    %874 = arith.mulf %873, %872 : vector<2x32xf32>
    %875 = arith.addf %867, %874 : vector<2x32xf32>
    %876 = vector.extract_strided_slice %14 {offsets = [0, 4], sizes = [1, 1], strides = [1, 1]} : vector<1x8xf32> to vector<1x1xf32>
    %877 = vector.extract_strided_slice %844 {offsets = [0, 4], sizes = [2, 1], strides = [1, 1]} : vector<2x16xf32> to vector<2x1xf32>
    %878 = vector.broadcast %877 : vector<2x1xf32> to vector<2x32xf32>
    %879 = arith.addf %5, %878 : vector<2x32xf32>
    %880 = math.tanh %879 : vector<2x32xf32>
    %881 = vector.broadcast %876 : vector<1x1xf32> to vector<2x32xf32>
    %882 = arith.mulf %881, %880 : vector<2x32xf32>
    %883 = arith.addf %875, %882 : vector<2x32xf32>
    %884 = vector.extract_strided_slice %14 {offsets = [0, 5], sizes = [1, 1], strides = [1, 1]} : vector<1x8xf32> to vector<1x1xf32>
    %885 = vector.extract_strided_slice %844 {offsets = [0, 5], sizes = [2, 1], strides = [1, 1]} : vector<2x16xf32> to vector<2x1xf32>
    %886 = vector.broadcast %885 : vector<2x1xf32> to vector<2x32xf32>
    %887 = arith.addf %5, %886 : vector<2x32xf32>
    %888 = math.tanh %887 : vector<2x32xf32>
    %889 = vector.broadcast %884 : vector<1x1xf32> to vector<2x32xf32>
    %890 = arith.mulf %889, %888 : vector<2x32xf32>
    %891 = arith.addf %883, %890 : vector<2x32xf32>
    %892 = vector.extract_strided_slice %14 {offsets = [0, 6], sizes = [1, 1], strides = [1, 1]} : vector<1x8xf32> to vector<1x1xf32>
    %893 = vector.extract_strided_slice %844 {offsets = [0, 6], sizes = [2, 1], strides = [1, 1]} : vector<2x16xf32> to vector<2x1xf32>
    %894 = vector.broadcast %893 : vector<2x1xf32> to vector<2x32xf32>
    %895 = arith.addf %5, %894 : vector<2x32xf32>
    %896 = math.tanh %895 : vector<2x32xf32>
    %897 = vector.broadcast %892 : vector<1x1xf32> to vector<2x32xf32>
    %898 = arith.mulf %897, %896 : vector<2x32xf32>
    %899 = arith.addf %891, %898 : vector<2x32xf32>
    %900 = vector.extract_strided_slice %14 {offsets = [0, 7], sizes = [1, 1], strides = [1, 1]} : vector<1x8xf32> to vector<1x1xf32>
    %901 = vector.extract_strided_slice %844 {offsets = [0, 7], sizes = [2, 1], strides = [1, 1]} : vector<2x16xf32> to vector<2x1xf32>
    %902 = vector.broadcast %901 : vector<2x1xf32> to vector<2x32xf32>
    %903 = arith.addf %5, %902 : vector<2x32xf32>
    %904 = math.tanh %903 : vector<2x32xf32>
    %905 = vector.broadcast %900 : vector<1x1xf32> to vector<2x32xf32>
    %906 = arith.mulf %905, %904 : vector<2x32xf32>
    %907 = arith.addf %899, %906 : vector<2x32xf32>
    %cst_87 = arith.constant dense<0.000000e+00> : vector<2x4xf32>
    %908 = tpu.matmul %907, %18, %cst_87 {dimension_numbers = #tpu.dot_dimension_numbers<[1], [0], [0], [1], [0, 0, 1, 1], [], []>} : vector<2x32xf32>, vector<32x4xf32>, vector<2x4xf32> -> vector<2x4xf32>
    %cst_88 = arith.constant dense<0xFF800000> : vector<2xf32>
    %909 = vector.multi_reduction <maximumf>, %908, %cst_88 [1] : vector<2x4xf32> to vector<2xf32>
    %910 = vector.shape_cast %909 : vector<2xf32> to vector<2x1xf32>
    %911 = vector.broadcast %910 : vector<2x1xf32> to vector<2x4xf32>
    %912 = arith.subf %908, %911 : vector<2x4xf32>
    %913 = math.exp %912 : vector<2x4xf32>
    %cst_89 = arith.constant dense<0.000000e+00> : vector<2xf32>
    %914 = vector.multi_reduction <add>, %913, %cst_89 [1] : vector<2x4xf32> to vector<2xf32>
    %915 = vector.shape_cast %914 : vector<2xf32> to vector<2x1xf32>
    %916 = vector.broadcast %915 : vector<2x1xf32> to vector<2x4xf32>
    %917 = arith.divf %913, %916 : vector<2x4xf32>
    %918 = vector.extract_strided_slice %15 {offsets = [0, 0], sizes = [1, 1], strides = [1, 1]} : vector<1x8xf32> to vector<1x1xf32>
    %919 = vector.extract_strided_slice %844 {offsets = [0, 8], sizes = [2, 1], strides = [1, 1]} : vector<2x16xf32> to vector<2x1xf32>
    %920 = vector.broadcast %919 : vector<2x1xf32> to vector<2x48xf32>
    %921 = arith.addf %11, %920 : vector<2x48xf32>
    %922 = math.tanh %921 : vector<2x48xf32>
    %923 = vector.broadcast %918 : vector<1x1xf32> to vector<2x48xf32>
    %924 = arith.mulf %923, %922 : vector<2x48xf32>
    %925 = vector.extract_strided_slice %15 {offsets = [0, 1], sizes = [1, 1], strides = [1, 1]} : vector<1x8xf32> to vector<1x1xf32>
    %926 = vector.extract_strided_slice %844 {offsets = [0, 9], sizes = [2, 1], strides = [1, 1]} : vector<2x16xf32> to vector<2x1xf32>
    %927 = vector.broadcast %926 : vector<2x1xf32> to vector<2x48xf32>
    %928 = arith.addf %11, %927 : vector<2x48xf32>
    %929 = math.tanh %928 : vector<2x48xf32>
    %930 = vector.broadcast %925 : vector<1x1xf32> to vector<2x48xf32>
    %931 = arith.mulf %930, %929 : vector<2x48xf32>
    %932 = arith.addf %924, %931 : vector<2x48xf32>
    %933 = vector.extract_strided_slice %15 {offsets = [0, 2], sizes = [1, 1], strides = [1, 1]} : vector<1x8xf32> to vector<1x1xf32>
    %934 = vector.extract_strided_slice %844 {offsets = [0, 10], sizes = [2, 1], strides = [1, 1]} : vector<2x16xf32> to vector<2x1xf32>
    %935 = vector.broadcast %934 : vector<2x1xf32> to vector<2x48xf32>
    %936 = arith.addf %11, %935 : vector<2x48xf32>
    %937 = math.tanh %936 : vector<2x48xf32>
    %938 = vector.broadcast %933 : vector<1x1xf32> to vector<2x48xf32>
    %939 = arith.mulf %938, %937 : vector<2x48xf32>
    %940 = arith.addf %932, %939 : vector<2x48xf32>
    %941 = vector.extract_strided_slice %15 {offsets = [0, 3], sizes = [1, 1], strides = [1, 1]} : vector<1x8xf32> to vector<1x1xf32>
    %942 = vector.extract_strided_slice %844 {offsets = [0, 11], sizes = [2, 1], strides = [1, 1]} : vector<2x16xf32> to vector<2x1xf32>
    %943 = vector.broadcast %942 : vector<2x1xf32> to vector<2x48xf32>
    %944 = arith.addf %11, %943 : vector<2x48xf32>
    %945 = math.tanh %944 : vector<2x48xf32>
    %946 = vector.broadcast %941 : vector<1x1xf32> to vector<2x48xf32>
    %947 = arith.mulf %946, %945 : vector<2x48xf32>
    %948 = arith.addf %940, %947 : vector<2x48xf32>
    %949 = vector.extract_strided_slice %15 {offsets = [0, 4], sizes = [1, 1], strides = [1, 1]} : vector<1x8xf32> to vector<1x1xf32>
    %950 = vector.extract_strided_slice %844 {offsets = [0, 12], sizes = [2, 1], strides = [1, 1]} : vector<2x16xf32> to vector<2x1xf32>
    %951 = vector.broadcast %950 : vector<2x1xf32> to vector<2x48xf32>
    %952 = arith.addf %11, %951 : vector<2x48xf32>
    %953 = math.tanh %952 : vector<2x48xf32>
    %954 = vector.broadcast %949 : vector<1x1xf32> to vector<2x48xf32>
    %955 = arith.mulf %954, %953 : vector<2x48xf32>
    %956 = arith.addf %948, %955 : vector<2x48xf32>
    %957 = vector.extract_strided_slice %15 {offsets = [0, 5], sizes = [1, 1], strides = [1, 1]} : vector<1x8xf32> to vector<1x1xf32>
    %958 = vector.extract_strided_slice %844 {offsets = [0, 13], sizes = [2, 1], strides = [1, 1]} : vector<2x16xf32> to vector<2x1xf32>
    %959 = vector.broadcast %958 : vector<2x1xf32> to vector<2x48xf32>
    %960 = arith.addf %11, %959 : vector<2x48xf32>
    %961 = math.tanh %960 : vector<2x48xf32>
    %962 = vector.broadcast %957 : vector<1x1xf32> to vector<2x48xf32>
    %963 = arith.mulf %962, %961 : vector<2x48xf32>
    %964 = arith.addf %956, %963 : vector<2x48xf32>
    %965 = vector.extract_strided_slice %15 {offsets = [0, 6], sizes = [1, 1], strides = [1, 1]} : vector<1x8xf32> to vector<1x1xf32>
    %966 = vector.extract_strided_slice %844 {offsets = [0, 14], sizes = [2, 1], strides = [1, 1]} : vector<2x16xf32> to vector<2x1xf32>
    %967 = vector.broadcast %966 : vector<2x1xf32> to vector<2x48xf32>
    %968 = arith.addf %11, %967 : vector<2x48xf32>
    %969 = math.tanh %968 : vector<2x48xf32>
    %970 = vector.broadcast %965 : vector<1x1xf32> to vector<2x48xf32>
    %971 = arith.mulf %970, %969 : vector<2x48xf32>
    %972 = arith.addf %964, %971 : vector<2x48xf32>
    %973 = vector.extract_strided_slice %15 {offsets = [0, 7], sizes = [1, 1], strides = [1, 1]} : vector<1x8xf32> to vector<1x1xf32>
    %974 = vector.extract_strided_slice %844 {offsets = [0, 15], sizes = [2, 1], strides = [1, 1]} : vector<2x16xf32> to vector<2x1xf32>
    %975 = vector.broadcast %974 : vector<2x1xf32> to vector<2x48xf32>
    %976 = arith.addf %11, %975 : vector<2x48xf32>
    %977 = math.tanh %976 : vector<2x48xf32>
    %978 = vector.broadcast %973 : vector<1x1xf32> to vector<2x48xf32>
    %979 = arith.mulf %978, %977 : vector<2x48xf32>
    %980 = arith.addf %972, %979 : vector<2x48xf32>
    %cst_90 = arith.constant dense<0.000000e+00> : vector<2x6xf32>
    %981 = tpu.matmul %980, %19, %cst_90 {dimension_numbers = #tpu.dot_dimension_numbers<[1], [0], [0], [1], [0, 0, 1, 1], [], []>} : vector<2x48xf32>, vector<48x6xf32>, vector<2x6xf32> -> vector<2x6xf32>
    %cst_91 = arith.constant 0.699999988 : f32
    %982 = vector.broadcast %cst_91 : f32 to vector<2x6xf32>
    %983 = arith.mulf %982, %981 : vector<2x6xf32>
    %984 = arith.addf %983, %22 : vector<2x6xf32>
    %cst_92 = arith.constant dense<0xFF800000> : vector<2xf32>
    %985 = vector.multi_reduction <maximumf>, %984, %cst_92 [1] : vector<2x6xf32> to vector<2xf32>
    %986 = vector.shape_cast %985 : vector<2xf32> to vector<2x1xf32>
    %987 = vector.broadcast %986 : vector<2x1xf32> to vector<2x6xf32>
    %988 = arith.subf %984, %987 : vector<2x6xf32>
    %989 = math.exp %988 : vector<2x6xf32>
    %cst_93 = arith.constant dense<0.000000e+00> : vector<2xf32>
    %990 = vector.multi_reduction <add>, %989, %cst_93 [1] : vector<2x6xf32> to vector<2xf32>
    %991 = vector.shape_cast %990 : vector<2xf32> to vector<2x1xf32>
    %992 = vector.broadcast %991 : vector<2x1xf32> to vector<2x6xf32>
    %993 = arith.divf %989, %992 : vector<2x6xf32>
    %994 = vector.extract_strided_slice %23 {offsets = [0, 24], sizes = [2, 4], strides = [1, 1]} : vector<2x32xf32> to vector<2x4xf32>
    %995 = arith.mulf %917, %994 : vector<2x4xf32>
    %996 = vector.extract_strided_slice %24 {offsets = [0, 36], sizes = [2, 6], strides = [1, 1]} : vector<2x48xf32> to vector<2x6xf32>
    %997 = arith.mulf %993, %996 : vector<2x6xf32>
    %998 = tpu.concatenate %995, %997, %841 in 1 : vector<2x4xf32>, vector<2x6xf32>, vector<2x32xf32> -> vector<2x42xf32>
    %cst_94 = arith.constant dense<0.000000e+00> : vector<2x32xf32>
    %999 = tpu.matmul %998, %16, %cst_94 {dimension_numbers = #tpu.dot_dimension_numbers<[1], [0], [0], [1], [0, 0, 1, 1], [], []>} : vector<2x42xf32>, vector<42x32xf32>, vector<2x32xf32> -> vector<2x32xf32>
    %1000 = vector.broadcast %17 : vector<1x32xf32> to vector<2x32xf32>
    %1001 = arith.addf %999, %1000 : vector<2x32xf32>
    %1002 = math.tanh %1001 : vector<2x32xf32>
    %cst_95 = arith.constant dense<0.000000e+00> : vector<2x16xf32>
    %1003 = tpu.matmul %1002, %12, %cst_95 {dimension_numbers = #tpu.dot_dimension_numbers<[1], [0], [0], [1], [0, 0, 1, 1], [], []>} : vector<2x32xf32>, vector<32x16xf32>, vector<2x16xf32> -> vector<2x16xf32>
    %1004 = vector.broadcast %13 : vector<1x16xf32> to vector<2x16xf32>
    %1005 = arith.addf %1003, %1004 : vector<2x16xf32>
    %1006 = vector.extract_strided_slice %14 {offsets = [0, 0], sizes = [1, 1], strides = [1, 1]} : vector<1x8xf32> to vector<1x1xf32>
    %1007 = vector.extract_strided_slice %1005 {offsets = [0, 0], sizes = [2, 1], strides = [1, 1]} : vector<2x16xf32> to vector<2x1xf32>
    %1008 = vector.broadcast %1007 : vector<2x1xf32> to vector<2x32xf32>
    %1009 = arith.addf %5, %1008 : vector<2x32xf32>
    %1010 = math.tanh %1009 : vector<2x32xf32>
    %1011 = vector.broadcast %1006 : vector<1x1xf32> to vector<2x32xf32>
    %1012 = arith.mulf %1011, %1010 : vector<2x32xf32>
    %1013 = vector.extract_strided_slice %14 {offsets = [0, 1], sizes = [1, 1], strides = [1, 1]} : vector<1x8xf32> to vector<1x1xf32>
    %1014 = vector.extract_strided_slice %1005 {offsets = [0, 1], sizes = [2, 1], strides = [1, 1]} : vector<2x16xf32> to vector<2x1xf32>
    %1015 = vector.broadcast %1014 : vector<2x1xf32> to vector<2x32xf32>
    %1016 = arith.addf %5, %1015 : vector<2x32xf32>
    %1017 = math.tanh %1016 : vector<2x32xf32>
    %1018 = vector.broadcast %1013 : vector<1x1xf32> to vector<2x32xf32>
    %1019 = arith.mulf %1018, %1017 : vector<2x32xf32>
    %1020 = arith.addf %1012, %1019 : vector<2x32xf32>
    %1021 = vector.extract_strided_slice %14 {offsets = [0, 2], sizes = [1, 1], strides = [1, 1]} : vector<1x8xf32> to vector<1x1xf32>
    %1022 = vector.extract_strided_slice %1005 {offsets = [0, 2], sizes = [2, 1], strides = [1, 1]} : vector<2x16xf32> to vector<2x1xf32>
    %1023 = vector.broadcast %1022 : vector<2x1xf32> to vector<2x32xf32>
    %1024 = arith.addf %5, %1023 : vector<2x32xf32>
    %1025 = math.tanh %1024 : vector<2x32xf32>
    %1026 = vector.broadcast %1021 : vector<1x1xf32> to vector<2x32xf32>
    %1027 = arith.mulf %1026, %1025 : vector<2x32xf32>
    %1028 = arith.addf %1020, %1027 : vector<2x32xf32>
    %1029 = vector.extract_strided_slice %14 {offsets = [0, 3], sizes = [1, 1], strides = [1, 1]} : vector<1x8xf32> to vector<1x1xf32>
    %1030 = vector.extract_strided_slice %1005 {offsets = [0, 3], sizes = [2, 1], strides = [1, 1]} : vector<2x16xf32> to vector<2x1xf32>
    %1031 = vector.broadcast %1030 : vector<2x1xf32> to vector<2x32xf32>
    %1032 = arith.addf %5, %1031 : vector<2x32xf32>
    %1033 = math.tanh %1032 : vector<2x32xf32>
    %1034 = vector.broadcast %1029 : vector<1x1xf32> to vector<2x32xf32>
    %1035 = arith.mulf %1034, %1033 : vector<2x32xf32>
    %1036 = arith.addf %1028, %1035 : vector<2x32xf32>
    %1037 = vector.extract_strided_slice %14 {offsets = [0, 4], sizes = [1, 1], strides = [1, 1]} : vector<1x8xf32> to vector<1x1xf32>
    %1038 = vector.extract_strided_slice %1005 {offsets = [0, 4], sizes = [2, 1], strides = [1, 1]} : vector<2x16xf32> to vector<2x1xf32>
    %1039 = vector.broadcast %1038 : vector<2x1xf32> to vector<2x32xf32>
    %1040 = arith.addf %5, %1039 : vector<2x32xf32>
    %1041 = math.tanh %1040 : vector<2x32xf32>
    %1042 = vector.broadcast %1037 : vector<1x1xf32> to vector<2x32xf32>
    %1043 = arith.mulf %1042, %1041 : vector<2x32xf32>
    %1044 = arith.addf %1036, %1043 : vector<2x32xf32>
    %1045 = vector.extract_strided_slice %14 {offsets = [0, 5], sizes = [1, 1], strides = [1, 1]} : vector<1x8xf32> to vector<1x1xf32>
    %1046 = vector.extract_strided_slice %1005 {offsets = [0, 5], sizes = [2, 1], strides = [1, 1]} : vector<2x16xf32> to vector<2x1xf32>
    %1047 = vector.broadcast %1046 : vector<2x1xf32> to vector<2x32xf32>
    %1048 = arith.addf %5, %1047 : vector<2x32xf32>
    %1049 = math.tanh %1048 : vector<2x32xf32>
    %1050 = vector.broadcast %1045 : vector<1x1xf32> to vector<2x32xf32>
    %1051 = arith.mulf %1050, %1049 : vector<2x32xf32>
    %1052 = arith.addf %1044, %1051 : vector<2x32xf32>
    %1053 = vector.extract_strided_slice %14 {offsets = [0, 6], sizes = [1, 1], strides = [1, 1]} : vector<1x8xf32> to vector<1x1xf32>
    %1054 = vector.extract_strided_slice %1005 {offsets = [0, 6], sizes = [2, 1], strides = [1, 1]} : vector<2x16xf32> to vector<2x1xf32>
    %1055 = vector.broadcast %1054 : vector<2x1xf32> to vector<2x32xf32>
    %1056 = arith.addf %5, %1055 : vector<2x32xf32>
    %1057 = math.tanh %1056 : vector<2x32xf32>
    %1058 = vector.broadcast %1053 : vector<1x1xf32> to vector<2x32xf32>
    %1059 = arith.mulf %1058, %1057 : vector<2x32xf32>
    %1060 = arith.addf %1052, %1059 : vector<2x32xf32>
    %1061 = vector.extract_strided_slice %14 {offsets = [0, 7], sizes = [1, 1], strides = [1, 1]} : vector<1x8xf32> to vector<1x1xf32>
    %1062 = vector.extract_strided_slice %1005 {offsets = [0, 7], sizes = [2, 1], strides = [1, 1]} : vector<2x16xf32> to vector<2x1xf32>
    %1063 = vector.broadcast %1062 : vector<2x1xf32> to vector<2x32xf32>
    %1064 = arith.addf %5, %1063 : vector<2x32xf32>
    %1065 = math.tanh %1064 : vector<2x32xf32>
    %1066 = vector.broadcast %1061 : vector<1x1xf32> to vector<2x32xf32>
    %1067 = arith.mulf %1066, %1065 : vector<2x32xf32>
    %1068 = arith.addf %1060, %1067 : vector<2x32xf32>
    %cst_96 = arith.constant dense<0.000000e+00> : vector<2x4xf32>
    %1069 = tpu.matmul %1068, %18, %cst_96 {dimension_numbers = #tpu.dot_dimension_numbers<[1], [0], [0], [1], [0, 0, 1, 1], [], []>} : vector<2x32xf32>, vector<32x4xf32>, vector<2x4xf32> -> vector<2x4xf32>
    %cst_97 = arith.constant dense<0xFF800000> : vector<2xf32>
    %1070 = vector.multi_reduction <maximumf>, %1069, %cst_97 [1] : vector<2x4xf32> to vector<2xf32>
    %1071 = vector.shape_cast %1070 : vector<2xf32> to vector<2x1xf32>
    %1072 = vector.broadcast %1071 : vector<2x1xf32> to vector<2x4xf32>
    %1073 = arith.subf %1069, %1072 : vector<2x4xf32>
    %1074 = math.exp %1073 : vector<2x4xf32>
    %cst_98 = arith.constant dense<0.000000e+00> : vector<2xf32>
    %1075 = vector.multi_reduction <add>, %1074, %cst_98 [1] : vector<2x4xf32> to vector<2xf32>
    %1076 = vector.shape_cast %1075 : vector<2xf32> to vector<2x1xf32>
    %1077 = vector.broadcast %1076 : vector<2x1xf32> to vector<2x4xf32>
    %1078 = arith.divf %1074, %1077 : vector<2x4xf32>
    %1079 = vector.extract_strided_slice %15 {offsets = [0, 0], sizes = [1, 1], strides = [1, 1]} : vector<1x8xf32> to vector<1x1xf32>
    %1080 = vector.extract_strided_slice %1005 {offsets = [0, 8], sizes = [2, 1], strides = [1, 1]} : vector<2x16xf32> to vector<2x1xf32>
    %1081 = vector.broadcast %1080 : vector<2x1xf32> to vector<2x48xf32>
    %1082 = arith.addf %11, %1081 : vector<2x48xf32>
    %1083 = math.tanh %1082 : vector<2x48xf32>
    %1084 = vector.broadcast %1079 : vector<1x1xf32> to vector<2x48xf32>
    %1085 = arith.mulf %1084, %1083 : vector<2x48xf32>
    %1086 = vector.extract_strided_slice %15 {offsets = [0, 1], sizes = [1, 1], strides = [1, 1]} : vector<1x8xf32> to vector<1x1xf32>
    %1087 = vector.extract_strided_slice %1005 {offsets = [0, 9], sizes = [2, 1], strides = [1, 1]} : vector<2x16xf32> to vector<2x1xf32>
    %1088 = vector.broadcast %1087 : vector<2x1xf32> to vector<2x48xf32>
    %1089 = arith.addf %11, %1088 : vector<2x48xf32>
    %1090 = math.tanh %1089 : vector<2x48xf32>
    %1091 = vector.broadcast %1086 : vector<1x1xf32> to vector<2x48xf32>
    %1092 = arith.mulf %1091, %1090 : vector<2x48xf32>
    %1093 = arith.addf %1085, %1092 : vector<2x48xf32>
    %1094 = vector.extract_strided_slice %15 {offsets = [0, 2], sizes = [1, 1], strides = [1, 1]} : vector<1x8xf32> to vector<1x1xf32>
    %1095 = vector.extract_strided_slice %1005 {offsets = [0, 10], sizes = [2, 1], strides = [1, 1]} : vector<2x16xf32> to vector<2x1xf32>
    %1096 = vector.broadcast %1095 : vector<2x1xf32> to vector<2x48xf32>
    %1097 = arith.addf %11, %1096 : vector<2x48xf32>
    %1098 = math.tanh %1097 : vector<2x48xf32>
    %1099 = vector.broadcast %1094 : vector<1x1xf32> to vector<2x48xf32>
    %1100 = arith.mulf %1099, %1098 : vector<2x48xf32>
    %1101 = arith.addf %1093, %1100 : vector<2x48xf32>
    %1102 = vector.extract_strided_slice %15 {offsets = [0, 3], sizes = [1, 1], strides = [1, 1]} : vector<1x8xf32> to vector<1x1xf32>
    %1103 = vector.extract_strided_slice %1005 {offsets = [0, 11], sizes = [2, 1], strides = [1, 1]} : vector<2x16xf32> to vector<2x1xf32>
    %1104 = vector.broadcast %1103 : vector<2x1xf32> to vector<2x48xf32>
    %1105 = arith.addf %11, %1104 : vector<2x48xf32>
    %1106 = math.tanh %1105 : vector<2x48xf32>
    %1107 = vector.broadcast %1102 : vector<1x1xf32> to vector<2x48xf32>
    %1108 = arith.mulf %1107, %1106 : vector<2x48xf32>
    %1109 = arith.addf %1101, %1108 : vector<2x48xf32>
    %1110 = vector.extract_strided_slice %15 {offsets = [0, 4], sizes = [1, 1], strides = [1, 1]} : vector<1x8xf32> to vector<1x1xf32>
    %1111 = vector.extract_strided_slice %1005 {offsets = [0, 12], sizes = [2, 1], strides = [1, 1]} : vector<2x16xf32> to vector<2x1xf32>
    %1112 = vector.broadcast %1111 : vector<2x1xf32> to vector<2x48xf32>
    %1113 = arith.addf %11, %1112 : vector<2x48xf32>
    %1114 = math.tanh %1113 : vector<2x48xf32>
    %1115 = vector.broadcast %1110 : vector<1x1xf32> to vector<2x48xf32>
    %1116 = arith.mulf %1115, %1114 : vector<2x48xf32>
    %1117 = arith.addf %1109, %1116 : vector<2x48xf32>
    %1118 = vector.extract_strided_slice %15 {offsets = [0, 5], sizes = [1, 1], strides = [1, 1]} : vector<1x8xf32> to vector<1x1xf32>
    %1119 = vector.extract_strided_slice %1005 {offsets = [0, 13], sizes = [2, 1], strides = [1, 1]} : vector<2x16xf32> to vector<2x1xf32>
    %1120 = vector.broadcast %1119 : vector<2x1xf32> to vector<2x48xf32>
    %1121 = arith.addf %11, %1120 : vector<2x48xf32>
    %1122 = math.tanh %1121 : vector<2x48xf32>
    %1123 = vector.broadcast %1118 : vector<1x1xf32> to vector<2x48xf32>
    %1124 = arith.mulf %1123, %1122 : vector<2x48xf32>
    %1125 = arith.addf %1117, %1124 : vector<2x48xf32>
    %1126 = vector.extract_strided_slice %15 {offsets = [0, 6], sizes = [1, 1], strides = [1, 1]} : vector<1x8xf32> to vector<1x1xf32>
    %1127 = vector.extract_strided_slice %1005 {offsets = [0, 14], sizes = [2, 1], strides = [1, 1]} : vector<2x16xf32> to vector<2x1xf32>
    %1128 = vector.broadcast %1127 : vector<2x1xf32> to vector<2x48xf32>
    %1129 = arith.addf %11, %1128 : vector<2x48xf32>
    %1130 = math.tanh %1129 : vector<2x48xf32>
    %1131 = vector.broadcast %1126 : vector<1x1xf32> to vector<2x48xf32>
    %1132 = arith.mulf %1131, %1130 : vector<2x48xf32>
    %1133 = arith.addf %1125, %1132 : vector<2x48xf32>
    %1134 = vector.extract_strided_slice %15 {offsets = [0, 7], sizes = [1, 1], strides = [1, 1]} : vector<1x8xf32> to vector<1x1xf32>
    %1135 = vector.extract_strided_slice %1005 {offsets = [0, 15], sizes = [2, 1], strides = [1, 1]} : vector<2x16xf32> to vector<2x1xf32>
    %1136 = vector.broadcast %1135 : vector<2x1xf32> to vector<2x48xf32>
    %1137 = arith.addf %11, %1136 : vector<2x48xf32>
    %1138 = math.tanh %1137 : vector<2x48xf32>
    %1139 = vector.broadcast %1134 : vector<1x1xf32> to vector<2x48xf32>
    %1140 = arith.mulf %1139, %1138 : vector<2x48xf32>
    %1141 = arith.addf %1133, %1140 : vector<2x48xf32>
    %cst_99 = arith.constant dense<0.000000e+00> : vector<2x6xf32>
    %1142 = tpu.matmul %1141, %19, %cst_99 {dimension_numbers = #tpu.dot_dimension_numbers<[1], [0], [0], [1], [0, 0, 1, 1], [], []>} : vector<2x48xf32>, vector<48x6xf32>, vector<2x6xf32> -> vector<2x6xf32>
    %cst_100 = arith.constant 0.699999988 : f32
    %1143 = vector.broadcast %cst_100 : f32 to vector<2x6xf32>
    %1144 = arith.mulf %1143, %1142 : vector<2x6xf32>
    %1145 = arith.addf %1144, %22 : vector<2x6xf32>
    %cst_101 = arith.constant dense<0xFF800000> : vector<2xf32>
    %1146 = vector.multi_reduction <maximumf>, %1145, %cst_101 [1] : vector<2x6xf32> to vector<2xf32>
    %1147 = vector.shape_cast %1146 : vector<2xf32> to vector<2x1xf32>
    %1148 = vector.broadcast %1147 : vector<2x1xf32> to vector<2x6xf32>
    %1149 = arith.subf %1145, %1148 : vector<2x6xf32>
    %1150 = math.exp %1149 : vector<2x6xf32>
    %cst_102 = arith.constant dense<0.000000e+00> : vector<2xf32>
    %1151 = vector.multi_reduction <add>, %1150, %cst_102 [1] : vector<2x6xf32> to vector<2xf32>
    %1152 = vector.shape_cast %1151 : vector<2xf32> to vector<2x1xf32>
    %1153 = vector.broadcast %1152 : vector<2x1xf32> to vector<2x6xf32>
    %1154 = arith.divf %1150, %1153 : vector<2x6xf32>
    %1155 = vector.extract_strided_slice %23 {offsets = [0, 28], sizes = [2, 4], strides = [1, 1]} : vector<2x32xf32> to vector<2x4xf32>
    %1156 = arith.mulf %1078, %1155 : vector<2x4xf32>
    %1157 = vector.extract_strided_slice %24 {offsets = [0, 42], sizes = [2, 6], strides = [1, 1]} : vector<2x48xf32> to vector<2x6xf32>
    %1158 = arith.mulf %1154, %1157 : vector<2x6xf32>
    %1159 = tpu.concatenate %1156, %1158, %1002 in 1 : vector<2x4xf32>, vector<2x6xf32>, vector<2x32xf32> -> vector<2x42xf32>
    %cst_103 = arith.constant dense<0.000000e+00> : vector<2x32xf32>
    %1160 = tpu.matmul %1159, %16, %cst_103 {dimension_numbers = #tpu.dot_dimension_numbers<[1], [0], [0], [1], [0, 0, 1, 1], [], []>} : vector<2x42xf32>, vector<42x32xf32>, vector<2x32xf32> -> vector<2x32xf32>
    %1161 = vector.broadcast %17 : vector<1x32xf32> to vector<2x32xf32>
    %1162 = arith.addf %1160, %1161 : vector<2x32xf32>
    %1163 = math.tanh %1162 : vector<2x32xf32>
    %cst_104 = arith.constant dense<0.000000e+00> : vector<2x16xf32>
    %1164 = tpu.matmul %1163, %12, %cst_104 {dimension_numbers = #tpu.dot_dimension_numbers<[1], [0], [0], [1], [0, 0, 1, 1], [], []>} : vector<2x32xf32>, vector<32x16xf32>, vector<2x16xf32> -> vector<2x16xf32>
    %1165 = vector.broadcast %13 : vector<1x16xf32> to vector<2x16xf32>
    %1166 = arith.addf %1164, %1165 : vector<2x16xf32>
    %1167 = vector.extract_strided_slice %14 {offsets = [0, 0], sizes = [1, 1], strides = [1, 1]} : vector<1x8xf32> to vector<1x1xf32>
    %1168 = vector.extract_strided_slice %1166 {offsets = [0, 0], sizes = [2, 1], strides = [1, 1]} : vector<2x16xf32> to vector<2x1xf32>
    %1169 = vector.broadcast %1168 : vector<2x1xf32> to vector<2x32xf32>
    %1170 = arith.addf %5, %1169 : vector<2x32xf32>
    %1171 = math.tanh %1170 : vector<2x32xf32>
    %1172 = vector.broadcast %1167 : vector<1x1xf32> to vector<2x32xf32>
    %1173 = arith.mulf %1172, %1171 : vector<2x32xf32>
    %1174 = vector.extract_strided_slice %14 {offsets = [0, 1], sizes = [1, 1], strides = [1, 1]} : vector<1x8xf32> to vector<1x1xf32>
    %1175 = vector.extract_strided_slice %1166 {offsets = [0, 1], sizes = [2, 1], strides = [1, 1]} : vector<2x16xf32> to vector<2x1xf32>
    %1176 = vector.broadcast %1175 : vector<2x1xf32> to vector<2x32xf32>
    %1177 = arith.addf %5, %1176 : vector<2x32xf32>
    %1178 = math.tanh %1177 : vector<2x32xf32>
    %1179 = vector.broadcast %1174 : vector<1x1xf32> to vector<2x32xf32>
    %1180 = arith.mulf %1179, %1178 : vector<2x32xf32>
    %1181 = arith.addf %1173, %1180 : vector<2x32xf32>
    %1182 = vector.extract_strided_slice %14 {offsets = [0, 2], sizes = [1, 1], strides = [1, 1]} : vector<1x8xf32> to vector<1x1xf32>
    %1183 = vector.extract_strided_slice %1166 {offsets = [0, 2], sizes = [2, 1], strides = [1, 1]} : vector<2x16xf32> to vector<2x1xf32>
    %1184 = vector.broadcast %1183 : vector<2x1xf32> to vector<2x32xf32>
    %1185 = arith.addf %5, %1184 : vector<2x32xf32>
    %1186 = math.tanh %1185 : vector<2x32xf32>
    %1187 = vector.broadcast %1182 : vector<1x1xf32> to vector<2x32xf32>
    %1188 = arith.mulf %1187, %1186 : vector<2x32xf32>
    %1189 = arith.addf %1181, %1188 : vector<2x32xf32>
    %1190 = vector.extract_strided_slice %14 {offsets = [0, 3], sizes = [1, 1], strides = [1, 1]} : vector<1x8xf32> to vector<1x1xf32>
    %1191 = vector.extract_strided_slice %1166 {offsets = [0, 3], sizes = [2, 1], strides = [1, 1]} : vector<2x16xf32> to vector<2x1xf32>
    %1192 = vector.broadcast %1191 : vector<2x1xf32> to vector<2x32xf32>
    %1193 = arith.addf %5, %1192 : vector<2x32xf32>
    %1194 = math.tanh %1193 : vector<2x32xf32>
    %1195 = vector.broadcast %1190 : vector<1x1xf32> to vector<2x32xf32>
    %1196 = arith.mulf %1195, %1194 : vector<2x32xf32>
    %1197 = arith.addf %1189, %1196 : vector<2x32xf32>
    %1198 = vector.extract_strided_slice %14 {offsets = [0, 4], sizes = [1, 1], strides = [1, 1]} : vector<1x8xf32> to vector<1x1xf32>
    %1199 = vector.extract_strided_slice %1166 {offsets = [0, 4], sizes = [2, 1], strides = [1, 1]} : vector<2x16xf32> to vector<2x1xf32>
    %1200 = vector.broadcast %1199 : vector<2x1xf32> to vector<2x32xf32>
    %1201 = arith.addf %5, %1200 : vector<2x32xf32>
    %1202 = math.tanh %1201 : vector<2x32xf32>
    %1203 = vector.broadcast %1198 : vector<1x1xf32> to vector<2x32xf32>
    %1204 = arith.mulf %1203, %1202 : vector<2x32xf32>
    %1205 = arith.addf %1197, %1204 : vector<2x32xf32>
    %1206 = vector.extract_strided_slice %14 {offsets = [0, 5], sizes = [1, 1], strides = [1, 1]} : vector<1x8xf32> to vector<1x1xf32>
    %1207 = vector.extract_strided_slice %1166 {offsets = [0, 5], sizes = [2, 1], strides = [1, 1]} : vector<2x16xf32> to vector<2x1xf32>
    %1208 = vector.broadcast %1207 : vector<2x1xf32> to vector<2x32xf32>
    %1209 = arith.addf %5, %1208 : vector<2x32xf32>
    %1210 = math.tanh %1209 : vector<2x32xf32>
    %1211 = vector.broadcast %1206 : vector<1x1xf32> to vector<2x32xf32>
    %1212 = arith.mulf %1211, %1210 : vector<2x32xf32>
    %1213 = arith.addf %1205, %1212 : vector<2x32xf32>
    %1214 = vector.extract_strided_slice %14 {offsets = [0, 6], sizes = [1, 1], strides = [1, 1]} : vector<1x8xf32> to vector<1x1xf32>
    %1215 = vector.extract_strided_slice %1166 {offsets = [0, 6], sizes = [2, 1], strides = [1, 1]} : vector<2x16xf32> to vector<2x1xf32>
    %1216 = vector.broadcast %1215 : vector<2x1xf32> to vector<2x32xf32>
    %1217 = arith.addf %5, %1216 : vector<2x32xf32>
    %1218 = math.tanh %1217 : vector<2x32xf32>
    %1219 = vector.broadcast %1214 : vector<1x1xf32> to vector<2x32xf32>
    %1220 = arith.mulf %1219, %1218 : vector<2x32xf32>
    %1221 = arith.addf %1213, %1220 : vector<2x32xf32>
    %1222 = vector.extract_strided_slice %14 {offsets = [0, 7], sizes = [1, 1], strides = [1, 1]} : vector<1x8xf32> to vector<1x1xf32>
    %1223 = vector.extract_strided_slice %1166 {offsets = [0, 7], sizes = [2, 1], strides = [1, 1]} : vector<2x16xf32> to vector<2x1xf32>
    %1224 = vector.broadcast %1223 : vector<2x1xf32> to vector<2x32xf32>
    %1225 = arith.addf %5, %1224 : vector<2x32xf32>
    %1226 = math.tanh %1225 : vector<2x32xf32>
    %1227 = vector.broadcast %1222 : vector<1x1xf32> to vector<2x32xf32>
    %1228 = arith.mulf %1227, %1226 : vector<2x32xf32>
    %1229 = arith.addf %1221, %1228 : vector<2x32xf32>
    %cst_105 = arith.constant dense<0.000000e+00> : vector<2x4xf32>
    %1230 = tpu.matmul %1229, %18, %cst_105 {dimension_numbers = #tpu.dot_dimension_numbers<[1], [0], [0], [1], [0, 0, 1, 1], [], []>} : vector<2x32xf32>, vector<32x4xf32>, vector<2x4xf32> -> vector<2x4xf32>
    %cst_106 = arith.constant dense<0xFF800000> : vector<2xf32>
    %1231 = vector.multi_reduction <maximumf>, %1230, %cst_106 [1] : vector<2x4xf32> to vector<2xf32>
    %1232 = vector.shape_cast %1231 : vector<2xf32> to vector<2x1xf32>
    %1233 = vector.broadcast %1232 : vector<2x1xf32> to vector<2x4xf32>
    %1234 = arith.subf %1230, %1233 : vector<2x4xf32>
    %1235 = math.exp %1234 : vector<2x4xf32>
    %cst_107 = arith.constant dense<0.000000e+00> : vector<2xf32>
    %1236 = vector.multi_reduction <add>, %1235, %cst_107 [1] : vector<2x4xf32> to vector<2xf32>
    %1237 = vector.shape_cast %1236 : vector<2xf32> to vector<2x1xf32>
    %1238 = vector.broadcast %1237 : vector<2x1xf32> to vector<2x4xf32>
    %1239 = arith.divf %1235, %1238 : vector<2x4xf32>
    %1240 = vector.extract_strided_slice %15 {offsets = [0, 0], sizes = [1, 1], strides = [1, 1]} : vector<1x8xf32> to vector<1x1xf32>
    %1241 = vector.extract_strided_slice %1166 {offsets = [0, 8], sizes = [2, 1], strides = [1, 1]} : vector<2x16xf32> to vector<2x1xf32>
    %1242 = vector.broadcast %1241 : vector<2x1xf32> to vector<2x48xf32>
    %1243 = arith.addf %11, %1242 : vector<2x48xf32>
    %1244 = math.tanh %1243 : vector<2x48xf32>
    %1245 = vector.broadcast %1240 : vector<1x1xf32> to vector<2x48xf32>
    %1246 = arith.mulf %1245, %1244 : vector<2x48xf32>
    %1247 = vector.extract_strided_slice %15 {offsets = [0, 1], sizes = [1, 1], strides = [1, 1]} : vector<1x8xf32> to vector<1x1xf32>
    %1248 = vector.extract_strided_slice %1166 {offsets = [0, 9], sizes = [2, 1], strides = [1, 1]} : vector<2x16xf32> to vector<2x1xf32>
    %1249 = vector.broadcast %1248 : vector<2x1xf32> to vector<2x48xf32>
    %1250 = arith.addf %11, %1249 : vector<2x48xf32>
    %1251 = math.tanh %1250 : vector<2x48xf32>
    %1252 = vector.broadcast %1247 : vector<1x1xf32> to vector<2x48xf32>
    %1253 = arith.mulf %1252, %1251 : vector<2x48xf32>
    %1254 = arith.addf %1246, %1253 : vector<2x48xf32>
    %1255 = vector.extract_strided_slice %15 {offsets = [0, 2], sizes = [1, 1], strides = [1, 1]} : vector<1x8xf32> to vector<1x1xf32>
    %1256 = vector.extract_strided_slice %1166 {offsets = [0, 10], sizes = [2, 1], strides = [1, 1]} : vector<2x16xf32> to vector<2x1xf32>
    %1257 = vector.broadcast %1256 : vector<2x1xf32> to vector<2x48xf32>
    %1258 = arith.addf %11, %1257 : vector<2x48xf32>
    %1259 = math.tanh %1258 : vector<2x48xf32>
    %1260 = vector.broadcast %1255 : vector<1x1xf32> to vector<2x48xf32>
    %1261 = arith.mulf %1260, %1259 : vector<2x48xf32>
    %1262 = arith.addf %1254, %1261 : vector<2x48xf32>
    %1263 = vector.extract_strided_slice %15 {offsets = [0, 3], sizes = [1, 1], strides = [1, 1]} : vector<1x8xf32> to vector<1x1xf32>
    %1264 = vector.extract_strided_slice %1166 {offsets = [0, 11], sizes = [2, 1], strides = [1, 1]} : vector<2x16xf32> to vector<2x1xf32>
    %1265 = vector.broadcast %1264 : vector<2x1xf32> to vector<2x48xf32>
    %1266 = arith.addf %11, %1265 : vector<2x48xf32>
    %1267 = math.tanh %1266 : vector<2x48xf32>
    %1268 = vector.broadcast %1263 : vector<1x1xf32> to vector<2x48xf32>
    %1269 = arith.mulf %1268, %1267 : vector<2x48xf32>
    %1270 = arith.addf %1262, %1269 : vector<2x48xf32>
    %1271 = vector.extract_strided_slice %15 {offsets = [0, 4], sizes = [1, 1], strides = [1, 1]} : vector<1x8xf32> to vector<1x1xf32>
    %1272 = vector.extract_strided_slice %1166 {offsets = [0, 12], sizes = [2, 1], strides = [1, 1]} : vector<2x16xf32> to vector<2x1xf32>
    %1273 = vector.broadcast %1272 : vector<2x1xf32> to vector<2x48xf32>
    %1274 = arith.addf %11, %1273 : vector<2x48xf32>
    %1275 = math.tanh %1274 : vector<2x48xf32>
    %1276 = vector.broadcast %1271 : vector<1x1xf32> to vector<2x48xf32>
    %1277 = arith.mulf %1276, %1275 : vector<2x48xf32>
    %1278 = arith.addf %1270, %1277 : vector<2x48xf32>
    %1279 = vector.extract_strided_slice %15 {offsets = [0, 5], sizes = [1, 1], strides = [1, 1]} : vector<1x8xf32> to vector<1x1xf32>
    %1280 = vector.extract_strided_slice %1166 {offsets = [0, 13], sizes = [2, 1], strides = [1, 1]} : vector<2x16xf32> to vector<2x1xf32>
    %1281 = vector.broadcast %1280 : vector<2x1xf32> to vector<2x48xf32>
    %1282 = arith.addf %11, %1281 : vector<2x48xf32>
    %1283 = math.tanh %1282 : vector<2x48xf32>
    %1284 = vector.broadcast %1279 : vector<1x1xf32> to vector<2x48xf32>
    %1285 = arith.mulf %1284, %1283 : vector<2x48xf32>
    %1286 = arith.addf %1278, %1285 : vector<2x48xf32>
    %1287 = vector.extract_strided_slice %15 {offsets = [0, 6], sizes = [1, 1], strides = [1, 1]} : vector<1x8xf32> to vector<1x1xf32>
    %1288 = vector.extract_strided_slice %1166 {offsets = [0, 14], sizes = [2, 1], strides = [1, 1]} : vector<2x16xf32> to vector<2x1xf32>
    %1289 = vector.broadcast %1288 : vector<2x1xf32> to vector<2x48xf32>
    %1290 = arith.addf %11, %1289 : vector<2x48xf32>
    %1291 = math.tanh %1290 : vector<2x48xf32>
    %1292 = vector.broadcast %1287 : vector<1x1xf32> to vector<2x48xf32>
    %1293 = arith.mulf %1292, %1291 : vector<2x48xf32>
    %1294 = arith.addf %1286, %1293 : vector<2x48xf32>
    %1295 = vector.extract_strided_slice %15 {offsets = [0, 7], sizes = [1, 1], strides = [1, 1]} : vector<1x8xf32> to vector<1x1xf32>
    %1296 = vector.extract_strided_slice %1166 {offsets = [0, 15], sizes = [2, 1], strides = [1, 1]} : vector<2x16xf32> to vector<2x1xf32>
    %1297 = vector.broadcast %1296 : vector<2x1xf32> to vector<2x48xf32>
    %1298 = arith.addf %11, %1297 : vector<2x48xf32>
    %1299 = math.tanh %1298 : vector<2x48xf32>
    %1300 = vector.broadcast %1295 : vector<1x1xf32> to vector<2x48xf32>
    %1301 = arith.mulf %1300, %1299 : vector<2x48xf32>
    %1302 = arith.addf %1294, %1301 : vector<2x48xf32>
    %cst_108 = arith.constant dense<0.000000e+00> : vector<2x6xf32>
    %1303 = tpu.matmul %1302, %19, %cst_108 {dimension_numbers = #tpu.dot_dimension_numbers<[1], [0], [0], [1], [0, 0, 1, 1], [], []>} : vector<2x48xf32>, vector<48x6xf32>, vector<2x6xf32> -> vector<2x6xf32>
    %cst_109 = arith.constant 0.699999988 : f32
    %1304 = vector.broadcast %cst_109 : f32 to vector<2x6xf32>
    %1305 = arith.mulf %1304, %1303 : vector<2x6xf32>
    %1306 = arith.addf %1305, %22 : vector<2x6xf32>
    %cst_110 = arith.constant dense<0xFF800000> : vector<2xf32>
    %1307 = vector.multi_reduction <maximumf>, %1306, %cst_110 [1] : vector<2x6xf32> to vector<2xf32>
    %1308 = vector.shape_cast %1307 : vector<2xf32> to vector<2x1xf32>
    %1309 = vector.broadcast %1308 : vector<2x1xf32> to vector<2x6xf32>
    %1310 = arith.subf %1306, %1309 : vector<2x6xf32>
    %1311 = math.exp %1310 : vector<2x6xf32>
    %cst_111 = arith.constant dense<0.000000e+00> : vector<2xf32>
    %1312 = vector.multi_reduction <add>, %1311, %cst_111 [1] : vector<2x6xf32> to vector<2xf32>
    %1313 = vector.shape_cast %1312 : vector<2xf32> to vector<2x1xf32>
    %1314 = vector.broadcast %1313 : vector<2x1xf32> to vector<2x6xf32>
    %1315 = arith.divf %1311, %1314 : vector<2x6xf32>
    %1316 = tpu.concatenate %36, %197, %358, %519, %680, %841, %1002, %1163 in 1 : vector<2x32xf32>, vector<2x32xf32>, vector<2x32xf32>, vector<2x32xf32>, vector<2x32xf32>, vector<2x32xf32>, vector<2x32xf32>, vector<2x32xf32> -> vector<2x256xf32>
    %c0_112 = arith.constant 0 : index
    %c0_113 = arith.constant 0 : index
    %1317 = vector.load %arg19[%c0_112, %c0_113] : memref<2x256xf32, #tpu.memory_space<vmem>>, vector<2x256xf32>
    tpu.vector_store %arg19[%c0_112, %c0_113], %1316 {strides = array<i32>} : memref<2x256xf32, #tpu.memory_space<vmem>>, vector<2x256xf32>,
    %1318 = tpu.concatenate %112, %273, %434, %595, %756, %917, %1078, %1239 in 1 : vector<2x4xf32>, vector<2x4xf32>, vector<2x4xf32>, vector<2x4xf32>, vector<2x4xf32>, vector<2x4xf32>, vector<2x4xf32>, vector<2x4xf32> -> vector<2x32xf32>
    %c0_114 = arith.constant 0 : index
    %c0_115 = arith.constant 0 : index
    %1319 = vector.load %arg20[%c0_114, %c0_115] : memref<2x32xf32, #tpu.memory_space<vmem>>, vector<2x32xf32>
    tpu.vector_store %arg20[%c0_114, %c0_115], %1318 {strides = array<i32>} : memref<2x32xf32, #tpu.memory_space<vmem>>, vector<2x32xf32>,
    %1320 = tpu.concatenate %188, %349, %510, %671, %832, %993, %1154, %1315 in 1 : vector<2x6xf32>, vector<2x6xf32>, vector<2x6xf32>, vector<2x6xf32>, vector<2x6xf32>, vector<2x6xf32>, vector<2x6xf32>, vector<2x6xf32> -> vector<2x48xf32>
    %c0_116 = arith.constant 0 : index
    %c0_117 = arith.constant 0 : index
    %1321 = vector.load %arg21[%c0_116, %c0_117] : memref<2x48xf32, #tpu.memory_space<vmem>>, vector<2x48xf32>
    tpu.vector_store %arg21[%c0_116, %c0_117], %1320 {strides = array<i32>} : memref<2x48xf32, #tpu.memory_space<vmem>>, vector<2x48xf32>,
    return
  }
}

</mosaic_0001>

<bundles_post_ra>
// kernel: tile.19
= control target key start
LH: loop header
LB: loop body
LE: loop exit
PB: predicated region body
PF: predicated region fallthrough
CT: control target
= control target key end

     0   :  { %vm5_vm0 = vcmask 1045508   ;;  %s12_s6 = smov 48  ;;  %s34_s11 = smov 48  ;;  %vm7_vm1 = vcmask 48128   ;;  %vm18_vm2 = vcmask 392528   ;;  %vm29_vm3 = vcmask 343328   ;;  %s204_s0 = inlined_call_operand.vmem [shape: f32[8,6,6], index: 0, kind: input, shape index: {}]   ;;  %s205_s1 = inlined_call_operand.vmem [shape: f32[48,6], index: 1, kind: output, shape index: {}]  }
   0x1   :  { %v86_v0 = vld [vmem:[%s204_s0 + $0x7] ss:$8 sm:$0xf]   ;;  %v90_v3 = vld [vmem:[%s204_s0 + $0x5] ss:$8 sm:$0xf]  }
   0x2   :  { %v87_v1 = vld [vmem:[%s204_s0 + $0x7] ss:$8 sm:%s12_s6]   ;;  %v91_v4 = vld [vmem:[%s204_s0 + $0x5] ss:$8 sm:%s34_s11]   ;;  %s107_s16 = smov 42   ;;  %s23_s19 = smov 48 }
   0x3   :  { %v15_v2 = vsel %vm5_vm0, %v87_v1, %v86_v0  ;;  %v37_v5 = vsel %vm5_vm0, %v91_v4, %v90_v3  ;;  %v88_v6 = vld [vmem:[%s204_s0 + $0x6] ss:$8 sm:$0xf]   ;;  %s108_s20 = smov 30   ;;  %s45_s25 = smov 48  ;;  %vm40_vm4 = vcmask 294128  }
   0x4   :  { %16 = vrot.lane.b32.xlu0 %v15_v2, %s107_s16  ;;  %38 = vrot.lane.b32.xlu1 %v37_v5, %s108_s20  ;;  %v89_v7 = vld [vmem:[%s204_s0 + $0x6] ss:$8 sm:%s23_s19]   ;;  %s56_s30 = smov 48  ;;  %s109_s4 = smov 36   ;;  %vm51_vm5 = vcmask 244928   ;;  %vm62_vm6 = vcmask 195728  }
   0x5   :  { %v92_v8 = vld [vmem:[%s204_s0 + $0x4] ss:$8 sm:$0xf]   ;;  %v26_v9 = vsel %vm5_vm0, %v89_v7, %v88_v6  ;;  %v94_v11 = vld [vmem:[%s204_s0 + $0x3] ss:$8 sm:$0xf]  }
   0x6   :  { %v93_v10 = vld [vmem:[%s204_s0 + $0x4] ss:$8 sm:%s45_s25]   ;;  %v96_v13 = vld [vmem:[%s204_s0 + $0x2] ss:$8 sm:$0xf]   ;;  %s67_s7 = smov 48 }
   0x7   :  { %v48_v12 = vsel %vm5_vm0, %v93_v10, %v92_v8  ;;  %v95_v14 = vld [vmem:[%s204_s0 + $0x3] ss:$8 sm:%s56_s30]   ;;  %s110_s8 = smov 24   ;;  %v97_v16 = vld [vmem:[%s204_s0 + $0x2] ss:$8 sm:%s67_s7]   ;;  %s78_s11 = smov 48 }
   0x8   :  { %27 = vrot.lane.b32.xlu0 %v26_v9, %s109_s4  ;;  %49 = vrot.lane.b32.xlu1 %v48_v12, %s110_s8  ;;  %v59_v15 = vsel %vm5_vm0, %v95_v14, %v94_v11  ;;  %v70_v17 = vsel %vm5_vm0, %v97_v16, %v96_v13  ;;  %v98_v18 = vld [vmem:[%s204_s0 + $0x1] ss:$8 sm:$0xf]   ;;  %s3_s16 = smov 48  ;;  %s112_s21 = smov 12   ;;  %vm73_vm7 = vcmask 146528  }
   0x9   :  { %v99_v19 = vld [vmem:[%s204_s0 + $0x1] ss:$8 sm:%s78_s11]   ;;  %v2_v20 = vld [vmem:[%s204_s0] ss:$8 sm:$0xf]   ;;  %s113_s24 = smov 6  }
   0xa   :  { %v4_v21 = vld [vmem:[%s204_s0] ss:$8 sm:%s3_s16]   ;;  %s111_s0 = smov 18   ;;  %v81_v23 = vsel %vm5_vm0, %v99_v19, %v98_v18  ;;  %vm84_vm8 = vcmask 97328  }
   0xb   :  { %v6_v22 = vsel %vm5_vm0, %v4_v21, %v2_v20 }
   0xc   :  { %60 = vrot.lane.b32.xlu0 %v59_v15, %s111_s0  ;;  %71 = vrot.lane.b32.xlu1 %v70_v17, %s112_s21  ;;  %8 = vst.msk [vmem:[%s205_s1] sm:$0x3f] %vm7_vm1, %v6_v22  }
  0x10   :  { %82 = vrot.lane.b32.xlu0 %v81_v23, %s113_s24 }
  0x76   :  { %v17_v24 = vpop.permute.xlu0 %16   ;;  %v39_v25 = vpop.permute.xlu1 %38  }
  0x77   :  { %19 = vst.msk [vmem:[%s205_s1] sm:$0x3f] %vm18_vm2, %v17_v24  }
  0x7a   :  { %v28_v26 = vpop.permute.xlu0 %27   ;;  %v50_v27 = vpop.permute.xlu1 %49  }
  0x7b   :  { %30 = vst.msk [vmem:[%s205_s1] sm:$0x3f] %vm29_vm3, %v28_v26  }
  0x7c   :  { %41 = vst.msk [vmem:[%s205_s1] sm:$0x3f] %vm40_vm4, %v39_v25  }
  0x7d   :  { %52 = vst.msk [vmem:[%s205_s1] sm:$0x3f] %vm51_vm5, %v50_v27  }
  0x7e   :  { %v61_v28 = vpop.permute.xlu0 %60   ;;  %v72_v29 = vpop.permute.xlu1 %71  }
  0x7f   :  { %63 = vst.msk [vmem:[%s205_s1] sm:$0x3f] %vm62_vm6, %v61_v28  }
  0x80   :  { %74 = vst.msk [vmem:[%s205_s1] sm:$0x3f] %vm73_vm7, %v72_v29  }
  0x82   :  { %v83_v30 = vpop.permute.xlu0 %82  }
  0x83   :  { %85 = vst.msk [vmem:[%s205_s1] sm:$0x3f] %vm84_vm8, %v83_v30  }

// kernel: spatial_attention_forward.1
= control target key start
LH: loop header
LB: loop body
LE: loop exit
PB: predicated region body
PF: predicated region fallthrough
CT: control target
= control target key end

     0   :  { %v7141_v2 = vmov 0.0|0.0   ;;  %vm5706_vm0 = vmmov 0   ;;  %v7143_v4 = vmov 0.0   ;;  %vm77_vm1 = vcmask 261120   ;;  %s5726_s25 = smov 122   ;;  %s5728_s27 = smov 10   ;;  %s7084_s1 = inlined_call_operand.vmem [shape: f32[2,48], index: 1, kind: input, shape index: {}]   ;;  %s7085_s18 = inlined_call_operand.vmem [shape: f32[2,6], index: 18, kind: input, shape index: {}]   ;;  %s7086_s3 = inlined_call_operand.vmem [shape: f32[32,32], index: 3, kind: input, shape index: {}]   ;;  %s7087_s12 = inlined_call_operand.vmem [shape: f32[42,32], index: 12, kind: input, shape index: {}]   ;;  %s7088_s2 = inlined_call_operand.vmem [shape: f32[2,32], index: 2, kind: input, shape index: {}]   ;;  %s7089_s17 = inlined_call_operand.vmem [shape: f32[2,4], index: 17, kind: input, shape index: {}]   ;;  %s7090_s0 = inlined_call_operand.vmem [shape: f32[2,32], index: 0, kind: input, shape index: {}]   ;;  %s7091_s8 = inlined_call_operand.vmem [shape: f32[32,16], index: 8, kind: input, shape index: {}]   ;;  %s7092_s6 = inlined_call_operand.vmem [shape: f32[192,48], index: 6, kind: input, shape index: {}]   ;;  %s7093_s5 = inlined_call_operand.vmem [shape: f32[2,192], index: 5, kind: input, shape index: {}]   ;;  %s7094_s10 = inlined_call_operand.vmem [shape: f32[1,8], index: 10, kind: input, shape index: {}]   ;;  %s7095_s11 = inlined_call_operand.vmem [shape: f32[1,8], index: 11, kind: input, shape index: {}]   ;;  %s7096_s13 = inlined_call_operand.vmem [shape: f32[1,32], index: 13, kind: input, shape index: {}]   ;;  %s7097_s9 = inlined_call_operand.vmem [shape: f32[1,16], index: 9, kind: input, shape index: {}]   ;;  %s7098_s14 = inlined_call_operand.vmem [shape: f32[32,4], index: 14, kind: input, shape index: {}]   ;;  %s7099_s4 = inlined_call_operand.vmem [shape: f32[1,32], index: 4, kind: input, shape index: {}]   ;;  %s7100_s7 = inlined_call_operand.vmem [shape: f32[1,48], index: 7, kind: input, shape index: {}]   ;;  %s7101_s15 = inlined_call_operand.vmem [shape: f32[48,6], index: 15, kind: input, shape index: {}]   ;;  %s7102_s16 = inlined_call_operand.vmem [shape: f32[2,6], index: 16, kind: input, shape index: {}]   ;;  %s7103_s19 = inlined_call_operand.vmem [shape: f32[2,256], index: 19, kind: output, shape index: {0}]   ;;  %s7104_s20 = inlined_call_operand.vmem [shape: f32[2,32], index: 20, kind: output, shape index: {1}]   ;;  %s7105_s21 = inlined_call_operand.vmem [shape: f32[2,48], index: 21, kind: output, shape index: {2}]  }
   0x1   :  { %7184 = sst [smem:[#allocation29_spill]] %s7084_s1  ;;  %4880 = vmatprep.subr.bf16.mxu0 %v7141_v2  ;;  %4461 = vmatprep.mubr.msk.f32.mxu0 %vm5706_vm0, %v7143_v4  ;;  %vm316_vm2 = vcmask 1041408   ;;  %vm5709_vm3 = vmmov 1   ;;  %v5939_v23 = vld [vmem:[%s7090_s0] sm:$0x3]  ;;  %vm302_vm5 = vcmask 31744  }
   0x2   :  { %7185 = sst [smem:[#allocation30_spill]] %s7085_s18  ;;  %s7190_s26 = sld [smem:[#allocation29_spill]]  ;;  %4886 = vmatprep.subr.bf16.mxu1 %v7141_v2  ;;  %vm5925_vm4 = vmpackc.low %vm316_vm2, %vm5709_vm3  ;;  %vm304_vm6 = vcmask 80896   ;;  %vm312_vm7 = vcmask 343040   ;;  %v266_v28 = vld [vmem:[%s7091_s8] sm:$0xff]  ;;  %v267_v29 = vld [vmem:[%s7091_s8 + $0x8] sm:$0xff] }
   0x3   :  { %7186 = sst [smem:[#allocation31_spill]] %s7086_s3  ;;  %s7191_s28 = sld [smem:[#allocation30_spill]]  ;;  %v268_v30 = vld [vmem:[%s7091_s8 + $0x10] sm:$0xff]  ;;  %v5956_v31 = vpack.c.bf16 %v267_v29, %v266_v28  ;;  %v269_v32 = vld [vmem:[%s7091_s8 + $0x18] sm:$0xff]  ;;  %v152_v34 = vld [vmem:[%s7092_s6] sm:$0xff]  ;;  %v7129_v37 = vmov 1  }
   0x4   :  { %7187 = sst [smem:[#allocation32_spill]] %s7087_s12  ;;  %s5708_s3 = smov 4   ;;  %v5962_v33 = vpack.c.bf16 %v269_v32, %v268_v30  ;;  %v153_v35 = vld [vmem:[%s7092_s6 + $0x8] sm:$0xff]  ;;  %v154_v36 = vld [vmem:[%s7092_s6 + $0x10] sm:$0xff]  ;;  %5218 = vset.pattern.permute.xlu1 %v7129_v37  ;;  %v7119_v38 = vmov 2   ;;  %v155_v40 = vld [vmem:[%s7092_s6 + $0x18] sm:$0xff] }
   0x5   :  { %7188 = sst [smem:[#allocation33_spill]] %s7088_s2  ;;  %s7192_s2 = sld [smem:[#allocation31_spill]]  ;;  %5219 = vset.pattern.permute.xlu0 %v7119_v38  ;;  %v4887_v39 = vpack.c.bf16 %v153_v35, %v152_v34  ;;  %v4890_v41 = vpack.c.bf16 %v155_v40, %v154_v36  ;;  %v156_v43 = vld [vmem:[%s7092_s6 + $0x20] sm:$0xff]  ;;  %v157_v44 = vld [vmem:[%s7092_s6 + $0x28] sm:$0xff]  ;;  %v158_v47 = vld [vmem:[%s7092_s6 + $0x30] sm:$0xff]  ;;  %vm193_vm8 = vcmask 523264  }
   0x6   :  { %7189 = sst [smem:[#allocation34_spill]] %s7089_s17  ;;  %s7193_s12 = sld [smem:[#allocation32_spill]]  ;;  %7198 = vst [vmem:[#allocation2_spill] sm:$0xff] %v5962_v33  ;;  %v4893_v46 = vpack.c.bf16 %v157_v44, %v156_v43  ;;  %v159_v48 = vld [vmem:[%s7092_s6 + $0x38] sm:$0xff]  ;;  %v4216_v50 = vld [vmem:[%s7094_s10] ss:$0 sm:$0xff] }
   0x7   :  { %s7194_s30 = sld [smem:[#allocation33_spill]]  ;;  %s7197_s1 = sld [smem:[#allocation34_spill]]  ;;  %4888 = vmatpush1.bf16.msra.mxu1 %v4887_v39  ;;  %v6000_v49 = vld.sshfl [vmem:[%s7093_s5] sm:$0x33 pattern:$0x76325410]  ;;  %494 = vperm.xlu1 %5218, %v4216_v50   ;;  %v4896_v52 = vpack.c.bf16 %v159_v48, %v158_v47 }
   0x8   :  { %v5866_v0 = vld [vmem:[%s7190_s26] sm:$0x3]  ;;  %4889 = vmatprep.subr.bf16.mxu1 %v7141_v2  ;;  %v191_v51 = vcombine.high %v6000_v49, %v6000_v49  ;;  %v161_v54 = vld [vmem:[%s7092_s6 + $0x48] sm:$0xff]  ;;  %v7115_v55 = vmov 3   ;;  %v7113_v56 = vmov 5   ;;  %v162_v58 = vld [vmem:[%s7092_s6 + $0x50] sm:$0xff] }
   0x9   :  { %v295_v1 = vld [vmem:[%s7191_s28] sm:$0x3]  ;;  %v163_v59 = vld [vmem:[%s7092_s6 + $0x58] sm:$0xff]  ;;  %v7125_v60 = vmov 4   ;;  %v7121_v61 = vmov 7   ;;  %v7117_v43 = vmov 8  }
   0xa   :  { %v297_v5 = vmul.f32 %v295_v1, %v5866_v0  ;;  %4210 = vmatprep.mubr.msk.f32.mxu1 %vm193_vm8, %v191_v51  ;;  %v160_v53 = vld [vmem:[%s7092_s6 + $0x40] sm:$0xff]  ;;  %v4902_v62 = vpack.c.bf16 %v163_v59, %v162_v58  ;;  %v165_v1 = vld [vmem:[%s7092_s6 + $0x68] sm:$0xff]  ;;  %v7109_v47 = vmov 9   ;;  %v7139_v48 = vmov 10   ;;  %s5733_s22 = smov 112   ;;  %s5734_s10 = smov 98  }
   0xb   :  { %v66_v3 = vld [vmem:[%s7192_s2] sm:$0xff]  ;;  %v67_v6 = vld [vmem:[%s7192_s2 + $0x8] sm:$0xff]  ;;  %v68_v7 = vld [vmem:[%s7192_s2 + $0x10] sm:$0xff]  ;;  %4891 = vmatpush1.bf16.msra.mxu1 %v4890_v41  ;;  %5220 = vset.pattern.permute.xlu1 %v7115_v55  ;;  %v4899_v57 = vpack.c.bf16 %v161_v54, %v160_v53  ;;  %v7137_v51 = vmov 11   ;;  %v7131_v58 = vmov 13   ;;  %v7133_v59 = vmov 14  }
   0xc   :  { %v69_v8 = vld [vmem:[%s7192_s2 + $0x18] sm:$0xff]  ;;  %v4881_v9 = vpack.c.bf16 %v67_v6, %v66_v3  ;;  %299 = vrot.lane.b32.xlu0 %v297_v5, %s5708_s3  ;;  %v273_v11 = vld [vmem:[%s7193_s12] sm:$0xff]  ;;  %v274_v12 = vld [vmem:[%s7193_s12 + $0x8] sm:$0xff]  ;;  %4892 = vmatprep.subr.bf16.mxu1 %v7141_v2  ;;  %v7111_v5 = vmov 6   ;;  %vm756_vm9 = vcmask 392192   ;;  %vm644_vm10 = vcmask 25600  }
   0xd   :  { %v4884_v10 = vpack.c.bf16 %v69_v8, %v68_v7  ;;  %v65_v13 = vld [vmem:[%s7194_s30] sm:$0x3]  ;;  %v5899_v14 = vpack.c.bf16 %v274_v12, %v273_v11  ;;  %v275_v15 = vld [vmem:[%s7193_s12 + $0x10] sm:$0xff]  ;;  %v276_v16 = vld [vmem:[%s7193_s12 + $0x18] sm:$0xff]  ;;  %518 = vperm.xlu1 %5220, %v4216_v50   ;;  %v7123_v8 = vmov 0   ;;  %vm832_vm11 = vcmask 41984  }
   0xe   :  { %4882 = vmatpush3.bf16.msra.mxu0 %v4881_v9  ;;  %v5910_v17 = vpack.c.bf16 %v276_v16, %v275_v15  ;;  %v277_v18 = vld [vmem:[%s7193_s12 + $0x20] sm:$0xff]  ;;  %v278_v19 = vld [vmem:[%s7193_s12 + $0x28] sm:$0x3]  ;;  %v166_v6 = vld [vmem:[%s7092_s6 + $0x70] sm:$0xff]  ;;  %s5740_s28 = smov 64   ;;  %s5741_s29 = smov 96  }
   0xf   :  { %4883 = vmatprep.subr.bf16.mxu0 %v7141_v2  ;;  %v5922_v20 = vpack.c.bf16 %v278_v19, %v277_v18  ;;  %v294_v22 = vld [vmem:[%s7197_s1] sm:$0x3]  ;;  %4894 = vmatpush1.bf16.msra.mxu1 %v4893_v46  ;;  %v167_v7 = vld [vmem:[%s7092_s6 + $0x78] sm:$0xff]  ;;  %v169_v12 = vld [vmem:[%s7092_s6 + $0x88] sm:$0xff]  ;;  %v7127_v46 = vmov 15   ;;  %s5730_s1 = smov 120  }
  0x10   :  { %v296_v24 = vmul.f32 %v294_v22, %v5939_v23  ;;  %506 = vperm.xlu0 %5219, %v4216_v50   ;;  %4895 = vmatprep.subr.bf16.mxu1 %v7141_v2  ;;  %v164_v63 = vld [vmem:[%s7092_s6 + $0x60] sm:$0xff]  ;;  %v170_v15 = vld [vmem:[%s7092_s6 + $0x90] sm:$0xff]  ;;  %v171_v16 = vld [vmem:[%s7092_s6 + $0x98] sm:$0xff]  ;;  %s5743_s12 = smov 8   ;;  %s5748_s2 = smov 18   ;;  %vm4093_vm12 = vcmask 785408  }
  0x11   :  { %5221 = vset.pattern.permute.xlu1 %v7125_v60  ;;  %v4905_v3 = vpack.c.bf16 %v165_v1, %v164_v63  ;;  %v6045_v9 = vld [vmem:[%s7095_s11] ss:$0 sm:$0xff]  ;;  %v4914_v18 = vpack.c.bf16 %v171_v16, %v170_v15  ;;  %v173_v22 = vld [vmem:[%s7092_s6 + $0xa8] sm:$0xff]  ;;  %v282_v53 = vld [vmem:[%s7098_s14 + $0x10] sm:$0xff]  ;;  %s5735_s11 = smov 108   ;;  %s5749_s30 = smov 30  }
  0x12   :  { %4885 = vmatpush3.bf16.msra.mxu0 %v4884_v10  ;;  %530 = vperm.xlu1 %5221, %v4216_v50   ;;  %v4908_v10 = vpack.c.bf16 %v167_v7, %v166_v6  ;;  %v168_v11 = vld [vmem:[%s7092_s6 + $0x80] sm:$0xff]  ;;  %v283_v54 = vld [vmem:[%s7098_s14 + $0x18] sm:$0xff]  ;;  %s5750_s8 = smov 42   ;;  %s5751_s17 = smov 28   ;;  %vm4139_vm13 = vcmask 64512   ;;  %vm4141_vm14 = vcmask 97280  }
  0x13   :  { %4922 = vmatprep.subr.bf16.mxu0 %v7141_v2  ;;  %4897 = vmatpush1.bf16.msra.mxu1 %v4896_v52  ;;  %v172_v19 = vld [vmem:[%s7092_s6 + $0xa0] sm:$0xff]  ;;  %vm4143_vm15 = vcmask 130048   ;;  %vm4147_vm2 = vcmask 195584   ;;  %vm4184_vm3 = vcmask 146432  }
  0x14   :  { %5222 = vset.pattern.permute.xlu0 %v7113_v56  ;;  %4898 = vmatprep.subr.bf16.mxu1 %v7141_v2  ;;  %v6091_v28 = vld [vmem:[%s7096_s13] ss:$0 sm:$0xff] }
  0x15   :  { %4462 = vmatmul.mubr.msk.f32.vlgmr.msra.gmra.mrb[0].mxu0 %vm77_vm1, %v65_v13  ;;  %542 = vperm.xlu0 %5222, %v4216_v50   ;;  %v4911_v13 = vpack.c.bf16 %v169_v12, %v168_v11  ;;  %v6103_v35 = vld [vmem:[%s7097_s9] ss:$0 sm:$0xff] }
  0x16   :  { %4924 = vmatpush3.bf16.msra.mxu0 %v5899_v14  ;;  %4476 = vmatprep.mubr.msk.f32.mxu0 %vm5706_vm0, %v7143_v4  ;;  %v4206_v15 = vld [vmem:[%s7099_s4] ss:$0 sm:$0xff]  ;;  %s5744_s4 = smov 20  }
  0x17   :  { %4925 = vmatprep.subr.bf16.mxu0 %v7141_v2  ;;  %4900 = vmatpush1.bf16.msra.mxu1 %v4899_v57  ;;  %v6141_v57 = vpack.c.bf16 %v283_v54, %v282_v53 }
  0x18   :  { %4901 = vmatprep.subr.bf16.mxu1 %v7141_v2  ;;  %5223 = vset.pattern.permute.xlu1 %v7111_v5 }
  0x19   :  { %5226 = vset.pattern.permute.xlu0 %v7121_v61  ;;  %554 = vperm.xlu1 %5223, %v4216_v50  }
  0x1a   :  { %4927 = vmatpush3.bf16.msra.mxu0 %v5910_v17  ;;  %566 = vperm.xlu0 %5226, %v4216_v50  }
  0x1b   :  { %4928 = vmatprep.subr.bf16.mxu0 %v7141_v2  ;;  %4903 = vmatpush1.bf16.msra.mxu1 %v4902_v62 }
  0x1c   :  { %4904 = vmatprep.subr.bf16.mxu1 %v7141_v2 }
  0x1d   :  { %5224 = vset.pattern.permute.xlu1 %v7123_v8 }
  0x1e   :  { %4931 = vmatpush3.bf16.msk.msra.mxu0 %vm5925_vm4, %v5922_v20  ;;  %5227 = vset.pattern.permute.xlu0 %v7123_v8 }
  0x1f   :  { %4932 = vmatprep.subr.bf16.mxu0 %v7141_v2  ;;  %483 = vperm.xlu0 %5227, %v4216_v50   ;;  %v281_v50 = vld [vmem:[%s7098_s14 + $0x8] sm:$0xff] }
  0x20   :  { %4906 = vmatpush1.bf16.msra.mxu1 %v4905_v3  ;;  %668 = vperm.xlu1 %5224, %v6045_v9  }
  0x21   :  { %4907 = vmatprep.subr.bf16.mxu1 %v7141_v2 }
  0x24   :  { %4909 = vmatpush1.bf16.msra.mxu1 %v4908_v10  ;;  %5225 = vset.pattern.permute.xlu1 %v7129_v37 }
  0x25   :  { %4910 = vmatprep.subr.bf16.mxu1 %v7141_v2  ;;  %679 = vperm.xlu1 %5225, %v6045_v9  }
  0x28   :  { %4912 = vmatpush1.bf16.msra.mxu1 %v4911_v13 }
  0x29   :  { %4913 = vmatprep.subr.bf16.mxu1 %v7141_v2 }
  0x2c   :  { %4915 = vmatpush1.bf16.msra.mxu1 %v4914_v18 }
  0x2d   :  { %4916 = vmatprep.subr.bf16.mxu1 %v7141_v2 }
  0x7e   :  { %v300_v25 = vpop.permute.xlu0 %299 }
  0x7f   :  { %v303_v26 = vsel %vm302_vm5, %v296_v24, %v300_v25  ;;  %v4917_v24 = vpack.c.bf16 %v173_v22, %v172_v19  ;;  %v174_v25 = vld [vmem:[%s7092_s6 + $0xb0] sm:$0xff] }
  0x80   :  { %v305_v27 = vsel %vm304_vm6, %v303_v26, 0.0  ;;  %v175_v26 = vld [vmem:[%s7092_s6 + $0xb8] sm:$0xff]  ;;  %s5732_s6 = smov 104  }
  0x81   :  { %4477 = vmatmul.mubr.msk.f32.vlgmr.msra.gmra.mrb[2].mxu0 %vm312_vm7, %v305_v27  ;;  %4918 = vmatpush1.bf16.msra.mxu1 %v4917_v24  ;;  %v4920_v27 = vpack.c.bf16 %v175_v26, %v174_v25 }
  0x82   :  { %4487 = vmatprep.mubr.msk.f32.mxu0 %vm5706_vm0, %v7143_v4  ;;  %4934 = vmatpush3.bf16.msra.mxu0 %v5956_v31 }
  0x83   :  { %4935 = vmatprep.subr.bf16.mxu0 %v7141_v2  ;;  %4919 = vmatprep.subr.bf16.mxu1 %v7141_v2 }
  0x85   :  { %4921 = vmatpush1.bf16.msra.mxu1 %v4920_v27 }
  0x86   :  { %4937 = vmatpush3.bf16.msra.mxu0 %v5962_v33  ;;  %4963 = vmatprep.subr.bf16.mxu1 %v7141_v2  ;;  %v6156_v62 = vpop.permute.xlu1 %494 }
  0x87   :  { %4938 = vmatprep.subr.bf16.mxu0 %v7141_v2  ;;  %7200 = vst [vmem:[#allocation4_spill] sm:$0xff] %v6156_v62 }
  0x88   :  { %261 = vmatmul.mubr.f32.vlgmr.msra.gmra.mrb[0].mxu1 %v6000_v49  ;;  %v280_v49 = vld [vmem:[%s7098_s14] sm:$0xff]  ;;  %s5729_s14 = smov 116  }
  0x89   :  { %4965 = vmatpush3.bf16.msra.mxu1 %v5956_v31  ;;  %4539 = vmatprep.mubr.msk.f32.mxu1 %vm5706_vm0, %v7143_v4  ;;  %v6131_v52 = vpack.c.bf16 %v281_v50, %v280_v49 }
  0x8a   :  { %4966 = vmatprep.subr.bf16.mxu1 %v7141_v2 }
  0x8c   :  { %v6158_v63 = vpop.permute.xlu1 %518 }
  0x8d   :  { %4968 = vmatpush3.bf16.msra.mxu1 %v5962_v33 }
  0x8e   :  { %4969 = vmatprep.subr.bf16.mxu1 %v7141_v2 }
  0x8f   :  { %v6162_v3 = vpop.permute.xlu0 %506 }
  0x90   :  { %7201 = vst [vmem:[#allocation5_spill] sm:$0xff] %v6162_v3 }
  0x91   :  { %v6160_v1 = vpop.permute.xlu1 %530 }
  0x94   :  { %v6166_v7 = vpop.permute.xlu0 %542 }
  0x98   :  { %v6164_v6 = vpop.permute.xlu1 %554 }
  0x99   :  { %v6170_v11 = vpop.permute.xlu0 %566 }
  0x9f   :  { %v6168_v10 = vpop.permute.xlu1 %668 }
  0xa0   :  { %7202 = vst [vmem:[#allocation6_spill] sm:$0xff] %v6168_v10 }
  0xa4   :  { %v6172_v12 = vpop.permute.xlu1 %679 }
  0xa5   :  { %7203 = vst [vmem:[#allocation7_spill] sm:$0xff] %v6172_v12 }
  0xe8   :  { %v5981_v42 = vpop.f32.mrb[0].mxu0 }
  0xe9   :  { %v4463_v45 = vpop.f32.mrb[1].mxu0  ;;  %v6180_v18 = vadd.f32 %v4206_v15, %v5981_v42 }
  0xea   :  { %v7135_v45 = vmov 12  }
 0x154   :  { %v386_v29 = vpop.f32.mrb[2].mxu0 }
 0x155   :  { %v387_v30 = vadd.f32 %v6091_v28, %v386_v29  ;;  %v4478_v32 = vpop.f32.mrb[3].mxu0 }
 0x157   :  { %5361 = vtanh.f32 %v387_v30 }
 0x15b   :  { %v6108_v41 = vpop.f32.mrb[0].mxu1 }
 0x15c   :  { %v264_v44 = vpop.f32.mrb[1].mxu1 }
 0x161   :  { %v6094_v34 = vpop.eup %5361 }
 0x162   :  { %7199 = vst [vmem:[#allocation3_spill] sm:$0xff] %v6094_v34  ;;  %4488 = vmatmul.mubr.msk.f32.vlgmr.msra.gmra.mrb[4].mxu0 %vm77_vm1, %v6094_v34 }
 0x163   :  { %4498 = vmatprep.mubr.msk.f32.mxu0 %vm5706_vm0, %v7143_v4  ;;  %4940 = vmatpush3.bf16.msra.mxu0 %v6131_v52 }
 0x164   :  { %4941 = vmatprep.subr.bf16.mxu0 %v7141_v2 }
 0x167   :  { %4943 = vmatpush3.bf16.msra.mxu0 %v6141_v57 }
 0x168   :  { %4944 = vmatprep.subr.bf16.mxu0 %v7141_v2 }
 0x235   :  { %v466_v36 = vpop.f32.mrb[4].mxu0 }
 0x236   :  { %v467_v39 = vadd.f32 %v6103_v35, %v466_v36  ;;  %v4489_v40 = vpop.f32.mrb[5].mxu0 }
 0x238   :  { %488 = vperm.xlu1 %5225, %v467_v39   ;;  %472 = vperm.xlu0 %5227, %v467_v39  }
 0x23c   :  { %5228 = vset.pattern.permute.xlu1 %v7119_v38  ;;  %5230 = vset.pattern.permute.xlu0 %v7125_v60 }
 0x23d   :  { %500 = vperm.xlu1 %5228, %v467_v39   ;;  %524 = vperm.xlu0 %5230, %v467_v39  }
 0x241   :  { %5229 = vset.pattern.permute.xlu1 %v7115_v55  ;;  %5233 = vset.pattern.permute.xlu0 %v7117_v43 }
 0x242   :  { %512 = vperm.xlu1 %5229, %v467_v39   ;;  %657 = vperm.xlu0 %5233, %v467_v39  }
 0x246   :  { %5231 = vset.pattern.permute.xlu1 %v7113_v56  ;;  %5238 = vset.pattern.permute.xlu0 %v7135_v45 }
 0x247   :  { %536 = vperm.xlu1 %5231, %v467_v39   ;;  %709 = vperm.xlu0 %5238, %v467_v39  }
 0x24b   :  { %5232 = vset.pattern.permute.xlu1 %v7111_v5  ;;  %5243 = vset.pattern.permute.xlu0 %v7127_v46 }
 0x24c   :  { %548 = vperm.xlu1 %5232, %v467_v39   ;;  %745 = vperm.xlu0 %5243, %v467_v39  }
 0x250   :  { %5234 = vset.pattern.permute.xlu1 %v7109_v47  ;;  %5244 = vset.pattern.permute.xlu0 %v7125_v60 }
 0x251   :  { %673 = vperm.xlu1 %5234, %v467_v39   ;;  %715 = vperm.xlu0 %5244, %v6045_v9  }
 0x255   :  { %5235 = vset.pattern.permute.xlu1 %v7121_v61  ;;  %5247 = vset.pattern.permute.xlu0 %v7121_v61 }
 0x256   :  { %560 = vperm.xlu1 %5235, %v467_v39   ;;  %751 = vperm.xlu0 %5247, %v6045_v9  }
 0x25a   :  { %5236 = vset.pattern.permute.xlu1 %v7139_v48  ;;  %5248 = vset.pattern.permute.xlu0 %v7117_v43 }
 0x25b   :  { %685 = vperm.xlu1 %5236, %v467_v39  }
 0x25f   :  { %5237 = vset.pattern.permute.xlu1 %v7137_v51 }
 0x260   :  { %697 = vperm.xlu1 %5237, %v467_v39  }
 0x264   :  { %5239 = vset.pattern.permute.xlu1 %v7131_v58 }
 0x265   :  { %721 = vperm.xlu1 %5239, %v467_v39  }
 0x269   :  { %5240 = vset.pattern.permute.xlu1 %v7133_v59 }
 0x26a   :  { %733 = vperm.xlu1 %5240, %v467_v39  }
 0x26e   :  { %5241 = vset.pattern.permute.xlu1 %v7119_v38 }
 0x26f   :  { %691 = vperm.xlu1 %5241, %v6045_v9  }
 0x273   :  { %5242 = vset.pattern.permute.xlu1 %v7115_v55 }
 0x274   :  { %703 = vperm.xlu1 %5242, %v6045_v9  }
 0x278   :  { %5245 = vset.pattern.permute.xlu1 %v7113_v56 }
 0x279   :  { %727 = vperm.xlu1 %5245, %v6045_v9  }
 0x27d   :  { %5246 = vset.pattern.permute.xlu1 %v7111_v5 }
 0x27e   :  { %739 = vperm.xlu1 %5246, %v6045_v9   ;;  %v6174_v9 = vpop.permute.xlu0 %483 }
 0x27f   :  { %7204 = vst [vmem:[#allocation8_spill] sm:$0xff] %v6174_v9 }
 0x282   :  { %5249 = vset.pattern.permute.xlu1 %v7109_v47 }
 0x2b7   :  { %v489_v13 = vpop.permute.xlu1 %488  ;;  %v473_v19 = vpop.permute.xlu0 %472 }
 0x2b8   :  { %v491_v22 = vadd.f32 %v489_v13, %v6180_v18  ;;  %v475_v24 = vadd.f32 %v473_v19, %v6180_v18 }
 0x2ba   :  { %5363 = vtanh.f32 %v491_v22 }
 0x2bb   :  { %5365 = vtanh.f32 %v475_v24 }
 0x2bc   :  { %v501_v16 = vpop.permute.xlu1 %500  ;;  %v525_v30 = vpop.permute.xlu0 %524 }
 0x2bd   :  { %v503_v26 = vadd.f32 %v501_v16, %v6180_v18  ;;  %v527_v32 = vadd.f32 %v525_v30, %v6180_v18 }
 0x2bf   :  { %5367 = vtanh.f32 %v503_v26 }
 0x2c1   :  { %v513_v25 = vpop.permute.xlu1 %512 }
 0x2c2   :  { %v515_v27 = vadd.f32 %v513_v25, %v6180_v18 }
 0x2c4   :  { %5369 = vtanh.f32 %v515_v27  ;;  %v5364_v39 = vpop.eup %5363  ;;  %v4208_v27 = vld [vmem:[%s7100_s7] ss:$0 sm:$0xff]  ;;  %s5731_s7 = smov 110  }
 0x2c5   :  { %v5366_v40 = vpop.eup %5365  ;;  %5371 = vtanh.f32 %v527_v32  ;;  %v497_v53 = vmul.f32 %v5364_v39, %v6156_v62 }
 0x2c6   :  { %v537_v29 = vpop.permute.xlu1 %536  ;;  %v486_v54 = vmul.f32 %v5366_v40, %v6174_v9  ;;  %v658_v40 = vpop.permute.xlu0 %657 }
 0x2c7   :  { %v539_v36 = vadd.f32 %v537_v29, %v6180_v18 }
 0x2c8   :  { %v498_v16 = vadd.f32 %v497_v53, %v486_v54 }
 0x2c9   :  { %v5368_v49 = vpop.eup %5367  ;;  %5373 = vtanh.f32 %v539_v36  ;;  %v6199_v36 = vadd.f32 %v4208_v27, %v6108_v41  ;;  %v284_v41 = vld [vmem:[%s7101_s15] sm:$0xff] }
 0x2ca   :  { %v509_v15 = vmul.f32 %v5368_v49, %v6162_v3 }
 0x2cb   :  { %v549_v42 = vpop.permute.xlu1 %548  ;;  %v660_v54 = vadd.f32 %v658_v40, %v6199_v36 }
 0x2cc   :  { %v551_v44 = vadd.f32 %v549_v42, %v6180_v18  ;;  %v510_v25 = vadd.f32 %v509_v15, %v498_v16 }
 0x2ce   :  { %v5370_v13 = vpop.eup %5369  ;;  %5375 = vtanh.f32 %v551_v44 }
 0x2cf   :  { %v521_v19 = vmul.f32 %v5370_v13, %v6158_v63  ;;  %v5372_v26 = vpop.eup %5371 }
 0x2d0   :  { %v674_v50 = vpop.permute.xlu1 %673  ;;  %v533_v42 = vmul.f32 %v5372_v26, %v6160_v1  ;;  %v710_v26 = vpop.permute.xlu0 %709 }
 0x2d1   :  { %v522_v29 = vadd.f32 %v521_v19, %v510_v25  ;;  %v676_v53 = vadd.f32 %v674_v50, %v6199_v36  ;;  %v712_v40 = vadd.f32 %v710_v26, %v6199_v36 }
 0x2d3   :  { %v5374_v30 = vpop.eup %5373  ;;  %v534_v44 = vadd.f32 %v533_v42, %v522_v29  ;;  %v286_v42 = vld [vmem:[%s7101_s15 + $0x10] sm:$0xff] }
 0x2d4   :  { %v545_v49 = vmul.f32 %v5374_v30, %v6166_v7 }
 0x2d5   :  { %v561_v22 = vpop.permute.xlu1 %560 }
 0x2d6   :  { %v563_v24 = vadd.f32 %v561_v22, %v6180_v18  ;;  %v546_v16 = vadd.f32 %v545_v49, %v534_v44  ;;  %v285_v22 = vld [vmem:[%s7101_s15 + $0x8] sm:$0xff] }
 0x2d7   :  { %v6213_v29 = vpack.c.bf16 %v285_v22, %v284_v41 }
 0x2d8   :  { %5377 = vtanh.f32 %v563_v24  ;;  %v5376_v39 = vpop.eup %5375 }
 0x2d9   :  { %v557_v13 = vmul.f32 %v5376_v39, %v6164_v6  ;;  %5379 = vtanh.f32 %v676_v53  ;;  %v287_v39 = vld [vmem:[%s7101_s15 + $0x18] sm:$0xff]  ;;  %v288_v53 = vld [vmem:[%s7101_s15 + $0x20] sm:$0xff] }
 0x2da   :  { %v686_v32 = vpop.permute.xlu1 %685  ;;  %5381 = vtanh.f32 %v660_v54  ;;  %v6225_v44 = vpack.c.bf16 %v287_v39, %v286_v42  ;;  %v289_v54 = vld [vmem:[%s7101_s15 + $0x28] sm:$0xff] }
 0x2db   :  { %v688_v19 = vadd.f32 %v686_v32, %v6199_v36  ;;  %v558_v25 = vadd.f32 %v557_v13, %v546_v16 }
 0x2dd   :  { %5383 = vtanh.f32 %v688_v19  ;;  %v6238_v19 = vpack.c.bf16 %v289_v54, %v288_v53 }
 0x2df   :  { %v698_v15 = vpop.permute.xlu1 %697 }
 0x2e0   :  { %v700_v30 = vadd.f32 %v698_v15, %v6199_v36  ;;  %v746_v15 = vpop.permute.xlu0 %745 }
 0x2e1   :  { %v748_v22 = vadd.f32 %v746_v15, %v6199_v36 }
 0x2e2   :  { %v5378_v24 = vpop.eup %5377  ;;  %5385 = vtanh.f32 %v700_v30 }
 0x2e3   :  { %v569_v50 = vmul.f32 %v5378_v24, %v6170_v11  ;;  %v5380_v13 = vpop.eup %5379  ;;  %5387 = vtanh.f32 %v712_v40 }
 0x2e4   :  { %v722_v27 = vpop.permute.xlu1 %721  ;;  %v5382_v41 = vpop.eup %5381  ;;  %v682_v24 = vmul.f32 %v5380_v13, %v6172_v12 }
 0x2e5   :  { %v570_v32 = vadd.f32 %v569_v50, %v558_v25  ;;  %v724_v16 = vadd.f32 %v722_v27, %v6199_v36  ;;  %v671_v30 = vmul.f32 %v5382_v41, %v6168_v10  ;;  %v6253_v13 = vpop.permute.xlu0 %715 }
 0x2e6   :  { %7205 = vst [vmem:[#allocation9_spill] sm:$0xff] %v6253_v13 }
 0x2e7   :  { %4499 = vmatmul.mubr.msk.f32.vlgmr.msra.gmra.mrb[6].mxu0 %vm77_vm1, %v570_v32  ;;  %v5384_v25 = vpop.eup %5383  ;;  %5389 = vtanh.f32 %v724_v16  ;;  %v683_v32 = vadd.f32 %v682_v24, %v671_v30 }
 0x2e8   :  { %4946 = vmatpush3.bf16.msra.mxu0 %v6213_v29  ;;  %4513 = vmatprep.mubr.msk.f32.mxu0 %vm5706_vm0, %v7143_v4  ;;  %5391 = vtanh.f32 %v748_v22 }
 0x2e9   :  { %v734_v49 = vpop.permute.xlu1 %733  ;;  %4947 = vmatprep.subr.bf16.mxu0 %v7141_v2 }
 0x2ea   :  { %v736_v26 = vadd.f32 %v734_v49, %v6199_v36 }
 0x2ec   :  { %4949 = vmatpush3.bf16.msra.mxu0 %v6225_v44  ;;  %v5386_v42 = vpop.eup %5385  ;;  %5393 = vtanh.f32 %v736_v26  ;;  %v6259_v26 = vpop.permute.xlu0 %751 }
 0x2ed   :  { %4950 = vmatprep.subr.bf16.mxu0 %v7141_v2  ;;  %v5388_v54 = vpop.eup %5387  ;;  %7207 = vst [vmem:[#allocation11_spill] sm:$0xff] %v6259_v26 }
 0x2ee   :  { %v6243_v50 = vpop.permute.xlu1 %691  ;;  %v718_v16 = vmul.f32 %v5388_v54, %v6253_v13 }
 0x2ef   :  { %v694_v27 = vmul.f32 %v5384_v25, %v6243_v50 }
 0x2f0   :  { %4952 = vmatpush3.bf16.msra.mxu0 %v6238_v19 }
 0x2f1   :  { %4953 = vmatprep.subr.bf16.mxu0 %v7141_v2  ;;  %v695_v40 = vadd.f32 %v694_v27, %v683_v32  ;;  %v5390_v41 = vpop.eup %5389 }
 0x2f2   :  { %v5392_v24 = vpop.eup %5391 }
 0x2f3   :  { %v6250_v39 = vpop.permute.xlu1 %703 }
 0x2f4   :  { %v706_v53 = vmul.f32 %v5386_v42, %v6250_v39 }
 0x2f6   :  { %v707_v49 = vadd.f32 %v706_v53, %v695_v40  ;;  %v5394_v30 = vpop.eup %5393  ;;  %v754_v40 = vmul.f32 %v5392_v24, %v6259_v26 }
 0x2f8   :  { %v6255_v15 = vpop.permute.xlu1 %727  ;;  %v719_v25 = vadd.f32 %v718_v16, %v707_v49 }
 0x2f9   :  { %7206 = vst [vmem:[#allocation10_spill] sm:$0xff] %v6255_v15  ;;  %v730_v22 = vmul.f32 %v5390_v41, %v6255_v15  ;;  %v290_v41 = vld [vmem:[%s7102_s16] sm:$0x3]  ;;  %s5727_s16 = smov 124  }
 0x2fb   :  { %v731_v27 = vadd.f32 %v730_v22, %v719_v25  ;;  %v6280_v25 = vmul.f32 0.3, %v290_v41 }
 0x2fd   :  { %v6261_v47 = vpop.permute.xlu1 %739 }
 0x2fe   :  { %7208 = vst [vmem:[#allocation12_spill] sm:$0xff] %v6261_v47  ;;  %v742_v32 = vmul.f32 %v5394_v30, %v6261_v47 }
 0x300   :  { %v743_v42 = vadd.f32 %v742_v32, %v731_v27 }
 0x302   :  { %v755_v53 = vadd.f32 %v754_v40, %v743_v42 }
 0x304   :  { %4514 = vmatmul.mubr.msk.f32.vlgmr.msra.gmra.mrb[8].mxu0 %vm756_vm9, %v755_v53 }
 0x305   :  { %4955 = vmatpush3.bf16.msra.mxu0 %v5899_v14  ;;  %4528 = vmatprep.mubr.msk.f32.mxu0 %vm5706_vm0, %v7143_v4 }
 0x306   :  { %4956 = vmatprep.subr.bf16.mxu0 %v7141_v2 }
 0x309   :  { %4958 = vmatpush3.bf16.msra.mxu0 %v5910_v17 }
 0x30a   :  { %4959 = vmatprep.subr.bf16.mxu0 %v7141_v2 }
 0x30d   :  { %4962 = vmatpush3.bf16.msk.msra.mxu0 %vm5925_vm4, %v5922_v20 }
 0x30e   :  { %4975 = vmatprep.subr.bf16.mxu0 %v7141_v2 }
 0x3ba   :  { %v640_v54 = vpop.f32.mrb[6].mxu0 }
 0x3bb   :  { %v4500_v49 = vpop.f32.mrb[7].mxu0  ;;  %v645_v16 = vsel %vm644_vm10, %v640_v54, -inf }
 0x3bc   :  { %646 = vmax.xlane.f32.xlu0 %v645_v16 }
 0x3d2   :  { %850 = vrot.lane.b32.xlu0 %v5866_v0, %s5726_s25 }
 0x3d7   :  { %v826_v22 = vpop.f32.mrb[8].mxu0 }
 0x3d8   :  { %v830_v24 = vmul.f32 0.7, %v826_v22  ;;  %v4515_v30 = vpop.f32.mrb[9].mxu0 }
 0x3da   :  { %v831_v27 = vadd.f32 %v830_v24, %v6280_v25 }
 0x3dc   :  { %v833_v32 = vsel %vm832_vm11, %v831_v27, -inf }
 0x3dd   :  { %834 = vmax.xlane.f32.xlu1 %v833_v32 }
 0x449   :  { %v647_v42 = vpop.xlane.xlu0 %646 }
 0x44a   :  { %v648_v40 = vsub.f32 %v640_v54, %v647_v42 }
 0x44c   :  { %v649_v16 = vmul.f32 1.442695, %v648_v40 }
 0x46a   :  { %v835_v53 = vpop.xlane.xlu1 %834 }
 0x46b   :  { %v836_v49 = vsub.f32 %v831_v27, %v835_v53 }
 0x46d   :  { %v837_v5 = vmul.f32 1.442695, %v836_v49 }
 0x46f   :  { %5395 = vpow2.f32 %v837_v5  ;;  %v851_v5 = vpop.permute.xlu0 %850 }
 0x470   :  { %5397 = vpow2.f32 %v649_v16 }
 0x479   :  { %v5396_v41 = vpop.eup %5395 }
 0x47a   :  { %v839_v22 = vsel %vm832_vm11, %v5396_v41, 0.0  ;;  %v5398_v30 = vpop.eup %5397 }
 0x47b   :  { %840 = vadd.xlane.f32.xlu1 %v839_v22  ;;  %v651_v24 = vsel %vm644_vm10, %v5398_v30, 0.0 }
 0x47f   :  { %652 = vadd.xlane.f32.xlu1 %v651_v24 }
 0x490   :  { %845 = vrot.lane.b32.xlu1 %v5939_v23, %s5727_s16  ;;  %s5738_s16 = smov 100  }
 0x494   :  { %858 = vrot.lane.b32.xlu1 %v6094_v34, %s5728_s27 }
 0x508   :  { %v841_v0 = vpop.xlane.xlu1 %840 }
 0x509   :  { %5399 = vrcp.f32 %v841_v0 }
 0x50c   :  { %v653_v42 = vpop.xlane.xlu1 %652 }
 0x50d   :  { %5401 = vrcp.f32 %v653_v42 }
 0x510   :  { %v846_v23 = vpop.permute.xlu1 %845 }
 0x513   :  { %v5400_v54 = vpop.eup %5399 }
 0x514   :  { %v6290_v27 = vmul.f32 %v5400_v54, %v5396_v41  ;;  %v859_v22 = vpop.permute.xlu1 %858 }
 0x516   :  { %7209 = vst [vmem:[#allocation13_spill] sm:$0xff] %v6290_v27  ;;  %v853_v32 = vmul.f32 %v851_v5, %v6290_v27 }
 0x517   :  { %v5402_v40 = vpop.eup %5401 }
 0x518   :  { %855 = vrot.lane.b32.xlu0 %v853_v32, %s5708_s3  ;;  %v6294_v53 = vmul.f32 %v5402_v40, %v5398_v30 }
 0x51a   :  { %7210 = vst [vmem:[#allocation14_spill] sm:$0xff] %v6294_v53  ;;  %v848_v49 = vmul.f32 %v846_v23, %v6294_v53  ;;  %v7212_v23 = vmov 6  }
 0x58a   :  { %v856_v16 = vpop.permute.xlu0 %855 }
 0x58b   :  { %v861_v24 = vsel %vm302_vm5, %v848_v49, %v856_v16  ;;  %v7213_v49 = vmov 9  }
 0x58c   :  { %v862_v0 = vsel %vm304_vm6, %v861_v24, %v859_v22 }
 0x58d   :  { %4529 = vmatmul.mubr.msk.f32.vlgmr.msra.gmra.mrb[10].mxu0 %vm312_vm7, %v862_v0 }
 0x58e   :  { %4977 = vmatpush3.bf16.msra.mxu0 %v6213_v29  ;;  %4565 = vmatprep.mubr.msk.f32.mxu0 %vm5706_vm0, %v7143_v4 }
 0x58f   :  { %4978 = vmatprep.subr.bf16.mxu0 %v7141_v2 }
 0x592   :  { %4980 = vmatpush3.bf16.msra.mxu0 %v6225_v44 }
 0x593   :  { %4981 = vmatprep.subr.bf16.mxu0 %v7141_v2 }
 0x596   :  { %4983 = vmatpush3.bf16.msra.mxu0 %v6238_v19 }
 0x597   :  { %4994 = vmatprep.subr.bf16.mxu0 %v7141_v2 }
 0x660   :  { %v932_v41 = vpop.f32.mrb[10].mxu0 }
 0x661   :  { %v933_v30 = vadd.f32 %v6091_v28, %v932_v41  ;;  %v4530_v54 = vpop.f32.mrb[11].mxu0 }
 0x663   :  { %5403 = vtanh.f32 %v933_v30 }
 0x66d   :  { %v6309_v5 = vpop.eup %5403 }
 0x66e   :  { %7211 = vst [vmem:[#allocation15_spill] sm:$0xff] %v6309_v5  ;;  %4540 = vmatmul.mubr.msk.f32.vlgmr.msra.gmra.mrb[2].mxu1 %vm77_vm1, %v6309_v5 }
 0x66f   :  { %4971 = vmatpush3.bf16.msra.mxu1 %v6131_v52  ;;  %4550 = vmatprep.mubr.msk.f32.mxu1 %vm5706_vm0, %v7143_v4 }
 0x670   :  { %4972 = vmatprep.subr.bf16.mxu1 %v7141_v2 }
 0x673   :  { %4974 = vmatpush3.bf16.msra.mxu1 %v6141_v57 }
 0x674   :  { %4984 = vmatprep.subr.bf16.mxu1 %v7141_v2 }
 0x741   :  { %v1006_v32 = vpop.f32.mrb[2].mxu1 }
 0x742   :  { %v1007_v42 = vadd.f32 %v6103_v35, %v1006_v32  ;;  %v4541_v40 = vpop.f32.mrb[3].mxu1 }
 0x744   :  { %1166 = vperm.xlu1 %5249, %v1007_v42   ;;  %1159 = vperm.xlu0 %5248, %v1007_v42  }
 0x748   :  { %5250 = vset.pattern.permute.xlu1 %v7139_v48  ;;  %5251 = vset.pattern.permute.xlu0 %v7137_v51 }
 0x749   :  { %1174 = vperm.xlu1 %5250, %v1007_v42   ;;  %1182 = vperm.xlu0 %5251, %v1007_v42  }
 0x74d   :  { %5252 = vset.pattern.permute.xlu1 %v7135_v45  ;;  %5254 = vset.pattern.permute.xlu0 %v7133_v59 }
 0x74e   :  { %1190 = vperm.xlu1 %5252, %v1007_v42   ;;  %1206 = vperm.xlu0 %5254, %v1007_v42  }
 0x752   :  { %5253 = vset.pattern.permute.xlu1 %v7131_v58  ;;  %5257 = vset.pattern.permute.xlu0 %v7129_v37 }
 0x753   :  { %1198 = vperm.xlu1 %5253, %v1007_v42   ;;  %1019 = vperm.xlu0 %5257, %v1007_v42  }
 0x757   :  { %5255 = vset.pattern.permute.xlu1 %v7127_v46  ;;  %5260 = vset.pattern.permute.xlu0 %v7125_v60 }
 0x758   :  { %1214 = vperm.xlu1 %5255, %v1007_v42   ;;  %1043 = vperm.xlu0 %5260, %v1007_v42  }
 0x75c   :  { %5256 = vset.pattern.permute.xlu1 %v7123_v8  ;;  %5263 = vset.pattern.permute.xlu0 %v7121_v61 }
 0x75d   :  { %1012 = vperm.xlu1 %5256, %v1007_v42   ;;  %1067 = vperm.xlu0 %5263, %v1007_v42  }
 0x761   :  { %5258 = vset.pattern.permute.xlu1 %v7119_v38  ;;  %5264 = vset.pattern.permute.xlu0 %v7117_v43 }
 0x762   :  { %1027 = vperm.xlu1 %5258, %v1007_v42  }
 0x766   :  { %5259 = vset.pattern.permute.xlu1 %v7115_v55 }
 0x767   :  { %1035 = vperm.xlu1 %5259, %v1007_v42  }
 0x76b   :  { %5261 = vset.pattern.permute.xlu1 %v7113_v56 }
 0x76c   :  { %1051 = vperm.xlu1 %5261, %v1007_v42  }
 0x770   :  { %5262 = vset.pattern.permute.xlu1 %v7212_v23 }
 0x771   :  { %1059 = vperm.xlu1 %5262, %v1007_v42  }
 0x775   :  { %5265 = vset.pattern.permute.xlu1 %v7213_v49 }
 0x7c3   :  { %v1167_v16 = vpop.permute.xlu1 %1166  ;;  %v1160_v22 = vpop.permute.xlu0 %1159 }
 0x7c4   :  { %v1169_v24 = vadd.f32 %v1167_v16, %v6199_v36  ;;  %v1162_v0 = vadd.f32 %v1160_v22, %v6199_v36 }
 0x7c6   :  { %5405 = vtanh.f32 %v1169_v24 }
 0x7c7   :  { %5407 = vtanh.f32 %v1162_v0 }
 0x7c8   :  { %v1175_v41 = vpop.permute.xlu1 %1174  ;;  %v1183_v30 = vpop.permute.xlu0 %1182 }
 0x7c9   :  { %v1177_v54 = vadd.f32 %v1175_v41, %v6199_v36  ;;  %v1185_v32 = vadd.f32 %v1183_v30, %v6199_v36 }
 0x7cb   :  { %5409 = vtanh.f32 %v1177_v54 }
 0x7cc   :  { %5411 = vtanh.f32 %v1185_v32 }
 0x7cd   :  { %v1191_v40 = vpop.permute.xlu1 %1190  ;;  %v1207_v42 = vpop.permute.xlu0 %1206 }
 0x7ce   :  { %v1193_v56 = vadd.f32 %v1191_v40, %v6199_v36  ;;  %v1209_v16 = vadd.f32 %v1207_v42, %v6199_v36 }
 0x7d0   :  { %v5406_v55 = vpop.eup %5405  ;;  %5413 = vtanh.f32 %v1193_v56 }
 0x7d1   :  { %v5408_v43 = vpop.eup %5407  ;;  %v1171_v22 = vmul.f32 %v5406_v55, %v6172_v12  ;;  %5415 = vtanh.f32 %v1209_v16 }
 0x7d2   :  { %v1164_v24 = vmul.f32 %v5408_v43, %v6168_v10  ;;  %v1199_v0 = vpop.permute.xlu1 %1198  ;;  %v1020_v60 = vpop.permute.xlu0 %1019 }
 0x7d3   :  { %v1201_v41 = vadd.f32 %v1199_v0, %v6199_v36 }
 0x7d4   :  { %v1172_v54 = vadd.f32 %v1171_v22, %v1164_v24  ;;  %v1022_v24 = vadd.f32 %v1020_v60, %v6180_v18 }
 0x7d5   :  { %v5410_v30 = vpop.eup %5409  ;;  %5417 = vtanh.f32 %v1201_v41 }
 0x7d6   :  { %v1179_v32 = vmul.f32 %v5410_v30, %v6243_v50  ;;  %v5412_v38 = vpop.eup %5411 }
 0x7d7   :  { %v1215_v40 = vpop.permute.xlu1 %1214  ;;  %v1187_v8 = vmul.f32 %v5412_v38, %v6250_v39 }
 0x7d8   :  { %v1180_v61 = vadd.f32 %v1179_v32, %v1172_v54  ;;  %v1217_v56 = vadd.f32 %v1215_v40, %v6199_v36 }
 0x7da   :  { %v5414_v42 = vpop.eup %5413  ;;  %5419 = vtanh.f32 %v1217_v56  ;;  %v1188_v55 = vadd.f32 %v1187_v8, %v1180_v61  ;;  %v1044_v56 = vpop.permute.xlu0 %1043 }
 0x7db   :  { %v1195_v43 = vmul.f32 %v5414_v42, %v6253_v13  ;;  %v5416_v41 = vpop.eup %5415  ;;  %v1046_v60 = vadd.f32 %v1044_v56, %v6180_v18 }
 0x7dc   :  { %v1013_v0 = vpop.permute.xlu1 %1012  ;;  %v1211_v40 = vmul.f32 %v5416_v41, %v6261_v47 }
 0x7dd   :  { %v1015_v16 = vadd.f32 %v1013_v0, %v6180_v18  ;;  %v1196_v30 = vadd.f32 %v1195_v43, %v1188_v55 }
 0x7de   :  { %v1068_v41 = vpop.permute.xlu0 %1067 }
 0x7df   :  { %v5418_v22 = vpop.eup %5417  ;;  %5421 = vtanh.f32 %v1015_v16 }
 0x7e0   :  { %v1203_v54 = vmul.f32 %v5418_v22, %v6255_v15  ;;  %5423 = vtanh.f32 %v1022_v24 }
 0x7e1   :  { %v1028_v32 = vpop.permute.xlu1 %1027 }
 0x7e2   :  { %v1204_v38 = vadd.f32 %v1203_v54, %v1196_v30  ;;  %v1030_v61 = vadd.f32 %v1028_v32, %v6180_v18  ;;  %v1070_v32 = vadd.f32 %v1068_v41, %v6180_v18 }
 0x7e4   :  { %v5420_v8 = vpop.eup %5419  ;;  %5425 = vtanh.f32 %v1030_v61  ;;  %v1212_v42 = vadd.f32 %v1211_v40, %v1204_v38 }
 0x7e5   :  { %v1219_v0 = vmul.f32 %v5420_v8, %v6259_v26 }
 0x7e6   :  { %v1036_v46 = vpop.permute.xlu1 %1035 }
 0x7e7   :  { %v1038_v55 = vadd.f32 %v1036_v46, %v6180_v18  ;;  %v1220_v43 = vadd.f32 %v1219_v0, %v1212_v42 }
 0x7e9   :  { %5427 = vtanh.f32 %v1038_v55  ;;  %4566 = vmatmul.mubr.msk.f32.vlgmr.msra.gmra.mrb[12].mxu0 %vm756_vm9, %v1220_v43  ;;  %v5422_v16 = vpop.eup %5421 }
 0x7ea   :  { %4996 = vmatpush3.bf16.msra.mxu0 %v5956_v31  ;;  %4591 = vmatprep.mubr.msk.f32.mxu0 %vm5706_vm0, %v7143_v4  ;;  %5429 = vtanh.f32 %v1046_v60  ;;  %v5424_v30 = vpop.eup %5423  ;;  %v1017_v46 = vmul.f32 %v5422_v16, %v6174_v9 }
 0x7eb   :  { %v1052_v22 = vpop.permute.xlu1 %1051  ;;  %4997 = vmatprep.subr.bf16.mxu0 %v7141_v2  ;;  %v1024_v40 = vmul.f32 %v5424_v30, %v6156_v62 }
 0x7ec   :  { %v1054_v24 = vadd.f32 %v1052_v22, %v6180_v18 }
 0x7ed   :  { %v1025_v56 = vadd.f32 %v1024_v40, %v1017_v46 }
 0x7ee   :  { %v5426_v54 = vpop.eup %5425  ;;  %5431 = vtanh.f32 %v1054_v24  ;;  %4999 = vmatpush3.bf16.msra.mxu0 %v5962_v33 }
 0x7ef   :  { %5006 = vmatprep.subr.bf16.mxu0 %v7141_v2  ;;  %v1032_v38 = vmul.f32 %v5426_v54, %v6162_v3  ;;  %5433 = vtanh.f32 %v1070_v32 }
 0x7f0   :  { %v1060_v61 = vpop.permute.xlu1 %1059 }
 0x7f1   :  { %v1062_v8 = vadd.f32 %v1060_v61, %v6180_v18  ;;  %v1033_v0 = vadd.f32 %v1032_v38, %v1025_v56 }
 0x7f3   :  { %v5428_v42 = vpop.eup %5427  ;;  %5435 = vtanh.f32 %v1062_v8 }
 0x7f4   :  { %v1040_v60 = vmul.f32 %v5428_v42, %v6158_v63  ;;  %v5430_v55 = vpop.eup %5429 }
 0x7f5   :  { %v1048_v41 = vmul.f32 %v5430_v55, %v6160_v1 }
 0x7f6   :  { %v1041_v43 = vadd.f32 %v1040_v60, %v1033_v0 }
 0x7f8   :  { %v5432_v16 = vpop.eup %5431  ;;  %v1049_v22 = vadd.f32 %v1048_v41, %v1041_v43  ;;  %v6392_v43 = vld [vmem:[%s7190_s26] sm:$0x3] }
 0x7f9   :  { %v1056_v24 = vmul.f32 %v5432_v16, %v6166_v7  ;;  %v5434_v30 = vpop.eup %5433 }
 0x7fa   :  { %v1072_v46 = vmul.f32 %v5434_v30, %v6170_v11 }
 0x7fb   :  { %v1057_v37 = vadd.f32 %v1056_v24, %v1049_v22 }
 0x7fd   :  { %v5436_v54 = vpop.eup %5435 }
 0x7fe   :  { %v1064_v61 = vmul.f32 %v5436_v54, %v6164_v6 }
 0x800   :  { %v1065_v32 = vadd.f32 %v1064_v61, %v1057_v37 }
 0x802   :  { %v1073_v40 = vadd.f32 %v1072_v46, %v1065_v32 }
 0x804   :  { %4551 = vmatmul.mubr.msk.f32.vlgmr.msra.gmra.mrb[4].mxu1 %vm77_vm1, %v1073_v40 }
 0x805   :  { %4986 = vmatpush3.bf16.msra.mxu1 %v5899_v14  ;;  %4580 = vmatprep.mubr.msk.f32.mxu1 %vm5706_vm0, %v7143_v4 }
 0x806   :  { %4987 = vmatprep.subr.bf16.mxu1 %v7141_v2 }
 0x809   :  { %4989 = vmatpush3.bf16.msra.mxu1 %v5910_v17 }
 0x80a   :  { %4990 = vmatprep.subr.bf16.mxu1 %v7141_v2 }
 0x80d   :  { %4993 = vmatpush3.bf16.msk.msra.mxu1 %vm5925_vm4, %v5922_v20 }
 0x80e   :  { %5000 = vmatprep.subr.bf16.mxu1 %v7141_v2 }
 0x8bc   :  { %v1290_v37 = vpop.f32.mrb[12].mxu0 }
 0x8bd   :  { %v1294_v38 = vmul.f32 0.7, %v1290_v37  ;;  %v4567_v8 = vpop.f32.mrb[13].mxu0  ;;  %v6401_v37 = vld [vmem:[%s7090_s0] sm:$0x3] }
 0x8bf   :  { %v1295_v56 = vadd.f32 %v1294_v38, %v6280_v25 }
 0x8c1   :  { %v1296_v42 = vsel %vm832_vm11, %v1295_v56, -inf }
 0x8c2   :  { %1297 = vmax.xlane.f32.xlu1 %v1296_v42 }
 0x8d7   :  { %v1143_v0 = vpop.f32.mrb[4].mxu1 }
 0x8d8   :  { %v4552_v60 = vpop.f32.mrb[5].mxu1  ;;  %v1147_v55 = vsel %vm644_vm10, %v1143_v0, -inf }
 0x8d9   :  { %1148 = vmax.xlane.f32.xlu0 %v1147_v55 }
 0x8ef   :  { %1311 = vrot.lane.b32.xlu0 %v6392_v43, %s5729_s14 }
 0x94f   :  { %v1298_v16 = vpop.xlane.xlu1 %1297 }
 0x950   :  { %v1299_v41 = vsub.f32 %v1295_v56, %v1298_v16 }
 0x952   :  { %v1300_v22 = vmul.f32 1.442695, %v1299_v41 }
 0x954   :  { %5437 = vpow2.f32 %v1300_v22 }
 0x95e   :  { %v5438_v24 = vpop.eup %5437 }
 0x95f   :  { %v1302_v30 = vsel %vm832_vm11, %v5438_v24, 0.0 }
 0x960   :  { %1303 = vadd.xlane.f32.xlu1 %v1302_v30 }
 0x966   :  { %v1149_v54 = vpop.xlane.xlu0 %1148 }
 0x967   :  { %v1150_v61 = vsub.f32 %v1143_v0, %v1149_v54 }
 0x969   :  { %v1151_v46 = vmul.f32 1.442695, %v1150_v61 }
 0x96a   :  { %v1312_v56 = vpop.permute.xlu0 %1311 }
 0x96b   :  { %5439 = vpow2.f32 %v1151_v46 }
 0x975   :  { %v5440_v32 = vpop.eup %5439 }
 0x976   :  { %v1153_v40 = vsel %vm644_vm10, %v5440_v32, 0.0 }
 0x977   :  { %1154 = vadd.xlane.f32.xlu1 %v1153_v40 }
 0x988   :  { %1307 = vrot.lane.b32.xlu1 %v6401_v37, %s5730_s1  ;;  %s5745_s1 = smov 16  }
 0x98c   :  { %1319 = vrot.lane.b32.xlu1 %v6309_v5, %s5728_s27 }
 0x9ed   :  { %v1304_v38 = vpop.xlane.xlu1 %1303 }
 0x9ee   :  { %5441 = vrcp.f32 %v1304_v38 }
 0x9f8   :  { %v5442_v8 = vpop.eup %5441 }
 0x9f9   :  { %v6406_v42 = vmul.f32 %v5442_v8, %v5438_v24 }
 0x9fb   :  { %7214 = vst [vmem:[#allocation16_spill] sm:$0xff] %v6406_v42  ;;  %v1314_v0 = vmul.f32 %v1312_v56, %v6406_v42 }
 0x9fd   :  { %1316 = vrot.lane.b32.xlu0 %v1314_v0, %s5708_s3  ;;  %v7217_v0 = vmov 1  }
 0xa04   :  { %v1155_v60 = vpop.xlane.xlu1 %1154 }
 0xa05   :  { %5443 = vrcp.f32 %v1155_v60  ;;  %v7219_v60 = vmov 4  }
 0xa08   :  { %v1308_v41 = vpop.permute.xlu1 %1307 }
 0xa0c   :  { %v1320_v54 = vpop.permute.xlu1 %1319 }
 0xa0f   :  { %v5444_v55 = vpop.eup %5443 }
 0xa10   :  { %v6410_v16 = vmul.f32 %v5444_v55, %v5440_v32  ;;  %v7220_v55 = vmov 0  }
 0xa12   :  { %7215 = vst [vmem:[#allocation17_spill] sm:$0xff] %v6410_v16  ;;  %v1310_v22 = vmul.f32 %v1308_v41, %v6410_v16  ;;  %v7221_v41 = vmov 7  }
 0xa6f   :  { %v1317_v30 = vpop.permute.xlu0 %1316 }
 0xa70   :  { %v1322_v61 = vsel %vm302_vm5, %v1310_v22, %v1317_v30  ;;  %v7222_v22 = vmov 2   ;;  %v7223_v30 = vmov 8  }
 0xa71   :  { %v1323_v46 = vsel %vm304_vm6, %v1322_v61, %v1320_v54  ;;  %v7224_v54 = vmov 3   ;;  %v7225_v61 = vmov 5  }
 0xa72   :  { %4581 = vmatmul.mubr.msk.f32.vlgmr.msra.gmra.mrb[6].mxu1 %vm312_vm7, %v1323_v46 }
 0xa73   :  { %5002 = vmatpush3.bf16.msra.mxu1 %v6131_v52  ;;  %4602 = vmatprep.mubr.msk.f32.mxu1 %vm5706_vm0, %v7143_v4 }
 0xa74   :  { %5003 = vmatprep.subr.bf16.mxu1 %v7141_v2 }
 0xa77   :  { %5005 = vmatpush3.bf16.msra.mxu1 %v6141_v57 }
 0xa78   :  { %5015 = vmatprep.subr.bf16.mxu1 %v7141_v2 }
 0xb45   :  { %v1393_v24 = vpop.f32.mrb[6].mxu1 }
 0xb46   :  { %v1394_v32 = vadd.f32 %v6091_v28, %v1393_v24  ;;  %v4582_v40 = vpop.f32.mrb[7].mxu1 }
 0xb48   :  { %5445 = vtanh.f32 %v1394_v32 }
 0xb52   :  { %v6423_v38 = vpop.eup %5445 }
 0xb53   :  { %7216 = vst [vmem:[#allocation18_spill] sm:$0xff] %v6423_v38  ;;  %4592 = vmatmul.mubr.msk.f32.vlgmr.msra.gmra.mrb[14].mxu0 %vm77_vm1, %v6423_v38 }
 0xb54   :  { %5008 = vmatpush3.bf16.msra.mxu0 %v6213_v29  ;;  %4617 = vmatprep.mubr.msk.f32.mxu0 %vm5706_vm0, %v7143_v4 }
 0xb55   :  { %5009 = vmatprep.subr.bf16.mxu0 %v7141_v2 }
 0xb58   :  { %5011 = vmatpush3.bf16.msra.mxu0 %v6225_v44 }
 0xb59   :  { %5012 = vmatprep.subr.bf16.mxu0 %v7141_v2 }
 0xb5c   :  { %5014 = vmatpush3.bf16.msra.mxu0 %v6238_v19 }
 0xb5d   :  { %5025 = vmatprep.subr.bf16.mxu0 %v7141_v2 }
 0xc26   :  { %v1467_v28 = vpop.f32.mrb[14].mxu0 }
 0xc27   :  { %v1468_v8 = vadd.f32 %v6103_v35, %v1467_v28  ;;  %v4593_v56 = vpop.f32.mrb[15].mxu0  ;;  %v7218_v35 = vmov 15  }
 0xc29   :  { %1627 = vperm.xlu1 %5265, %v1468_v8   ;;  %1620 = vperm.xlu0 %5264, %v1468_v8  }
 0xc2d   :  { %5266 = vset.pattern.permute.xlu1 %v7139_v48  ;;  %5267 = vset.pattern.permute.xlu0 %v7137_v51 }
 0xc2e   :  { %1635 = vperm.xlu1 %5266, %v1468_v8   ;;  %1643 = vperm.xlu0 %5267, %v1468_v8  }
 0xc32   :  { %5268 = vset.pattern.permute.xlu1 %v7135_v45  ;;  %5270 = vset.pattern.permute.xlu0 %v7133_v59 }
 0xc33   :  { %1651 = vperm.xlu1 %5268, %v1468_v8   ;;  %1667 = vperm.xlu0 %5270, %v1468_v8  }
 0xc37   :  { %5269 = vset.pattern.permute.xlu1 %v7131_v58  ;;  %5273 = vset.pattern.permute.xlu0 %v7217_v0 }
 0xc38   :  { %1659 = vperm.xlu1 %5269, %v1468_v8   ;;  %1480 = vperm.xlu0 %5273, %v1468_v8  }
 0xc3c   :  { %5271 = vset.pattern.permute.xlu1 %v7218_v35  ;;  %5276 = vset.pattern.permute.xlu0 %v7219_v60 }
 0xc3d   :  { %1675 = vperm.xlu1 %5271, %v1468_v8   ;;  %1504 = vperm.xlu0 %5276, %v1468_v8  }
 0xc41   :  { %5272 = vset.pattern.permute.xlu1 %v7220_v55  ;;  %5279 = vset.pattern.permute.xlu0 %v7221_v41 }
 0xc42   :  { %1473 = vperm.xlu1 %5272, %v1468_v8   ;;  %1528 = vperm.xlu0 %5279, %v1468_v8  }
 0xc46   :  { %5274 = vset.pattern.permute.xlu1 %v7222_v22  ;;  %5280 = vset.pattern.permute.xlu0 %v7223_v30 }
 0xc47   :  { %1488 = vperm.xlu1 %5274, %v1468_v8  }
 0xc4b   :  { %5275 = vset.pattern.permute.xlu1 %v7224_v54 }
 0xc4c   :  { %1496 = vperm.xlu1 %5275, %v1468_v8  }
 0xc50   :  { %5277 = vset.pattern.permute.xlu1 %v7225_v61 }
 0xc51   :  { %1512 = vperm.xlu1 %5277, %v1468_v8  }
 0xc55   :  { %5278 = vset.pattern.permute.xlu1 %v7212_v23 }
 0xc56   :  { %1520 = vperm.xlu1 %5278, %v1468_v8  }
 0xc5a   :  { %5281 = vset.pattern.permute.xlu1 %v7213_v49 }
 0xca8   :  { %v1628_v46 = vpop.permute.xlu1 %1627  ;;  %v1621_v24 = vpop.permute.xlu0 %1620 }
 0xca9   :  { %v1630_v32 = vadd.f32 %v1628_v46, %v6199_v36  ;;  %v1623_v40 = vadd.f32 %v1621_v24, %v6199_v36 }
 0xcab   :  { %5447 = vtanh.f32 %v1630_v32 }
 0xcac   :  { %5449 = vtanh.f32 %v1623_v40 }
 0xcad   :  { %v1636_v28 = vpop.permute.xlu1 %1635  ;;  %v1644_v56 = vpop.permute.xlu0 %1643 }
 0xcae   :  { %v1638_v58 = vadd.f32 %v1636_v28, %v6199_v36  ;;  %v1646_v59 = vadd.f32 %v1644_v56, %v6199_v36 }
 0xcb0   :  { %5451 = vtanh.f32 %v1638_v58 }
 0xcb1   :  { %5453 = vtanh.f32 %v1646_v59 }
 0xcb2   :  { %v1652_v45 = vpop.permute.xlu1 %1651  ;;  %v1668_v8 = vpop.permute.xlu0 %1667 }
 0xcb3   :  { %v1654_v51 = vadd.f32 %v1652_v45, %v6199_v36  ;;  %v1670_v46 = vadd.f32 %v1668_v8, %v6199_v36 }
 0xcb5   :  { %v5448_v48 = vpop.eup %5447  ;;  %5455 = vtanh.f32 %v1654_v51 }
 0xcb6   :  { %v5450_v2 = vpop.eup %5449  ;;  %v1632_v24 = vmul.f32 %v5448_v48, %v6172_v12  ;;  %5457 = vtanh.f32 %v1670_v46 }
 0xcb7   :  { %v1625_v32 = vmul.f32 %v5450_v2, %v6168_v10  ;;  %v1660_v40 = vpop.permute.xlu1 %1659  ;;  %v1481_v34 = vpop.permute.xlu0 %1480 }
 0xcb8   :  { %v1662_v28 = vadd.f32 %v1660_v40, %v6199_v36 }
 0xcb9   :  { %v1633_v58 = vadd.f32 %v1632_v24, %v1625_v32  ;;  %v1483_v32 = vadd.f32 %v1481_v34, %v6180_v18 }
 0xcba   :  { %v5452_v56 = vpop.eup %5451  ;;  %5459 = vtanh.f32 %v1662_v28 }
 0xcbb   :  { %v1640_v59 = vmul.f32 %v5452_v56, %v6243_v50  ;;  %v5454_v4 = vpop.eup %5453 }
 0xcbc   :  { %v1676_v45 = vpop.permute.xlu1 %1675  ;;  %v1648_v53 = vmul.f32 %v5454_v4, %v6250_v39 }
 0xcbd   :  { %v1641_v27 = vadd.f32 %v1640_v59, %v1633_v58  ;;  %v1678_v51 = vadd.f32 %v1676_v45, %v6199_v36 }
 0xcbf   :  { %v5456_v8 = vpop.eup %5455  ;;  %5461 = vtanh.f32 %v1678_v51  ;;  %v1649_v48 = vadd.f32 %v1648_v53, %v1641_v27  ;;  %v1505_v51 = vpop.permute.xlu0 %1504 }
 0xcc0   :  { %v1656_v2 = vmul.f32 %v5456_v8, %v6253_v13  ;;  %v5458_v28 = vpop.eup %5457  ;;  %v1507_v34 = vadd.f32 %v1505_v51, %v6180_v18 }
 0xcc1   :  { %v1474_v40 = vpop.permute.xlu1 %1473  ;;  %v1672_v45 = vmul.f32 %v5458_v28, %v6261_v47 }
 0xcc2   :  { %v1476_v46 = vadd.f32 %v1474_v40, %v6180_v18  ;;  %v1657_v56 = vadd.f32 %v1656_v2, %v1649_v48 }
 0xcc4   :  { %v5460_v24 = vpop.eup %5459  ;;  %5463 = vtanh.f32 %v1476_v46  ;;  %v7226_v46 = vmov 0.0  }
 0xcc5   :  { %v1664_v58 = vmul.f32 %v5460_v24, %v6255_v15  ;;  %5465 = vtanh.f32 %v1483_v32  ;;  %v1529_v24 = vpop.permute.xlu0 %1528 }
 0xcc6   :  { %v1489_v59 = vpop.permute.xlu1 %1488 }
 0xcc7   :  { %v1665_v4 = vadd.f32 %v1664_v58, %v1657_v56  ;;  %v1491_v27 = vadd.f32 %v1489_v59, %v6180_v18  ;;  %v7227_v56 = vmov 0.0|0.0  }
 0xcc9   :  { %v5462_v53 = vpop.eup %5461  ;;  %5467 = vtanh.f32 %v1491_v27  ;;  %v1673_v8 = vadd.f32 %v1672_v45, %v1665_v4  ;;  %v1531_v4 = vadd.f32 %v1529_v24, %v6180_v18 }
 0xcca   :  { %v1680_v40 = vmul.f32 %v5462_v53, %v6259_v26 }
 0xccb   :  { %v1497_v42 = vpop.permute.xlu1 %1496 }
 0xccc   :  { %v1499_v48 = vadd.f32 %v1497_v42, %v6180_v18  ;;  %v1681_v2 = vadd.f32 %v1680_v40, %v1673_v8 }
 0xcce   :  { %5469 = vtanh.f32 %v1499_v48  ;;  %4618 = vmatmul.mubr.msk.f32.vlgmr.msra.gmra.mrb[16].mxu0 %vm756_vm9, %v1681_v2  ;;  %v5464_v28 = vpop.eup %5463 }
 0xccf   :  { %5027 = vmatpush3.bf16.msra.mxu0 %v5956_v31  ;;  %4643 = vmatprep.mubr.msk.f32.mxu0 %vm5706_vm0, %v7226_v46  ;;  %5471 = vtanh.f32 %v1507_v34  ;;  %v5466_v59 = vpop.eup %5465  ;;  %v1478_v42 = vmul.f32 %v5464_v28, %v6174_v9 }
 0xcd0   :  { %v1513_v32 = vpop.permute.xlu1 %1512  ;;  %5028 = vmatprep.subr.bf16.mxu0 %v7227_v56  ;;  %v1485_v27 = vmul.f32 %v5466_v59, %v6156_v62 }
 0xcd1   :  { %v1515_v58 = vadd.f32 %v1513_v32, %v6180_v18 }
 0xcd2   :  { %v1486_v40 = vadd.f32 %v1485_v27, %v1478_v42 }
 0xcd3   :  { %v5468_v45 = vpop.eup %5467  ;;  %5473 = vtanh.f32 %v1515_v58  ;;  %5030 = vmatpush3.bf16.msra.mxu0 %v5962_v33 }
 0xcd4   :  { %5037 = vmatprep.subr.bf16.mxu0 %v7227_v56  ;;  %v1493_v53 = vmul.f32 %v5468_v45, %v6162_v3  ;;  %5475 = vtanh.f32 %v1531_v4 }
 0xcd5   :  { %v1521_v51 = vpop.permute.xlu1 %1520 }
 0xcd6   :  { %v1523_v8 = vadd.f32 %v1521_v51, %v6180_v18  ;;  %v1494_v48 = vadd.f32 %v1493_v53, %v1486_v40 }
 0xcd8   :  { %v5470_v34 = vpop.eup %5469  ;;  %5477 = vtanh.f32 %v1523_v8 }
 0xcd9   :  { %v1501_v2 = vmul.f32 %v5470_v34, %v6158_v63  ;;  %v5472_v28 = vpop.eup %5471 }
 0xcda   :  { %v1509_v58 = vmul.f32 %v5472_v28, %v6160_v1 }
 0xcdb   :  { %v1502_v24 = vadd.f32 %v1501_v2, %v1494_v48 }
 0xcdd   :  { %v5474_v32 = vpop.eup %5473  ;;  %v1510_v16 = vadd.f32 %v1509_v58, %v1502_v24 }
 0xcde   :  { %v1517_v59 = vmul.f32 %v5474_v32, %v6166_v7  ;;  %v5476_v5 = vpop.eup %5475 }
 0xcdf   :  { %v1533_v42 = vmul.f32 %v5476_v5, %v6170_v11 }
 0xce0   :  { %v1518_v3 = vadd.f32 %v1517_v59, %v1510_v16 }
 0xce2   :  { %v5478_v45 = vpop.eup %5477 }
 0xce3   :  { %v1525_v51 = vmul.f32 %v5478_v45, %v6164_v6 }
 0xce5   :  { %v1526_v4 = vadd.f32 %v1525_v51, %v1518_v3 }
 0xce7   :  { %v1534_v27 = vadd.f32 %v1533_v42, %v1526_v4 }
 0xce9   :  { %4603 = vmatmul.mubr.msk.f32.vlgmr.msra.gmra.mrb[8].mxu1 %vm77_vm1, %v1534_v27 }
 0xcea   :  { %5017 = vmatpush3.bf16.msra.mxu1 %v5899_v14  ;;  %4632 = vmatprep.mubr.msk.f32.mxu1 %vm5706_vm0, %v7226_v46 }
 0xceb   :  { %5018 = vmatprep.subr.bf16.mxu1 %v7227_v56 }
 0xcee   :  { %5020 = vmatpush3.bf16.msra.mxu1 %v5910_v17 }
 0xcef   :  { %5021 = vmatprep.subr.bf16.mxu1 %v7227_v56 }
 0xcf2   :  { %5024 = vmatpush3.bf16.msk.msra.mxu1 %vm5925_vm4, %v5922_v20 }
 0xcf3   :  { %5031 = vmatprep.subr.bf16.mxu1 %v7227_v56 }
 0xda1   :  { %v1751_v3 = vpop.f32.mrb[16].mxu0 }
 0xda2   :  { %v1755_v5 = vmul.f32 0.7, %v1751_v3  ;;  %v4619_v16 = vpop.f32.mrb[17].mxu0 }
 0xda4   :  { %v1756_v53 = vadd.f32 %v1755_v5, %v6280_v25 }
 0xda6   :  { %v1757_v8 = vsel %vm832_vm11, %v1756_v53, -inf }
 0xda7   :  { %1758 = vmax.xlane.f32.xlu1 %v1757_v8 }
 0xdbc   :  { %v1604_v40 = vpop.f32.mrb[8].mxu1 }
 0xdbd   :  { %v4604_v34 = vpop.f32.mrb[9].mxu1  ;;  %v1608_v48 = vsel %vm644_vm10, %v1604_v40, -inf }
 0xdbe   :  { %1609 = vmax.xlane.f32.xlu0 %v1608_v48 }
 0xdd4   :  { %1772 = vrot.lane.b32.xlu0 %v6392_v43, %s5731_s7  ;;  %s5746_s7 = smov 24  }
 0xe34   :  { %v1759_v2 = vpop.xlane.xlu1 %1758 }
 0xe35   :  { %v1760_v28 = vsub.f32 %v1756_v53, %v1759_v2 }
 0xe37   :  { %v1761_v24 = vmul.f32 1.442695, %v1760_v28 }
 0xe39   :  { %5479 = vpow2.f32 %v1761_v24 }
 0xe43   :  { %v5480_v32 = vpop.eup %5479 }
 0xe44   :  { %v1763_v58 = vsel %vm832_vm11, %v5480_v32, 0.0 }
 0xe45   :  { %1764 = vadd.xlane.f32.xlu1 %v1763_v58 }
 0xe4b   :  { %v1610_v59 = vpop.xlane.xlu0 %1609 }
 0xe4c   :  { %v1611_v45 = vsub.f32 %v1604_v40, %v1610_v59 }
 0xe4e   :  { %v1612_v51 = vmul.f32 1.442695, %v1611_v45  ;;  %v6531_v45 = vld [vmem:[%s7096_s13] ss:$0 sm:$0xff] }
 0xe4f   :  { %v1773_v5 = vpop.permute.xlu0 %1772 }
 0xe50   :  { %5481 = vpow2.f32 %v1612_v51 }
 0xe5a   :  { %v5482_v42 = vpop.eup %5481 }
 0xe5b   :  { %v1614_v4 = vsel %vm644_vm10, %v5482_v42, 0.0 }
 0xe5c   :  { %1615 = vadd.xlane.f32.xlu1 %v1614_v4 }
 0xe6d   :  { %1768 = vrot.lane.b32.xlu1 %v6401_v37, %s5729_s14  ;;  %s5742_s14 = smov 12  }
 0xe71   :  { %1780 = vrot.lane.b32.xlu1 %v6423_v38, %s5728_s27 }
 0xed2   :  { %v1765_v27 = vpop.xlane.xlu1 %1764 }
 0xed3   :  { %5483 = vrcp.f32 %v1765_v27 }
 0xedd   :  { %v5484_v3 = vpop.eup %5483 }
 0xede   :  { %v6512_v16 = vmul.f32 %v5484_v3, %v5480_v32  ;;  %v6549_v3 = vld [vmem:[%s7097_s9] ss:$0 sm:$0xff] }
 0xee0   :  { %7228 = vst [vmem:[#allocation19_spill] sm:$0xff] %v6512_v16  ;;  %v1775_v53 = vmul.f32 %v1773_v5, %v6512_v16 }
 0xee2   :  { %1777 = vrot.lane.b32.xlu0 %v1775_v53, %s5708_s3 }
 0xee9   :  { %v1616_v8 = vpop.xlane.xlu1 %1615 }
 0xeea   :  { %5485 = vrcp.f32 %v1616_v8  ;;  %v7231_v8 = vmov 10  }
 0xeed   :  { %v1769_v48 = vpop.permute.xlu1 %1768 }
 0xef1   :  { %v1781_v24 = vpop.permute.xlu1 %1780 }
 0xef4   :  { %v5486_v40 = vpop.eup %5485 }
 0xef5   :  { %v6516_v34 = vmul.f32 %v5486_v40, %v5482_v42  ;;  %v7232_v40 = vmov 11  }
 0xef7   :  { %7229 = vst [vmem:[#allocation20_spill] sm:$0xff] %v6516_v34  ;;  %v1771_v2 = vmul.f32 %v1769_v48, %v6516_v34  ;;  %v7233_v48 = vmov 12  }
 0xf54   :  { %v1778_v28 = vpop.permute.xlu0 %1777 }
 0xf55   :  { %v1783_v58 = vsel %vm302_vm5, %v1771_v2, %v1778_v28  ;;  %v7234_v2 = vmov 14   ;;  %v7235_v28 = vmov 13  }
 0xf56   :  { %v1784_v59 = vsel %vm304_vm6, %v1783_v58, %v1781_v24 }
 0xf57   :  { %4633 = vmatmul.mubr.msk.f32.vlgmr.msra.gmra.mrb[10].mxu1 %vm312_vm7, %v1784_v59 }
 0xf58   :  { %5033 = vmatpush3.bf16.msra.mxu1 %v6131_v52  ;;  %4654 = vmatprep.mubr.msk.f32.mxu1 %vm5706_vm0, %v7226_v46 }
 0xf59   :  { %5034 = vmatprep.subr.bf16.mxu1 %v7227_v56 }
 0xf5c   :  { %5036 = vmatpush3.bf16.msra.mxu1 %v6141_v57 }
 0xf5d   :  { %5046 = vmatprep.subr.bf16.mxu1 %v7227_v56 }
0x102a   :  { %v1854_v32 = vpop.f32.mrb[10].mxu1 }
0x102b   :  { %v1855_v51 = vadd.f32 %v6531_v45, %v1854_v32  ;;  %v4634_v42 = vpop.f32.mrb[11].mxu1 }
0x102d   :  { %5487 = vtanh.f32 %v1855_v51 }
0x1037   :  { %v6534_v4 = vpop.eup %5487 }
0x1038   :  { %7230 = vst [vmem:[#allocation21_spill] sm:$0xff] %v6534_v4  ;;  %4644 = vmatmul.mubr.msk.f32.vlgmr.msra.gmra.mrb[18].mxu0 %vm77_vm1, %v6534_v4 }
0x1039   :  { %5039 = vmatpush3.bf16.msra.mxu0 %v6213_v29  ;;  %4669 = vmatprep.mubr.msk.f32.mxu0 %vm5706_vm0, %v7226_v46 }
0x103a   :  { %5040 = vmatprep.subr.bf16.mxu0 %v7227_v56 }
0x103d   :  { %5042 = vmatpush3.bf16.msra.mxu0 %v6225_v44 }
0x103e   :  { %5043 = vmatprep.subr.bf16.mxu0 %v7227_v56 }
0x1041   :  { %5045 = vmatpush3.bf16.msra.mxu0 %v6238_v19 }
0x1042   :  { %5056 = vmatprep.subr.bf16.mxu0 %v7227_v56 }
0x110b   :  { %v1928_v27 = vpop.f32.mrb[18].mxu0 }
0x110c   :  { %v1929_v5 = vadd.f32 %v6549_v3, %v1928_v27  ;;  %v4645_v53 = vpop.f32.mrb[19].mxu0 }
0x110e   :  { %2088 = vperm.xlu1 %5281, %v1929_v5   ;;  %2081 = vperm.xlu0 %5280, %v1929_v5  }
0x1112   :  { %5282 = vset.pattern.permute.xlu1 %v7231_v8  ;;  %5283 = vset.pattern.permute.xlu0 %v7232_v40 }
0x1113   :  { %2096 = vperm.xlu1 %5282, %v1929_v5   ;;  %2104 = vperm.xlu0 %5283, %v1929_v5  }
0x1117   :  { %5284 = vset.pattern.permute.xlu1 %v7233_v48  ;;  %5286 = vset.pattern.permute.xlu0 %v7234_v2 }
0x1118   :  { %2112 = vperm.xlu1 %5284, %v1929_v5   ;;  %2128 = vperm.xlu0 %5286, %v1929_v5  }
0x111c   :  { %5285 = vset.pattern.permute.xlu1 %v7235_v28  ;;  %5289 = vset.pattern.permute.xlu0 %v7217_v0 }
0x111d   :  { %2120 = vperm.xlu1 %5285, %v1929_v5   ;;  %1941 = vperm.xlu0 %5289, %v1929_v5  }
0x1121   :  { %5287 = vset.pattern.permute.xlu1 %v7218_v35  ;;  %5292 = vset.pattern.permute.xlu0 %v7219_v60 }
0x1122   :  { %2136 = vperm.xlu1 %5287, %v1929_v5   ;;  %1965 = vperm.xlu0 %5292, %v1929_v5  }
0x1126   :  { %5288 = vset.pattern.permute.xlu1 %v7220_v55  ;;  %5295 = vset.pattern.permute.xlu0 %v7221_v41 }
0x1127   :  { %1934 = vperm.xlu1 %5288, %v1929_v5   ;;  %1989 = vperm.xlu0 %5295, %v1929_v5  }
0x112b   :  { %5290 = vset.pattern.permute.xlu1 %v7222_v22  ;;  %5296 = vset.pattern.permute.xlu0 %v7223_v30 }
0x112c   :  { %1949 = vperm.xlu1 %5290, %v1929_v5  }
0x1130   :  { %5291 = vset.pattern.permute.xlu1 %v7224_v54 }
0x1131   :  { %1957 = vperm.xlu1 %5291, %v1929_v5  }
0x1135   :  { %5293 = vset.pattern.permute.xlu1 %v7225_v61 }
0x1136   :  { %1973 = vperm.xlu1 %5293, %v1929_v5  }
0x113a   :  { %5294 = vset.pattern.permute.xlu1 %v7212_v23 }
0x113b   :  { %1981 = vperm.xlu1 %5294, %v1929_v5  }
0x113f   :  { %5297 = vset.pattern.permute.xlu1 %v7213_v49 }
0x118d   :  { %v2089_v24 = vpop.permute.xlu1 %2088  ;;  %v2082_v58 = vpop.permute.xlu0 %2081 }
0x118e   :  { %v2091_v59 = vadd.f32 %v2089_v24, %v6199_v36  ;;  %v2084_v32 = vadd.f32 %v2082_v58, %v6199_v36 }
0x1190   :  { %5489 = vtanh.f32 %v2091_v59 }
0x1191   :  { %5491 = vtanh.f32 %v2084_v32 }
0x1192   :  { %v2097_v51 = vpop.permute.xlu1 %2096  ;;  %v2105_v42 = vpop.permute.xlu0 %2104 }
0x1193   :  { %v2099_v27 = vadd.f32 %v2097_v51, %v6199_v36  ;;  %v2107_v53 = vadd.f32 %v2105_v42, %v6199_v36 }
0x1195   :  { %5493 = vtanh.f32 %v2099_v27 }
0x1196   :  { %5495 = vtanh.f32 %v2107_v53 }
0x1197   :  { %v2113_v16 = vpop.permute.xlu1 %2112  ;;  %v2129_v5 = vpop.permute.xlu0 %2128 }
0x1198   :  { %v2115_v34 = vadd.f32 %v2113_v16, %v6199_v36  ;;  %v2131_v24 = vadd.f32 %v2129_v5, %v6199_v36 }
0x119a   :  { %v5490_v38 = vpop.eup %5489  ;;  %5497 = vtanh.f32 %v2115_v34 }
0x119b   :  { %v5492_v49 = vpop.eup %5491  ;;  %v2093_v58 = vmul.f32 %v5490_v38, %v6172_v12  ;;  %5499 = vtanh.f32 %v2131_v24 }
0x119c   :  { %v2086_v59 = vmul.f32 %v5492_v49, %v6168_v10  ;;  %v2121_v32 = vpop.permute.xlu1 %2120  ;;  %v1942_v10 = vpop.permute.xlu0 %1941 }
0x119d   :  { %v2123_v51 = vadd.f32 %v2121_v32, %v6199_v36 }
0x119e   :  { %v2094_v27 = vadd.f32 %v2093_v58, %v2086_v59  ;;  %v1944_v59 = vadd.f32 %v1942_v10, %v6180_v18 }
0x119f   :  { %v5494_v42 = vpop.eup %5493  ;;  %5501 = vtanh.f32 %v2123_v51 }
0x11a0   :  { %v2101_v53 = vmul.f32 %v5494_v42, %v6243_v50  ;;  %v5496_v23 = vpop.eup %5495 }
0x11a1   :  { %v2137_v16 = vpop.permute.xlu1 %2136  ;;  %v2109_v54 = vmul.f32 %v5496_v23, %v6250_v39 }
0x11a2   :  { %v2102_v61 = vadd.f32 %v2101_v53, %v2094_v27  ;;  %v2139_v34 = vadd.f32 %v2137_v16, %v6199_v36 }
0x11a4   :  { %v5498_v5 = vpop.eup %5497  ;;  %5503 = vtanh.f32 %v2139_v34  ;;  %v2110_v38 = vadd.f32 %v2109_v54, %v2102_v61  ;;  %v1966_v34 = vpop.permute.xlu0 %1965 }
0x11a5   :  { %v2117_v49 = vmul.f32 %v5498_v5, %v6253_v13  ;;  %v5500_v51 = vpop.eup %5499  ;;  %v1968_v10 = vadd.f32 %v1966_v34, %v6180_v18 }
0x11a6   :  { %v1935_v32 = vpop.permute.xlu1 %1934  ;;  %v2133_v16 = vmul.f32 %v5500_v51, %v6261_v47 }
0x11a7   :  { %v1937_v24 = vadd.f32 %v1935_v32, %v6180_v18  ;;  %v2118_v42 = vadd.f32 %v2117_v49, %v2110_v38 }
0x11a8   :  { %v1990_v51 = vpop.permute.xlu0 %1989 }
0x11a9   :  { %v5502_v58 = vpop.eup %5501  ;;  %5505 = vtanh.f32 %v1937_v24 }
0x11aa   :  { %v2125_v27 = vmul.f32 %v5502_v58, %v6255_v15  ;;  %5507 = vtanh.f32 %v1944_v59 }
0x11ab   :  { %v1950_v53 = vpop.permute.xlu1 %1949 }
0x11ac   :  { %v2126_v23 = vadd.f32 %v2125_v27, %v2118_v42  ;;  %v1952_v54 = vadd.f32 %v1950_v53, %v6180_v18  ;;  %v1992_v53 = vadd.f32 %v1990_v51, %v6180_v18 }
0x11ae   :  { %v5504_v61 = vpop.eup %5503  ;;  %5509 = vtanh.f32 %v1952_v54  ;;  %v2134_v5 = vadd.f32 %v2133_v16, %v2126_v23  ;;  %v7236_v23 = vld [vmem:[#allocation5_spill] sm:$0xff] }
0x11af   :  { %v2141_v32 = vmul.f32 %v5504_v61, %v6259_v26 }
0x11b0   :  { %v1958_v13 = vpop.permute.xlu1 %1957 }
0x11b1   :  { %v1960_v38 = vadd.f32 %v1958_v13, %v6180_v18  ;;  %v2142_v49 = vadd.f32 %v2141_v32, %v2134_v5 }
0x11b3   :  { %5511 = vtanh.f32 %v1960_v38  ;;  %4670 = vmatmul.mubr.msk.f32.vlgmr.msra.gmra.mrb[20].mxu0 %vm756_vm9, %v2142_v49  ;;  %v5506_v24 = vpop.eup %5505 }
0x11b4   :  { %5058 = vmatpush3.bf16.msra.mxu0 %v5956_v31  ;;  %4695 = vmatprep.mubr.msk.f32.mxu0 %vm5706_vm0, %v7226_v46  ;;  %5513 = vtanh.f32 %v1968_v10  ;;  %v5508_v42 = vpop.eup %5507  ;;  %v1939_v13 = vmul.f32 %v5506_v24, %v6174_v9 }
0x11b5   :  { %v1974_v58 = vpop.permute.xlu1 %1973  ;;  %5059 = vmatprep.subr.bf16.mxu0 %v7227_v56  ;;  %v1946_v16 = vmul.f32 %v5508_v42, %v6156_v62 }
0x11b6   :  { %v1976_v59 = vadd.f32 %v1974_v58, %v6180_v18 }
0x11b7   :  { %v1947_v5 = vadd.f32 %v1946_v16, %v1939_v13 }
0x11b8   :  { %v5510_v27 = vpop.eup %5509  ;;  %5515 = vtanh.f32 %v1976_v59  ;;  %5061 = vmatpush3.bf16.msra.mxu0 %v5962_v33 }
0x11b9   :  { %5068 = vmatprep.subr.bf16.mxu0 %v7227_v56  ;;  %v1954_v54 = vmul.f32 %v5510_v27, %v7236_v23  ;;  %5517 = vtanh.f32 %v1992_v53 }
0x11ba   :  { %v1982_v61 = vpop.permute.xlu1 %1981 }
0x11bb   :  { %v1984_v34 = vadd.f32 %v1982_v61, %v6180_v18  ;;  %v1955_v10 = vadd.f32 %v1954_v54, %v1947_v5 }
0x11bd   :  { %v5512_v32 = vpop.eup %5511  ;;  %5519 = vtanh.f32 %v1984_v34 }
0x11be   :  { %v1962_v38 = vmul.f32 %v5512_v32, %v6158_v63  ;;  %v5514_v49 = vpop.eup %5513 }
0x11bf   :  { %v1970_v58 = vmul.f32 %v5514_v49, %v6160_v1 }
0x11c0   :  { %v1963_v24 = vadd.f32 %v1962_v38, %v1955_v10 }
0x11c2   :  { %v5516_v51 = vpop.eup %5515  ;;  %v1971_v59 = vadd.f32 %v1970_v58, %v1963_v24 }
0x11c3   :  { %v1978_v42 = vmul.f32 %v5516_v51, %v6166_v7  ;;  %v5518_v62 = vpop.eup %5517 }
0x11c4   :  { %v1994_v13 = vmul.f32 %v5518_v62, %v6170_v11 }
0x11c5   :  { %v1979_v23 = vadd.f32 %v1978_v42, %v1971_v59 }
0x11c7   :  { %v5520_v27 = vpop.eup %5519 }
0x11c8   :  { %v1986_v61 = vmul.f32 %v5520_v27, %v6164_v6 }
0x11ca   :  { %v1987_v53 = vadd.f32 %v1986_v61, %v1979_v23 }
0x11cc   :  { %v1995_v16 = vadd.f32 %v1994_v13, %v1987_v53 }
0x11ce   :  { %4655 = vmatmul.mubr.msk.f32.vlgmr.msra.gmra.mrb[12].mxu1 %vm77_vm1, %v1995_v16 }
0x11cf   :  { %5048 = vmatpush3.bf16.msra.mxu1 %v5899_v14  ;;  %4684 = vmatprep.mubr.msk.f32.mxu1 %vm5706_vm0, %v7226_v46 }
0x11d0   :  { %5049 = vmatprep.subr.bf16.mxu1 %v7227_v56 }
0x11d3   :  { %5051 = vmatpush3.bf16.msra.mxu1 %v5910_v17 }
0x11d4   :  { %5052 = vmatprep.subr.bf16.mxu1 %v7227_v56 }
0x11d7   :  { %5055 = vmatpush3.bf16.msk.msra.mxu1 %vm5925_vm4, %v5922_v20 }
0x11d8   :  { %5062 = vmatprep.subr.bf16.mxu1 %v7227_v56 }
0x1286   :  { %v2212_v62 = vpop.f32.mrb[20].mxu0 }
0x1287   :  { %v2216_v23 = vmul.f32 0.7, %v2212_v62  ;;  %v4671_v54 = vpop.f32.mrb[21].mxu0 }
0x1289   :  { %v2217_v34 = vadd.f32 %v2216_v23, %v6280_v25 }
0x128b   :  { %v2218_v5 = vsel %vm832_vm11, %v2217_v34, -inf }
0x128c   :  { %2219 = vmax.xlane.f32.xlu1 %v2218_v5 }
0x12a1   :  { %v2065_v32 = vpop.f32.mrb[12].mxu1 }
0x12a2   :  { %v4656_v10 = vpop.f32.mrb[13].mxu1  ;;  %v2069_v38 = vsel %vm644_vm10, %v2065_v32, -inf }
0x12a3   :  { %2070 = vmax.xlane.f32.xlu0 %v2069_v38 }
0x12b9   :  { %2233 = vrot.lane.b32.xlu0 %v6392_v43, %s5732_s6 }
0x1319   :  { %v2220_v49 = vpop.xlane.xlu1 %2219 }
0x131a   :  { %v2221_v24 = vsub.f32 %v2217_v34, %v2220_v49 }
0x131c   :  { %v2222_v51 = vmul.f32 1.442695, %v2221_v24 }
0x131e   :  { %5521 = vpow2.f32 %v2222_v51 }
0x1328   :  { %v5522_v58 = vpop.eup %5521 }
0x1329   :  { %v2224_v59 = vsel %vm832_vm11, %v5522_v58, 0.0 }
0x132a   :  { %2225 = vadd.xlane.f32.xlu1 %v2224_v59 }
0x1330   :  { %v2071_v42 = vpop.xlane.xlu0 %2070 }
0x1331   :  { %v2072_v27 = vsub.f32 %v2065_v32, %v2071_v42 }
0x1333   :  { %v2073_v61 = vmul.f32 1.442695, %v2072_v27 }
0x1334   :  { %v2234_v62 = vpop.permute.xlu0 %2233 }
0x1335   :  { %5523 = vpow2.f32 %v2073_v61 }
0x133f   :  { %v5524_v13 = vpop.eup %5523 }
0x1340   :  { %v2075_v53 = vsel %vm644_vm10, %v5524_v13, 0.0 }
0x1341   :  { %2076 = vadd.xlane.f32.xlu1 %v2075_v53 }
0x1352   :  { %2229 = vrot.lane.b32.xlu1 %v6401_v37, %s5733_s22 }
0x1356   :  { %2241 = vrot.lane.b32.xlu1 %v6534_v4, %s5728_s27 }
0x13b7   :  { %v2226_v43 = vpop.xlane.xlu1 %2225 }
0x13b8   :  { %5525 = vrcp.f32 %v2226_v43  ;;  %v7240_v43 = vmov 3  }
0x13c2   :  { %v5526_v16 = vpop.eup %5525 }
0x13c3   :  { %v6628_v23 = vmul.f32 %v5526_v16, %v5522_v58  ;;  %v7241_v16 = vmov 5  }
0x13c5   :  { %7237 = vst [vmem:[#allocation22_spill] sm:$0xff] %v6628_v23  ;;  %v2236_v54 = vmul.f32 %v2234_v62, %v6628_v23  ;;  %v7242_v62 = vmov 6  }
0x13c7   :  { %2238 = vrot.lane.b32.xlu0 %v2236_v54, %s5708_s3  ;;  %v7243_v54 = vmov 9  }
0x13ce   :  { %v2077_v34 = vpop.xlane.xlu1 %2076 }
0x13cf   :  { %5527 = vrcp.f32 %v2077_v34 }
0x13d2   :  { %v2230_v10 = vpop.permute.xlu1 %2229 }
0x13d6   :  { %v2242_v49 = vpop.permute.xlu1 %2241 }
0x13d9   :  { %v5528_v5 = vpop.eup %5527 }
0x13da   :  { %v6632_v32 = vmul.f32 %v5528_v5, %v5524_v13 }
0x13dc   :  { %7238 = vst [vmem:[#allocation23_spill] sm:$0xff] %v6632_v32  ;;  %v2232_v37 = vmul.f32 %v2230_v10, %v6632_v32 }
0x1439   :  { %v2239_v38 = vpop.permute.xlu0 %2238 }
0x143a   :  { %v2244_v24 = vsel %vm302_vm5, %v2232_v37, %v2239_v38 }
0x143b   :  { %v2245_v51 = vsel %vm304_vm6, %v2244_v24, %v2242_v49 }
0x143c   :  { %4685 = vmatmul.mubr.msk.f32.vlgmr.msra.gmra.mrb[14].mxu1 %vm312_vm7, %v2245_v51 }
0x143d   :  { %5064 = vmatpush3.bf16.msra.mxu1 %v6131_v52  ;;  %4706 = vmatprep.mubr.msk.f32.mxu1 %vm5706_vm0, %v7226_v46 }
0x143e   :  { %5065 = vmatprep.subr.bf16.mxu1 %v7227_v56 }
0x1441   :  { %5067 = vmatpush3.bf16.msra.mxu1 %v6141_v57 }
0x1442   :  { %5077 = vmatprep.subr.bf16.mxu1 %v7227_v56 }
0x150f   :  { %v2315_v58 = vpop.f32.mrb[14].mxu1 }
0x1510   :  { %v2316_v59 = vadd.f32 %v6531_v45, %v2315_v58  ;;  %v4686_v42 = vpop.f32.mrb[15].mxu1 }
0x1512   :  { %5529 = vtanh.f32 %v2316_v59 }
0x151c   :  { %v6645_v27 = vpop.eup %5529 }
0x151d   :  { %7239 = vst [vmem:[#allocation24_spill] sm:$0xff] %v6645_v27  ;;  %4696 = vmatmul.mubr.msk.f32.vlgmr.msra.gmra.mrb[22].mxu0 %vm77_vm1, %v6645_v27 }
0x151e   :  { %5070 = vmatpush3.bf16.msra.mxu0 %v6213_v29  ;;  %4721 = vmatprep.mubr.msk.f32.mxu0 %vm5706_vm0, %v7226_v46 }
0x151f   :  { %5071 = vmatprep.subr.bf16.mxu0 %v7227_v56 }
0x1522   :  { %5073 = vmatpush3.bf16.msra.mxu0 %v6225_v44 }
0x1523   :  { %5074 = vmatprep.subr.bf16.mxu0 %v7227_v56 }
0x1526   :  { %5076 = vmatpush3.bf16.msra.mxu0 %v6238_v19 }
0x1527   :  { %5087 = vmatprep.subr.bf16.mxu0 %v7227_v56 }
0x15f0   :  { %v2389_v61 = vpop.f32.mrb[22].mxu0 }
0x15f1   :  { %v2390_v13 = vadd.f32 %v6549_v3, %v2389_v61  ;;  %v4697_v53 = vpop.f32.mrb[23].mxu0 }
0x15f3   :  { %2549 = vperm.xlu1 %5297, %v2390_v13   ;;  %2542 = vperm.xlu0 %5296, %v2390_v13  }
0x15f7   :  { %5298 = vset.pattern.permute.xlu1 %v7231_v8  ;;  %5299 = vset.pattern.permute.xlu0 %v7232_v40 }
0x15f8   :  { %2557 = vperm.xlu1 %5298, %v2390_v13   ;;  %2565 = vperm.xlu0 %5299, %v2390_v13  }
0x15fc   :  { %5300 = vset.pattern.permute.xlu1 %v7233_v48  ;;  %5302 = vset.pattern.permute.xlu0 %v7234_v2 }
0x15fd   :  { %2573 = vperm.xlu1 %5300, %v2390_v13   ;;  %2589 = vperm.xlu0 %5302, %v2390_v13  }
0x1601   :  { %5301 = vset.pattern.permute.xlu1 %v7235_v28  ;;  %5305 = vset.pattern.permute.xlu0 %v7217_v0 }
0x1602   :  { %2581 = vperm.xlu1 %5301, %v2390_v13   ;;  %2402 = vperm.xlu0 %5305, %v2390_v13  }
0x1606   :  { %5303 = vset.pattern.permute.xlu1 %v7218_v35  ;;  %5308 = vset.pattern.permute.xlu0 %v7219_v60 }
0x1607   :  { %2597 = vperm.xlu1 %5303, %v2390_v13   ;;  %2426 = vperm.xlu0 %5308, %v2390_v13  }
0x160b   :  { %5304 = vset.pattern.permute.xlu1 %v7220_v55  ;;  %5311 = vset.pattern.permute.xlu0 %v7221_v41 }
0x160c   :  { %2395 = vperm.xlu1 %5304, %v2390_v13   ;;  %2450 = vperm.xlu0 %5311, %v2390_v13  }
0x1610   :  { %5306 = vset.pattern.permute.xlu1 %v7222_v22  ;;  %5312 = vset.pattern.permute.xlu0 %v7223_v30 }
0x1611   :  { %2410 = vperm.xlu1 %5306, %v2390_v13  }
0x1615   :  { %5307 = vset.pattern.permute.xlu1 %v7240_v43 }
0x1616   :  { %2418 = vperm.xlu1 %5307, %v2390_v13  }
0x161a   :  { %5309 = vset.pattern.permute.xlu1 %v7241_v16 }
0x161b   :  { %2434 = vperm.xlu1 %5309, %v2390_v13  }
0x161f   :  { %5310 = vset.pattern.permute.xlu1 %v7242_v62 }
0x1620   :  { %2442 = vperm.xlu1 %5310, %v2390_v13  }
0x1624   :  { %5313 = vset.pattern.permute.xlu1 %v7243_v54 }
0x1672   :  { %v2550_v34 = vpop.permute.xlu1 %2549  ;;  %v2543_v5 = vpop.permute.xlu0 %2542 }
0x1673   :  { %v2552_v10 = vadd.f32 %v2550_v34, %v6199_v36  ;;  %v2545_v37 = vadd.f32 %v2543_v5, %v6199_v36  ;;  %v7244_v5 = vld [vmem:[#allocation6_spill] sm:$0xff] }
0x1675   :  { %5531 = vtanh.f32 %v2552_v10 }
0x1676   :  { %5533 = vtanh.f32 %v2545_v37 }
0x1677   :  { %v2558_v38 = vpop.permute.xlu1 %2557  ;;  %v2566_v49 = vpop.permute.xlu0 %2565 }
0x1678   :  { %v2560_v24 = vadd.f32 %v2558_v38, %v6199_v36  ;;  %v2568_v51 = vadd.f32 %v2566_v49, %v6199_v36 }
0x167a   :  { %5535 = vtanh.f32 %v2560_v24 }
0x167b   :  { %5537 = vtanh.f32 %v2568_v51 }
0x167c   :  { %v2574_v58 = vpop.permute.xlu1 %2573  ;;  %v2590_v59 = vpop.permute.xlu0 %2589 }
0x167d   :  { %v2576_v42 = vadd.f32 %v2574_v58, %v6199_v36  ;;  %v2592_v13 = vadd.f32 %v2590_v59, %v6199_v36 }
0x167f   :  { %v5532_v61 = vpop.eup %5531  ;;  %5539 = vtanh.f32 %v2576_v42 }
0x1680   :  { %v5534_v53 = vpop.eup %5533  ;;  %v2554_v34 = vmul.f32 %v5532_v61, %v6172_v12  ;;  %5541 = vtanh.f32 %v2592_v13 }
0x1681   :  { %v2547_v10 = vmul.f32 %v5534_v53, %v7244_v5  ;;  %v2582_v37 = vpop.permute.xlu1 %2581  ;;  %v7245_v53 = vld [vmem:[#allocation9_spill] sm:$0xff]  ;;  %v2403_v12 = vpop.permute.xlu0 %2402 }
0x1682   :  { %v2584_v38 = vadd.f32 %v2582_v37, %v6199_v36 }
0x1683   :  { %v2555_v24 = vadd.f32 %v2554_v34, %v2547_v10  ;;  %v2405_v10 = vadd.f32 %v2403_v12, %v6180_v18 }
0x1684   :  { %v5536_v49 = vpop.eup %5535  ;;  %5543 = vtanh.f32 %v2584_v38 }
0x1685   :  { %v2562_v51 = vmul.f32 %v5536_v49, %v6243_v50  ;;  %v5538_v23 = vpop.eup %5537 }
0x1686   :  { %v2598_v58 = vpop.permute.xlu1 %2597  ;;  %v2570_v4 = vmul.f32 %v5538_v23, %v6250_v39 }
0x1687   :  { %v2563_v32 = vadd.f32 %v2562_v51, %v2555_v24  ;;  %v2600_v42 = vadd.f32 %v2598_v58, %v6199_v36 }
0x1689   :  { %v5540_v59 = vpop.eup %5539  ;;  %5545 = vtanh.f32 %v2600_v42  ;;  %v2571_v61 = vadd.f32 %v2570_v4, %v2563_v32  ;;  %v2427_v42 = vpop.permute.xlu0 %2426 }
0x168a   :  { %v2578_v5 = vmul.f32 %v5540_v59, %v7245_v53  ;;  %v5542_v38 = vpop.eup %5541  ;;  %v2429_v12 = vadd.f32 %v2427_v42, %v6180_v18 }
0x168b   :  { %v2396_v37 = vpop.permute.xlu1 %2395  ;;  %v2594_v58 = vmul.f32 %v5542_v38, %v6261_v47 }
0x168c   :  { %v2398_v13 = vadd.f32 %v2396_v37, %v6180_v18  ;;  %v2579_v49 = vadd.f32 %v2578_v5, %v2571_v61 }
0x168d   :  { %v2451_v38 = vpop.permute.xlu0 %2450 }
0x168e   :  { %v5544_v34 = vpop.eup %5543  ;;  %5547 = vtanh.f32 %v2398_v13 }
0x168f   :  { %v2586_v24 = vmul.f32 %v5544_v34, %v6255_v15  ;;  %5549 = vtanh.f32 %v2405_v10 }
0x1690   :  { %v2411_v51 = vpop.permute.xlu1 %2410 }
0x1691   :  { %v2587_v23 = vadd.f32 %v2586_v24, %v2579_v49  ;;  %v2413_v4 = vadd.f32 %v2411_v51, %v6180_v18  ;;  %v2453_v51 = vadd.f32 %v2451_v38, %v6180_v18 }
0x1693   :  { %v5546_v32 = vpop.eup %5545  ;;  %5551 = vtanh.f32 %v2413_v4  ;;  %v2595_v59 = vadd.f32 %v2594_v58, %v2587_v23  ;;  %v7246_v58 = vld [vmem:[#allocation4_spill] sm:$0xff]  ;;  %v7247_v4 = vld [vmem:[#allocation5_spill] sm:$0xff] }
0x1694   :  { %v2602_v37 = vmul.f32 %v5546_v32, %v6259_v26 }
0x1695   :  { %v2419_v53 = vpop.permute.xlu1 %2418 }
0x1696   :  { %v2421_v5 = vadd.f32 %v2419_v53, %v6180_v18  ;;  %v2603_v61 = vadd.f32 %v2602_v37, %v2595_v59 }
0x1698   :  { %5553 = vtanh.f32 %v2421_v5  ;;  %4722 = vmatmul.mubr.msk.f32.vlgmr.msra.gmra.mrb[24].mxu0 %vm756_vm9, %v2603_v61  ;;  %v5548_v13 = vpop.eup %5547 }
0x1699   :  { %5089 = vmatpush3.bf16.msra.mxu0 %v5956_v31  ;;  %4747 = vmatprep.mubr.msk.f32.mxu0 %vm5706_vm0, %v7226_v46  ;;  %5555 = vtanh.f32 %v2429_v12  ;;  %v5550_v49 = vpop.eup %5549  ;;  %v2400_v53 = vmul.f32 %v5548_v13, %v6174_v9 }
0x169a   :  { %v2435_v34 = vpop.permute.xlu1 %2434  ;;  %5090 = vmatprep.subr.bf16.mxu0 %v7227_v56  ;;  %v2407_v23 = vmul.f32 %v5550_v49, %v7246_v58 }
0x169b   :  { %v2437_v10 = vadd.f32 %v2435_v34, %v6180_v18 }
0x169c   :  { %v2408_v37 = vadd.f32 %v2407_v23, %v2400_v53 }
0x169d   :  { %v5552_v24 = vpop.eup %5551  ;;  %5557 = vtanh.f32 %v2437_v10  ;;  %5092 = vmatpush3.bf16.msra.mxu0 %v5962_v33 }
0x169e   :  { %5099 = vmatprep.subr.bf16.mxu0 %v7227_v56  ;;  %v2415_v32 = vmul.f32 %v5552_v24, %v7247_v4  ;;  %5559 = vtanh.f32 %v2453_v51 }
0x169f   :  { %v2443_v42 = vpop.permute.xlu1 %2442 }
0x16a0   :  { %v2445_v59 = vadd.f32 %v2443_v42, %v6180_v18  ;;  %v2416_v5 = vadd.f32 %v2415_v32, %v2408_v37 }
0x16a2   :  { %v5554_v12 = vpop.eup %5553  ;;  %5561 = vtanh.f32 %v2445_v59 }
0x16a3   :  { %v2423_v61 = vmul.f32 %v5554_v12, %v6158_v63  ;;  %v5556_v13 = vpop.eup %5555 }
0x16a4   :  { %v2431_v10 = vmul.f32 %v5556_v13, %v6160_v1 }
0x16a5   :  { %v2424_v38 = vadd.f32 %v2423_v61, %v2416_v5  ;;  %v6730_v61 = vld [vmem:[%s7190_s26] sm:$0x3] }
0x16a7   :  { %v5558_v34 = vpop.eup %5557  ;;  %v2432_v33 = vadd.f32 %v2431_v10, %v2424_v38 }
0x16a8   :  { %v2439_v49 = vmul.f32 %v5558_v34, %v6166_v7  ;;  %v5560_v58 = vpop.eup %5559 }
0x16a9   :  { %v2455_v53 = vmul.f32 %v5560_v58, %v6170_v11 }
0x16aa   :  { %v2440_v4 = vadd.f32 %v2439_v49, %v2432_v33 }
0x16ac   :  { %v5562_v24 = vpop.eup %5561 }
0x16ad   :  { %v2447_v42 = vmul.f32 %v5562_v24, %v6164_v6 }
0x16af   :  { %v2448_v51 = vadd.f32 %v2447_v42, %v2440_v4 }
0x16b1   :  { %v2456_v23 = vadd.f32 %v2455_v53, %v2448_v51 }
0x16b3   :  { %4707 = vmatmul.mubr.msk.f32.vlgmr.msra.gmra.mrb[16].mxu1 %vm77_vm1, %v2456_v23 }
0x16b4   :  { %5079 = vmatpush3.bf16.msra.mxu1 %v5899_v14  ;;  %4736 = vmatprep.mubr.msk.f32.mxu1 %vm5706_vm0, %v7226_v46 }
0x16b5   :  { %5080 = vmatprep.subr.bf16.mxu1 %v7227_v56 }
0x16b8   :  { %5082 = vmatpush3.bf16.msra.mxu1 %v5910_v17 }
0x16b9   :  { %5083 = vmatprep.subr.bf16.mxu1 %v7227_v56 }
0x16bc   :  { %5086 = vmatpush3.bf16.msk.msra.mxu1 %vm5925_vm4, %v5922_v20 }
0x16bd   :  { %5093 = vmatprep.subr.bf16.mxu1 %v7227_v56 }
0x176b   :  { %v2673_v33 = vpop.f32.mrb[24].mxu0 }
0x176c   :  { %v2677_v58 = vmul.f32 0.7, %v2673_v33  ;;  %v4723_v4 = vpop.f32.mrb[25].mxu0  ;;  %v6738_v33 = vld [vmem:[%s7090_s0] sm:$0x3]  ;;  %s5736_s0 = smov 92  }
0x176e   :  { %v2678_v32 = vadd.f32 %v2677_v58, %v6280_v25 }
0x1770   :  { %v2679_v59 = vsel %vm832_vm11, %v2678_v32, -inf }
0x1771   :  { %2680 = vmax.xlane.f32.xlu1 %v2679_v59 }
0x1786   :  { %v2526_v37 = vpop.f32.mrb[16].mxu1 }
0x1787   :  { %v4708_v12 = vpop.f32.mrb[17].mxu1  ;;  %v2530_v5 = vsel %vm644_vm10, %v2526_v37, -inf }
0x1788   :  { %2531 = vmax.xlane.f32.xlu0 %v2530_v5 }
0x179e   :  { %2694 = vrot.lane.b32.xlu0 %v6730_v61, %s5734_s10 }
0x17fe   :  { %v2681_v13 = vpop.xlane.xlu1 %2680 }
0x17ff   :  { %v2682_v38 = vsub.f32 %v2678_v32, %v2681_v13 }
0x1801   :  { %v2683_v34 = vmul.f32 1.442695, %v2682_v38 }
0x1803   :  { %5563 = vpow2.f32 %v2683_v34 }
0x180d   :  { %v5564_v10 = vpop.eup %5563 }
0x180e   :  { %v2685_v49 = vsel %vm832_vm11, %v5564_v10, 0.0 }
0x180f   :  { %2686 = vadd.xlane.f32.xlu1 %v2685_v49 }
0x1815   :  { %v2532_v24 = vpop.xlane.xlu0 %2531 }
0x1816   :  { %v2533_v42 = vsub.f32 %v2526_v37, %v2532_v24 }
0x1818   :  { %v2534_v53 = vmul.f32 1.442695, %v2533_v42 }
0x1819   :  { %v2695_v32 = vpop.permute.xlu0 %2694 }
0x181a   :  { %5565 = vpow2.f32 %v2534_v53 }
0x1824   :  { %v5566_v51 = vpop.eup %5565 }
0x1825   :  { %v2536_v23 = vsel %vm644_vm10, %v5566_v51, 0.0 }
0x1826   :  { %2537 = vadd.xlane.f32.xlu1 %v2536_v23 }
0x1837   :  { %2690 = vrot.lane.b32.xlu1 %v6738_v33, %s5735_s11 }
0x183b   :  { %2702 = vrot.lane.b32.xlu1 %v6645_v27, %s5728_s27 }
0x189c   :  { %v2687_v58 = vpop.xlane.xlu1 %2686 }
0x189d   :  { %5567 = vrcp.f32 %v2687_v58 }
0x18a7   :  { %v5568_v4 = vpop.eup %5567 }
0x18a8   :  { %v6743_v59 = vmul.f32 %v5568_v4, %v5564_v10 }
0x18aa   :  { %7248 = vst [vmem:[#allocation25_spill] sm:$0xff] %v6743_v59  ;;  %v2697_v37 = vmul.f32 %v2695_v32, %v6743_v59 }
0x18ac   :  { %2699 = vrot.lane.b32.xlu0 %v2697_v37, %s5708_s3 }
0x18b3   :  { %v2538_v12 = vpop.xlane.xlu1 %2537 }
0x18b4   :  { %5569 = vrcp.f32 %v2538_v12 }
0x18b7   :  { %v2691_v38 = vpop.permute.xlu1 %2690 }
0x18bb   :  { %v2703_v24 = vpop.permute.xlu1 %2702 }
0x18be   :  { %v5570_v5 = vpop.eup %5569 }
0x18bf   :  { %v6747_v13 = vmul.f32 %v5570_v5, %v5566_v51 }
0x18c1   :  { %7249 = vst [vmem:[#allocation26_spill] sm:$0xff] %v6747_v13  ;;  %v2693_v34 = vmul.f32 %v2691_v38, %v6747_v13 }
0x191e   :  { %v2700_v49 = vpop.permute.xlu0 %2699 }
0x191f   :  { %v2705_v42 = vsel %vm302_vm5, %v2693_v34, %v2700_v49 }
0x1920   :  { %v2706_v53 = vsel %vm304_vm6, %v2705_v42, %v2703_v24 }
0x1921   :  { %4737 = vmatmul.mubr.msk.f32.vlgmr.msra.gmra.mrb[18].mxu1 %vm312_vm7, %v2706_v53 }
0x1922   :  { %5095 = vmatpush3.bf16.msra.mxu1 %v6131_v52  ;;  %4758 = vmatprep.mubr.msk.f32.mxu1 %vm5706_vm0, %v7226_v46 }
0x1923   :  { %5096 = vmatprep.subr.bf16.mxu1 %v7227_v56 }
0x1926   :  { %5098 = vmatpush3.bf16.msra.mxu1 %v6141_v57 }
0x1927   :  { %5108 = vmatprep.subr.bf16.mxu1 %v7227_v56 }
0x19f4   :  { %v2776_v10 = vpop.f32.mrb[18].mxu1 }
0x19f5   :  { %v2777_v51 = vadd.f32 %v6531_v45, %v2776_v10  ;;  %v4738_v23 = vpop.f32.mrb[19].mxu1 }
0x19f7   :  { %5571 = vtanh.f32 %v2777_v51 }
0x1a01   :  { %v6760_v58 = vpop.eup %5571 }
0x1a02   :  { %7250 = vst [vmem:[#allocation27_spill] sm:$0xff] %v6760_v58  ;;  %4748 = vmatmul.mubr.msk.f32.vlgmr.msra.gmra.mrb[26].mxu0 %vm77_vm1, %v6760_v58 }
0x1a03   :  { %5101 = vmatpush3.bf16.msra.mxu0 %v6213_v29  ;;  %4773 = vmatprep.mubr.msk.f32.mxu0 %vm5706_vm0, %v7226_v46 }
0x1a04   :  { %5102 = vmatprep.subr.bf16.mxu0 %v7227_v56 }
0x1a07   :  { %5104 = vmatpush3.bf16.msra.mxu0 %v6225_v44 }
0x1a08   :  { %5105 = vmatprep.subr.bf16.mxu0 %v7227_v56 }
0x1a0b   :  { %5107 = vmatpush3.bf16.msra.mxu0 %v6238_v19 }
0x1a0c   :  { %5118 = vmatprep.subr.bf16.mxu0 %v7227_v56 }
0x1ad5   :  { %v2850_v45 = vpop.f32.mrb[26].mxu0 }
0x1ad6   :  { %v2851_v4 = vadd.f32 %v6549_v3, %v2850_v45  ;;  %v4749_v32 = vpop.f32.mrb[27].mxu0 }
0x1ad8   :  { %3010 = vperm.xlu1 %5313, %v2851_v4   ;;  %3003 = vperm.xlu0 %5312, %v2851_v4  }
0x1adc   :  { %5314 = vset.pattern.permute.xlu1 %v7231_v8  ;;  %5315 = vset.pattern.permute.xlu0 %v7232_v40 }
0x1add   :  { %3018 = vperm.xlu1 %5314, %v2851_v4   ;;  %3026 = vperm.xlu0 %5315, %v2851_v4  }
0x1ae1   :  { %5316 = vset.pattern.permute.xlu1 %v7233_v48  ;;  %5318 = vset.pattern.permute.xlu0 %v7234_v2 }
0x1ae2   :  { %3034 = vperm.xlu1 %5316, %v2851_v4   ;;  %3050 = vperm.xlu0 %5318, %v2851_v4  }
0x1ae6   :  { %5317 = vset.pattern.permute.xlu1 %v7235_v28  ;;  %5321 = vset.pattern.permute.xlu0 %v7217_v0 }
0x1ae7   :  { %3042 = vperm.xlu1 %5317, %v2851_v4   ;;  %2863 = vperm.xlu0 %5321, %v2851_v4  }
0x1aeb   :  { %5319 = vset.pattern.permute.xlu1 %v7218_v35  ;;  %5324 = vset.pattern.permute.xlu0 %v7219_v60 }
0x1aec   :  { %3058 = vperm.xlu1 %5319, %v2851_v4   ;;  %2887 = vperm.xlu0 %5324, %v2851_v4  }
0x1af0   :  { %5320 = vset.pattern.permute.xlu1 %v7220_v55  ;;  %5327 = vset.pattern.permute.xlu0 %v7221_v41 }
0x1af1   :  { %2856 = vperm.xlu1 %5320, %v2851_v4   ;;  %2911 = vperm.xlu0 %5327, %v2851_v4  }
0x1af5   :  { %5322 = vset.pattern.permute.xlu1 %v7222_v22  ;;  %5328 = vset.pattern.permute.xlu0 %v7223_v30 }
0x1af6   :  { %2871 = vperm.xlu1 %5322, %v2851_v4  }
0x1afa   :  { %5323 = vset.pattern.permute.xlu1 %v7240_v43 }
0x1afb   :  { %2879 = vperm.xlu1 %5323, %v2851_v4  }
0x1aff   :  { %5325 = vset.pattern.permute.xlu1 %v7241_v16 }
0x1b00   :  { %2895 = vperm.xlu1 %5325, %v2851_v4  }
0x1b04   :  { %5326 = vset.pattern.permute.xlu1 %v7242_v62 }
0x1b05   :  { %2903 = vperm.xlu1 %5326, %v2851_v4   ;;  %v7251_v4 = vld [vmem:[#allocation7_spill] sm:$0xff] }
0x1b09   :  { %5329 = vset.pattern.permute.xlu1 %v7243_v54 }
0x1b57   :  { %v3011_v3 = vpop.permute.xlu1 %3010  ;;  %v3004_v37 = vpop.permute.xlu0 %3003 }
0x1b58   :  { %v3013_v12 = vadd.f32 %v3011_v3, %v6199_v36  ;;  %v3006_v5 = vadd.f32 %v3004_v37, %v6199_v36  ;;  %v7252_v3 = vld [vmem:[#allocation6_spill] sm:$0xff] }
0x1b5a   :  { %5573 = vtanh.f32 %v3013_v12 }
0x1b5b   :  { %5575 = vtanh.f32 %v3006_v5 }
0x1b5c   :  { %v3019_v38 = vpop.permute.xlu1 %3018  ;;  %v3027_v34 = vpop.permute.xlu0 %3026 }
0x1b5d   :  { %v3021_v49 = vadd.f32 %v3019_v38, %v6199_v36  ;;  %v3029_v24 = vadd.f32 %v3027_v34, %v6199_v36 }
0x1b5f   :  { %5577 = vtanh.f32 %v3021_v49 }
0x1b60   :  { %5579 = vtanh.f32 %v3029_v24 }
0x1b61   :  { %v3035_v42 = vpop.permute.xlu1 %3034  ;;  %v3051_v53 = vpop.permute.xlu0 %3050 }
0x1b62   :  { %v3037_v10 = vadd.f32 %v3035_v42, %v6199_v36  ;;  %v3053_v23 = vadd.f32 %v3051_v53, %v6199_v36 }
0x1b64   :  { %v5574_v51 = vpop.eup %5573  ;;  %5581 = vtanh.f32 %v3037_v10 }
0x1b65   :  { %v5576_v45 = vpop.eup %5575  ;;  %v3015_v32 = vmul.f32 %v5574_v51, %v7251_v4  ;;  %5583 = vtanh.f32 %v3053_v23 }
0x1b66   :  { %v3008_v37 = vmul.f32 %v5576_v45, %v7252_v3  ;;  %v3043_v12 = vpop.permute.xlu1 %3042  ;;  %v7253_v45 = vld [vmem:[#allocation9_spill] sm:$0xff]  ;;  %v2864_v3 = vpop.permute.xlu0 %2863 }
0x1b67   :  { %v3045_v5 = vadd.f32 %v3043_v12, %v6199_v36 }
0x1b68   :  { %v3016_v34 = vadd.f32 %v3015_v32, %v3008_v37  ;;  %v2866_v37 = vadd.f32 %v2864_v3, %v6180_v18 }
0x1b69   :  { %v5578_v38 = vpop.eup %5577  ;;  %5585 = vtanh.f32 %v3045_v5 }
0x1b6a   :  { %v3023_v49 = vmul.f32 %v5578_v38, %v6243_v50  ;;  %v5580_v24 = vpop.eup %5579 }
0x1b6b   :  { %v3059_v42 = vpop.permute.xlu1 %3058  ;;  %v3031_v59 = vmul.f32 %v5580_v24, %v6250_v39 }
0x1b6c   :  { %v3024_v27 = vadd.f32 %v3023_v49, %v3016_v34  ;;  %v3061_v10 = vadd.f32 %v3059_v42, %v6199_v36 }
0x1b6e   :  { %v5582_v53 = vpop.eup %5581  ;;  %5587 = vtanh.f32 %v3061_v10  ;;  %v3032_v51 = vadd.f32 %v3031_v59, %v3024_v27  ;;  %v2888_v10 = vpop.permute.xlu0 %2887 }
0x1b6f   :  { %v3039_v13 = vmul.f32 %v5582_v53, %v7253_v45  ;;  %v5584_v5 = vpop.eup %5583  ;;  %v2890_v3 = vadd.f32 %v2888_v10, %v6180_v18 }
0x1b70   :  { %v2857_v12 = vpop.permute.xlu1 %2856  ;;  %v3055_v42 = vmul.f32 %v5584_v5, %v6261_v47 }
0x1b71   :  { %v2859_v23 = vadd.f32 %v2857_v12, %v6180_v18  ;;  %v3040_v38 = vadd.f32 %v3039_v13, %v3032_v51 }
0x1b72   :  { %v2912_v5 = vpop.permute.xlu0 %2911 }
0x1b73   :  { %v5586_v32 = vpop.eup %5585  ;;  %5589 = vtanh.f32 %v2859_v23 }
0x1b74   :  { %v3047_v34 = vmul.f32 %v5586_v32, %v6255_v15  ;;  %5591 = vtanh.f32 %v2866_v37 }
0x1b75   :  { %v2872_v49 = vpop.permute.xlu1 %2871 }
0x1b76   :  { %v3048_v24 = vadd.f32 %v3047_v34, %v3040_v38  ;;  %v2874_v27 = vadd.f32 %v2872_v49, %v6180_v18  ;;  %v2914_v49 = vadd.f32 %v2912_v5, %v6180_v18 }
0x1b78   :  { %v5588_v59 = vpop.eup %5587  ;;  %5593 = vtanh.f32 %v2874_v27  ;;  %v3056_v53 = vadd.f32 %v3055_v42, %v3048_v24  ;;  %v7254_v42 = vld [vmem:[#allocation2_spill] sm:$0xff]  ;;  %v7255_v24 = vld [vmem:[#allocation4_spill] sm:$0xff] }
0x1b79   :  { %v3063_v12 = vmul.f32 %v5588_v59, %v6259_v26  ;;  %v7256_v59 = vld [vmem:[#allocation5_spill] sm:$0xff] }
0x1b7a   :  { %v2880_v45 = vpop.permute.xlu1 %2879 }
0x1b7b   :  { %v2882_v13 = vadd.f32 %v2880_v45, %v6180_v18  ;;  %v3064_v51 = vadd.f32 %v3063_v12, %v3056_v53 }
0x1b7d   :  { %5595 = vtanh.f32 %v2882_v13  ;;  %4774 = vmatmul.mubr.msk.f32.vlgmr.msra.gmra.mrb[28].mxu0 %vm756_vm9, %v3064_v51  ;;  %v5590_v23 = vpop.eup %5589 }
0x1b7e   :  { %5120 = vmatpush3.bf16.msra.mxu0 %v5956_v31  ;;  %4799 = vmatprep.mubr.msk.f32.mxu0 %vm5706_vm0, %v7226_v46  ;;  %5597 = vtanh.f32 %v2890_v3  ;;  %v5592_v38 = vpop.eup %5591  ;;  %v2861_v45 = vmul.f32 %v5590_v23, %v6174_v9 }
0x1b7f   :  { %v2896_v32 = vpop.permute.xlu1 %2895  ;;  %5121 = vmatprep.subr.bf16.mxu0 %v7227_v56  ;;  %v2868_v27 = vmul.f32 %v5592_v38, %v7255_v24 }
0x1b80   :  { %v2898_v37 = vadd.f32 %v2896_v32, %v6180_v18 }
0x1b81   :  { %v2869_v3 = vadd.f32 %v2868_v27, %v2861_v45 }
0x1b82   :  { %v5594_v34 = vpop.eup %5593  ;;  %5599 = vtanh.f32 %v2898_v37  ;;  %5123 = vmatpush3.bf16.msra.mxu0 %v7254_v42 }
0x1b83   :  { %5130 = vmatprep.subr.bf16.mxu0 %v7227_v56  ;;  %v2876_v10 = vmul.f32 %v5594_v34, %v7256_v59  ;;  %5601 = vtanh.f32 %v2914_v49 }
0x1b84   :  { %v2904_v53 = vpop.permute.xlu1 %2903 }
0x1b85   :  { %v2906_v12 = vadd.f32 %v2904_v53, %v6180_v18  ;;  %v2877_v51 = vadd.f32 %v2876_v10, %v2869_v3 }
0x1b87   :  { %v5596_v13 = vpop.eup %5595  ;;  %5603 = vtanh.f32 %v2906_v12 }
0x1b88   :  { %v2884_v23 = vmul.f32 %v5596_v13, %v6158_v63  ;;  %v5598_v5 = vpop.eup %5597 }
0x1b89   :  { %v2892_v42 = vmul.f32 %v5598_v5, %v6160_v1 }
0x1b8a   :  { %v2885_v32 = vadd.f32 %v2884_v23, %v2877_v51 }
0x1b8c   :  { %v5600_v37 = vpop.eup %5599  ;;  %v2893_v9 = vadd.f32 %v2892_v42, %v2885_v32 }
0x1b8d   :  { %v2900_v38 = vmul.f32 %v5600_v37, %v6166_v7  ;;  %v5602_v24 = vpop.eup %5601 }
0x1b8e   :  { %v2916_v45 = vmul.f32 %v5602_v24, %v6170_v11 }
0x1b8f   :  { %v2901_v59 = vadd.f32 %v2900_v38, %v2893_v9 }
0x1b91   :  { %v5604_v34 = vpop.eup %5603 }
0x1b92   :  { %v2908_v53 = vmul.f32 %v5604_v34, %v6164_v6 }
0x1b94   :  { %v2909_v49 = vadd.f32 %v2908_v53, %v2901_v59 }
0x1b96   :  { %v2917_v27 = vadd.f32 %v2916_v45, %v2909_v49 }
0x1b98   :  { %4759 = vmatmul.mubr.msk.f32.vlgmr.msra.gmra.mrb[20].mxu1 %vm77_vm1, %v2917_v27 }
0x1b99   :  { %5110 = vmatpush3.bf16.msra.mxu1 %v5899_v14  ;;  %4788 = vmatprep.mubr.msk.f32.mxu1 %vm5706_vm0, %v7226_v46 }
0x1b9a   :  { %5111 = vmatprep.subr.bf16.mxu1 %v7227_v56 }
0x1b9d   :  { %5113 = vmatpush3.bf16.msra.mxu1 %v5910_v17 }
0x1b9e   :  { %5114 = vmatprep.subr.bf16.mxu1 %v7227_v56 }
0x1ba1   :  { %5117 = vmatpush3.bf16.msk.msra.mxu1 %vm5925_vm4, %v5922_v20 }
0x1ba2   :  { %5124 = vmatprep.subr.bf16.mxu1 %v7227_v56 }
0x1c50   :  { %v3134_v9 = vpop.f32.mrb[28].mxu0 }
0x1c51   :  { %v3138_v42 = vmul.f32 0.7, %v3134_v9  ;;  %v4775_v24 = vpop.f32.mrb[29].mxu0 }
0x1c53   :  { %v3139_v59 = vadd.f32 %v3138_v42, %v6280_v25 }
0x1c55   :  { %v3140_v10 = vsel %vm832_vm11, %v3139_v59, -inf }
0x1c56   :  { %3141 = vmax.xlane.f32.xlu1 %v3140_v10 }
0x1c6b   :  { %v2987_v12 = vpop.f32.mrb[20].mxu1 }
0x1c6c   :  { %v4760_v3 = vpop.f32.mrb[21].mxu1  ;;  %v2991_v13 = vsel %vm644_vm10, %v2987_v12, -inf }
0x1c6d   :  { %2992 = vmax.xlane.f32.xlu0 %v2991_v13 }
0x1c83   :  { %3155 = vrot.lane.b32.xlu0 %v6730_v61, %s5736_s0 }
0x1ce3   :  { %v3142_v51 = vpop.xlane.xlu1 %3141 }
0x1ce4   :  { %v3143_v23 = vsub.f32 %v3139_v59, %v3142_v51 }
0x1ce6   :  { %v3144_v5 = vmul.f32 1.442695, %v3143_v23 }
0x1ce8   :  { %5605 = vpow2.f32 %v3144_v5 }
0x1cf2   :  { %v5606_v32 = vpop.eup %5605 }
0x1cf3   :  { %v3146_v37 = vsel %vm832_vm11, %v5606_v32, 0.0 }
0x1cf4   :  { %3147 = vadd.xlane.f32.xlu1 %v3146_v37 }
0x1cfa   :  { %v2993_v38 = vpop.xlane.xlu0 %2992 }
0x1cfb   :  { %v2994_v34 = vsub.f32 %v2987_v12, %v2993_v38 }
0x1cfd   :  { %v2995_v53 = vmul.f32 1.442695, %v2994_v34  ;;  %v6868_v34 = vld [vmem:[%s7096_s13] ss:$0 sm:$0xff] }
0x1cfe   :  { %v3156_v42 = vpop.permute.xlu0 %3155 }
0x1cff   :  { %5607 = vpow2.f32 %v2995_v53 }
0x1d09   :  { %v5608_v45 = vpop.eup %5607 }
0x1d0a   :  { %v2997_v49 = vsel %vm644_vm10, %v5608_v45, 0.0 }
0x1d0b   :  { %2998 = vadd.xlane.f32.xlu1 %v2997_v49 }
0x1d1c   :  { %3151 = vrot.lane.b32.xlu1 %v6738_v33, %s5732_s6  ;;  %s5752_s6 = smov 36  }
0x1d20   :  { %3163 = vrot.lane.b32.xlu1 %v6760_v58, %s5728_s27 }
0x1d81   :  { %v3148_v27 = vpop.xlane.xlu1 %3147 }
0x1d82   :  { %5609 = vrcp.f32 %v3148_v27 }
0x1d8c   :  { %v5610_v9 = vpop.eup %5609 }
0x1d8d   :  { %v6849_v24 = vmul.f32 %v5610_v9, %v5606_v32  ;;  %v6886_v9 = vld [vmem:[%s7097_s9] ss:$0 sm:$0xff]  ;;  %s5737_s9 = smov 86  }
0x1d8f   :  { %7257 = vst [vmem:[#allocation7_spill] sm:$0xff] %v6849_v24  ;;  %v3158_v59 = vmul.f32 %v3156_v42, %v6849_v24 }
0x1d91   :  { %3160 = vrot.lane.b32.xlu0 %v3158_v59, %s5708_s3 }
0x1d98   :  { %v2999_v10 = vpop.xlane.xlu1 %2998 }
0x1d99   :  { %5611 = vrcp.f32 %v2999_v10 }
0x1d9c   :  { %v3152_v13 = vpop.permute.xlu1 %3151 }
0x1da0   :  { %v3164_v5 = vpop.permute.xlu1 %3163 }
0x1da3   :  { %v5612_v12 = vpop.eup %5611 }
0x1da4   :  { %v6853_v3 = vmul.f32 %v5612_v12, %v5608_v45 }
0x1da6   :  { %7258 = vst [vmem:[#allocation28_spill] sm:$0xff] %v6853_v3  ;;  %v3154_v51 = vmul.f32 %v3152_v13, %v6853_v3 }
0x1e03   :  { %v3161_v23 = vpop.permute.xlu0 %3160 }
0x1e04   :  { %v3166_v37 = vsel %vm302_vm5, %v3154_v51, %v3161_v23 }
0x1e05   :  { %v3167_v38 = vsel %vm304_vm6, %v3166_v37, %v3164_v5 }
0x1e06   :  { %4789 = vmatmul.mubr.msk.f32.vlgmr.msra.gmra.mrb[22].mxu1 %vm312_vm7, %v3167_v38 }
0x1e07   :  { %5126 = vmatpush3.bf16.msra.mxu1 %v6131_v52  ;;  %4810 = vmatprep.mubr.msk.f32.mxu1 %vm5706_vm0, %v7226_v46 }
0x1e08   :  { %5127 = vmatprep.subr.bf16.mxu1 %v7227_v56 }
0x1e0b   :  { %5129 = vmatpush3.bf16.msra.mxu1 %v6141_v57 }
0x1e0c   :  { %5139 = vmatprep.subr.bf16.mxu1 %v7227_v56 }
0x1ed9   :  { %v3237_v32 = vpop.f32.mrb[22].mxu1 }
0x1eda   :  { %v3238_v53 = vadd.f32 %v6868_v34, %v3237_v32  ;;  %v4790_v45 = vpop.f32.mrb[23].mxu1 }
0x1edc   :  { %5613 = vtanh.f32 %v3238_v53 }
0x1ee6   :  { %v6871_v49 = vpop.eup %5613 }
0x1ee7   :  { %4800 = vmatmul.mubr.msk.f32.vlgmr.msra.gmra.mrb[30].mxu0 %vm77_vm1, %v6871_v49 }
0x1ee8   :  { %5132 = vmatpush3.bf16.msra.mxu0 %v6213_v29  ;;  %4825 = vmatprep.mubr.msk.f32.mxu0 %vm5706_vm0, %v7226_v46 }
0x1ee9   :  { %5133 = vmatprep.subr.bf16.mxu0 %v7227_v56 }
0x1eec   :  { %5135 = vmatpush3.bf16.msra.mxu0 %v6225_v44 }
0x1eed   :  { %5136 = vmatprep.subr.bf16.mxu0 %v7227_v56 }
0x1ef0   :  { %5138 = vmatpush3.bf16.msra.mxu0 %v6238_v19 }
0x1ef1   :  { %5149 = vmatprep.subr.bf16.mxu0 %v7227_v56 }
0x1fba   :  { %v3311_v27 = vpop.f32.mrb[30].mxu0 }
0x1fbb   :  { %v3312_v42 = vadd.f32 %v6886_v9, %v3311_v27  ;;  %v4801_v59 = vpop.f32.mrb[31].mxu0 }
0x1fbc   :  { %v7259_v59 = vld [vmem:[#allocation6_spill] sm:$0xff] }
0x1fbd   :  { %3471 = vperm.xlu1 %5329, %v3312_v42   ;;  %3464 = vperm.xlu0 %5328, %v3312_v42  }
0x1fc1   :  { %5330 = vset.pattern.permute.xlu1 %v7231_v8  ;;  %5331 = vset.pattern.permute.xlu0 %v7232_v40 }
0x1fc2   :  { %3479 = vperm.xlu1 %5330, %v3312_v42   ;;  %3487 = vperm.xlu0 %5331, %v3312_v42  }
0x1fc6   :  { %5332 = vset.pattern.permute.xlu1 %v7233_v48  ;;  %5334 = vset.pattern.permute.xlu0 %v7234_v2 }
0x1fc7   :  { %3495 = vperm.xlu1 %5332, %v3312_v42   ;;  %3511 = vperm.xlu0 %5334, %v3312_v42  }
0x1fcb   :  { %5333 = vset.pattern.permute.xlu1 %v7235_v28  ;;  %5337 = vset.pattern.permute.xlu0 %v7217_v0 }
0x1fcc   :  { %3503 = vperm.xlu1 %5333, %v3312_v42   ;;  %3324 = vperm.xlu0 %5337, %v3312_v42  }
0x1fd0   :  { %5335 = vset.pattern.permute.xlu1 %v7218_v35  ;;  %5340 = vset.pattern.permute.xlu0 %v7219_v60 }
0x1fd1   :  { %3519 = vperm.xlu1 %5335, %v3312_v42   ;;  %3348 = vperm.xlu0 %5340, %v3312_v42  }
0x1fd5   :  { %5336 = vset.pattern.permute.xlu1 %v7220_v55  ;;  %5343 = vset.pattern.permute.xlu0 %v7221_v41 }
0x1fd6   :  { %3317 = vperm.xlu1 %5336, %v3312_v42   ;;  %3372 = vperm.xlu0 %5343, %v3312_v42  }
0x1fda   :  { %5338 = vset.pattern.permute.xlu1 %v7222_v22  ;;  %5344 = vset.pattern.permute.xlu0 %v7223_v30 }
0x1fdb   :  { %3332 = vperm.xlu1 %5338, %v3312_v42  }
0x1fdf   :  { %5339 = vset.pattern.permute.xlu1 %v7240_v43 }
0x1fe0   :  { %3340 = vperm.xlu1 %5339, %v3312_v42  }
0x1fe4   :  { %5341 = vset.pattern.permute.xlu1 %v7241_v16 }
0x1fe5   :  { %3356 = vperm.xlu1 %5341, %v3312_v42  }
0x1fe9   :  { %5342 = vset.pattern.permute.xlu1 %v7242_v62 }
0x1fea   :  { %3364 = vperm.xlu1 %5342, %v3312_v42  }
0x1fee   :  { %5345 = vset.pattern.permute.xlu1 %v7243_v54 }
0x203c   :  { %v3472_v10 = vpop.permute.xlu1 %3471  ;;  %v3465_v12 = vpop.permute.xlu0 %3464 }
0x203d   :  { %v3474_v13 = vadd.f32 %v3472_v10, %v6199_v36  ;;  %v3467_v51 = vadd.f32 %v3465_v12, %v6199_v36 }
0x203f   :  { %5615 = vtanh.f32 %v3474_v13 }
0x2040   :  { %5617 = vtanh.f32 %v3467_v51 }
0x2041   :  { %v3480_v30 = vpop.permute.xlu1 %3479  ;;  %v3488_v23 = vpop.permute.xlu0 %3487 }
0x2042   :  { %v3482_v5 = vadd.f32 %v3480_v30, %v6199_v36  ;;  %v3490_v37 = vadd.f32 %v3488_v23, %v6199_v36 }
0x2044   :  { %5619 = vtanh.f32 %v3482_v5 }
0x2045   :  { %5621 = vtanh.f32 %v3490_v37 }
0x2046   :  { %v3496_v38 = vpop.permute.xlu1 %3495  ;;  %v3512_v32 = vpop.permute.xlu0 %3511 }
0x2047   :  { %v3498_v54 = vadd.f32 %v3496_v38, %v6199_v36  ;;  %v3514_v45 = vadd.f32 %v3512_v32, %v6199_v36 }
0x2049   :  { %v5616_v53 = vpop.eup %5615  ;;  %5623 = vtanh.f32 %v3498_v54 }
0x204a   :  { %v5618_v27 = vpop.eup %5617  ;;  %v3476_v42 = vmul.f32 %v5616_v53, %v7251_v4  ;;  %5625 = vtanh.f32 %v3514_v45 }
0x204b   :  { %v3469_v10 = vmul.f32 %v5618_v27, %v7259_v59  ;;  %v3504_v12 = vpop.permute.xlu1 %3503  ;;  %v7260_v27 = vld [vmem:[#allocation9_spill] sm:$0xff]  ;;  %v3325_v58 = vpop.permute.xlu0 %3324 }
0x204c   :  { %v3506_v13 = vadd.f32 %v3504_v12, %v6199_v36 }
0x204d   :  { %v3477_v30 = vadd.f32 %v3476_v42, %v3469_v10  ;;  %v3327_v10 = vadd.f32 %v3325_v58, %v6180_v18 }
0x204e   :  { %v5620_v51 = vpop.eup %5619  ;;  %5627 = vtanh.f32 %v3506_v13 }
0x204f   :  { %v3484_v23 = vmul.f32 %v5620_v51, %v6243_v50  ;;  %v5622_v5 = vpop.eup %5621 }
0x2050   :  { %v3520_v37 = vpop.permute.xlu1 %3519  ;;  %v3492_v24 = vmul.f32 %v5622_v5, %v6250_v39 }
0x2051   :  { %v3485_v38 = vadd.f32 %v3484_v23, %v3477_v30  ;;  %v3522_v54 = vadd.f32 %v3520_v37, %v6199_v36 }
0x2053   :  { %v5624_v32 = vpop.eup %5623  ;;  %5629 = vtanh.f32 %v3522_v54  ;;  %v3493_v53 = vadd.f32 %v3492_v24, %v3485_v38  ;;  %v3349_v54 = vpop.permute.xlu0 %3348 }
0x2054   :  { %v3500_v3 = vmul.f32 %v5624_v32, %v7260_v27  ;;  %v5626_v13 = vpop.eup %5625  ;;  %v3351_v58 = vadd.f32 %v3349_v54, %v6180_v18 }
0x2055   :  { %v3318_v12 = vpop.permute.xlu1 %3317  ;;  %v3516_v37 = vmul.f32 %v5626_v13, %v6261_v47 }
0x2056   :  { %v3320_v45 = vadd.f32 %v3318_v12, %v6180_v18  ;;  %v3501_v51 = vadd.f32 %v3500_v3, %v3493_v53 }
0x2057   :  { %v3373_v13 = vpop.permute.xlu0 %3372 }
0x2058   :  { %v5628_v42 = vpop.eup %5627  ;;  %5631 = vtanh.f32 %v3320_v45 }
0x2059   :  { %v3508_v30 = vmul.f32 %v5628_v42, %v6255_v15  ;;  %5633 = vtanh.f32 %v3327_v10 }
0x205a   :  { %v3333_v23 = vpop.permute.xlu1 %3332 }
0x205b   :  { %v3509_v5 = vadd.f32 %v3508_v30, %v3501_v51  ;;  %v3335_v24 = vadd.f32 %v3333_v23, %v6180_v18 }
0x205d   :  { %v5630_v38 = vpop.eup %5629  ;;  %5635 = vtanh.f32 %v3335_v24  ;;  %v3517_v32 = vadd.f32 %v3516_v37, %v3509_v5  ;;  %v3375_v37 = vadd.f32 %v3373_v13, %v6180_v18  ;;  %v7262_v5 = vld [vmem:[#allocation2_spill] sm:$0xff] }
0x205e   :  { %v3524_v12 = vmul.f32 %v5630_v38, %v6259_v26  ;;  %v7264_v38 = vld [vmem:[#allocation5_spill] sm:$0xff] }
0x205f   :  { %v3341_v27 = vpop.permute.xlu1 %3340 }
0x2060   :  { %v3343_v3 = vadd.f32 %v3341_v27, %v6180_v18  ;;  %v3525_v53 = vadd.f32 %v3524_v12, %v3517_v32  ;;  %v7261_v27 = vld [vmem:[#allocation8_spill] sm:$0xff] }
0x2062   :  { %5637 = vtanh.f32 %v3343_v3  ;;  %4826 = vmatmul.mubr.msk.f32.vlgmr.msra.gmra.mrb[32].mxu0 %vm756_vm9, %v3525_v53  ;;  %v5632_v45 = vpop.eup %5631 }
0x2063   :  { %5151 = vmatpush3.bf16.msra.mxu0 %v5956_v31  ;;  %4851 = vmatprep.mubr.msk.f32.mxu0 %vm5706_vm0, %v7226_v46  ;;  %5639 = vtanh.f32 %v3351_v58  ;;  %v5634_v51 = vpop.eup %5633  ;;  %v3322_v23 = vmul.f32 %v5632_v45, %v7261_v27  ;;  %v7263_v31 = vld [vmem:[#allocation4_spill] sm:$0xff] }
0x2064   :  { %v3357_v42 = vpop.permute.xlu1 %3356  ;;  %5152 = vmatprep.subr.bf16.mxu0 %v7227_v56  ;;  %v3329_v24 = vmul.f32 %v5634_v51, %v7263_v31 }
0x2065   :  { %v3359_v10 = vadd.f32 %v3357_v42, %v6180_v18 }
0x2066   :  { %v3330_v58 = vadd.f32 %v3329_v24, %v3322_v23 }
0x2067   :  { %v5636_v30 = vpop.eup %5635  ;;  %5641 = vtanh.f32 %v3359_v10  ;;  %5154 = vmatpush3.bf16.msra.mxu0 %v7262_v5 }
0x2068   :  { %5161 = vmatprep.subr.bf16.mxu0 %v7227_v56  ;;  %v3337_v54 = vmul.f32 %v5636_v30, %v7264_v38  ;;  %5643 = vtanh.f32 %v3375_v37 }
0x2069   :  { %v3365_v32 = vpop.permute.xlu1 %3364 }
0x206a   :  { %v3367_v12 = vadd.f32 %v3365_v32, %v6180_v18  ;;  %v3338_v53 = vadd.f32 %v3337_v54, %v3330_v58 }
0x206c   :  { %v5638_v3 = vpop.eup %5637  ;;  %5645 = vtanh.f32 %v3367_v12 }
0x206d   :  { %v3345_v45 = vmul.f32 %v5638_v3, %v6158_v63  ;;  %v5640_v13 = vpop.eup %5639 }
0x206e   :  { %v3353_v5 = vmul.f32 %v5640_v13, %v6160_v1 }
0x206f   :  { %v3346_v42 = vadd.f32 %v3345_v45, %v3338_v53 }
0x2071   :  { %v5642_v10 = vpop.eup %5641  ;;  %v3354_v26 = vadd.f32 %v3353_v5, %v3346_v42 }
0x2072   :  { %v3361_v51 = vmul.f32 %v5642_v10, %v6166_v7  ;;  %v5644_v47 = vpop.eup %5643 }
0x2073   :  { %v3377_v23 = vmul.f32 %v5644_v47, %v6170_v11 }
0x2074   :  { %v3362_v15 = vadd.f32 %v3361_v51, %v3354_v26 }
0x2076   :  { %v5646_v30 = vpop.eup %5645 }
0x2077   :  { %v3369_v32 = vmul.f32 %v5646_v30, %v6164_v6 }
0x2079   :  { %v3370_v37 = vadd.f32 %v3369_v32, %v3362_v15 }
0x207b   :  { %v3378_v24 = vadd.f32 %v3377_v23, %v3370_v37 }
0x207d   :  { %4811 = vmatmul.mubr.msk.f32.vlgmr.msra.gmra.mrb[24].mxu1 %vm77_vm1, %v3378_v24 }
0x207e   :  { %5141 = vmatpush3.bf16.msra.mxu1 %v5899_v14  ;;  %4840 = vmatprep.mubr.msk.f32.mxu1 %vm5706_vm0, %v7226_v46 }
0x207f   :  { %5142 = vmatprep.subr.bf16.mxu1 %v7227_v56 }
0x2082   :  { %5144 = vmatpush3.bf16.msra.mxu1 %v5910_v17 }
0x2083   :  { %5145 = vmatprep.subr.bf16.mxu1 %v7227_v56 }
0x2086   :  { %5148 = vmatpush3.bf16.msk.msra.mxu1 %vm5925_vm4, %v5922_v20  ;;  %vm4149_vm4 = vcmask 228352  }
0x2087   :  { %5155 = vmatprep.subr.bf16.mxu1 %v7227_v56 }
0x2135   :  { %v3595_v47 = vpop.f32.mrb[32].mxu0 }
0x2136   :  { %v3599_v15 = vmul.f32 0.7, %v3595_v47  ;;  %v4827_v26 = vpop.f32.mrb[33].mxu0 }
0x2138   :  { %v3600_v14 = vadd.f32 %v3599_v15, %v6280_v25 }
0x213a   :  { %v3601_v54 = vsel %vm832_vm11, %v3600_v14, -inf }
0x213b   :  { %3602 = vmax.xlane.f32.xlu1 %v3601_v54 }
0x2150   :  { %v3448_v12 = vpop.f32.mrb[24].mxu1 }
0x2151   :  { %v4812_v58 = vpop.f32.mrb[25].mxu1  ;;  %v3452_v17 = vsel %vm644_vm10, %v3448_v12, -inf }
0x2152   :  { %3453 = vmax.xlane.f32.xlu0 %v3452_v17 }
0x2168   :  { %3616 = vrot.lane.b32.xlu0 %v6730_v61, %s5737_s9 }
0x21c8   :  { %v3603_v21 = vpop.xlane.xlu1 %3602 }
0x21c9   :  { %v3604_v20 = vsub.f32 %v3600_v14, %v3603_v21 }
0x21cb   :  { %v3605_v3 = vmul.f32 1.442695, %v3604_v20 }
0x21cd   :  { %5647 = vpow2.f32 %v3605_v3 }
0x21d7   :  { %v5648_v53 = vpop.eup %5647 }
0x21d8   :  { %v3607_v45 = vsel %vm832_vm11, %v5648_v53, 0.0 }
0x21d9   :  { %3608 = vadd.xlane.f32.xlu1 %v3607_v45 }
0x21df   :  { %v3454_v13 = vpop.xlane.xlu0 %3453 }
0x21e0   :  { %v3455_v42 = vsub.f32 %v3448_v12, %v3454_v13 }
0x21e2   :  { %v3456_v10 = vmul.f32 1.442695, %v3455_v42 }
0x21e3   :  { %v3617_v32 = vpop.permute.xlu0 %3616 }
0x21e4   :  { %5649 = vpow2.f32 %v3456_v10 }
0x21ee   :  { %v5650_v5 = vpop.eup %5649 }
0x21ef   :  { %v3458_v51 = vsel %vm644_vm10, %v5650_v5, 0.0 }
0x21f0   :  { %3459 = vadd.xlane.f32.xlu1 %v3458_v51 }
0x2201   :  { %3612 = vrot.lane.b32.xlu1 %v6738_v33, %s5738_s16 }
0x2205   :  { %3624 = vrot.lane.b32.xlu1 %v6871_v49, %s5728_s27  ;;  %s5739_s27 = smov 32  }
0x2266   :  { %v3609_v61 = vpop.xlane.xlu1 %3608 }
0x2267   :  { %5651 = vrcp.f32 %v3609_v61 }
0x2271   :  { %v5652_v30 = vpop.eup %5651 }
0x2272   :  { %v6964_v23 = vmul.f32 %v5652_v30, %v5648_v53 }
0x2274   :  { %v3619_v37 = vmul.f32 %v3617_v32, %v6964_v23 }
0x2276   :  { %3621 = vrot.lane.b32.xlu0 %v3619_v37, %s5708_s3 }
0x227d   :  { %v3460_v24 = vpop.xlane.xlu1 %3459 }
0x227e   :  { %5653 = vrcp.f32 %v3460_v24 }
0x2281   :  { %v3613_v26 = vpop.permute.xlu1 %3612 }
0x2285   :  { %v3625_v54 = vpop.permute.xlu1 %3624 }
0x2288   :  { %v5654_v47 = vpop.eup %5653 }
0x2289   :  { %v6968_v15 = vmul.f32 %v5654_v47, %v5650_v5 }
0x228b   :  { %v3615_v33 = vmul.f32 %v3613_v26, %v6968_v15 }
0x22e8   :  { %v3622_v14 = vpop.permute.xlu0 %3621 }
0x22e9   :  { %v3627_v12 = vsel %vm302_vm5, %v3615_v33, %v3622_v14 }
0x22ea   :  { %v3628_v58 = vsel %vm304_vm6, %v3627_v12, %v3625_v54  ;;  %vm4151_vm6 = vcmask 254976  }
0x22eb   :  { %4841 = vmatmul.mubr.msk.f32.vlgmr.msra.gmra.mrb[26].mxu1 %vm312_vm7, %v3628_v58 }
0x22ec   :  { %5157 = vmatpush3.bf16.msra.mxu1 %v6131_v52  ;;  %4862 = vmatprep.mubr.msk.f32.mxu1 %vm5706_vm0, %v7226_v46 }
0x22ed   :  { %5158 = vmatprep.subr.bf16.mxu1 %v7227_v56 }
0x22f0   :  { %5160 = vmatpush3.bf16.msra.mxu1 %v6141_v57 }
0x23be   :  { %v3698_v17 = vpop.f32.mrb[26].mxu1 }
0x23bf   :  { %v3699_v21 = vadd.f32 %v6868_v34, %v3698_v17  ;;  %v4842_v20 = vpop.f32.mrb[27].mxu1 }
0x23c1   :  { %5655 = vtanh.f32 %v3699_v21 }
0x23cb   :  { %v6980_v3 = vpop.eup %5655 }
0x23cc   :  { %4852 = vmatmul.mubr.msk.f32.vlgmr.msra.gmra.mrb[34].mxu0 %vm77_vm1, %v6980_v3 }
0x23cd   :  { %5163 = vmatpush3.bf16.msra.mxu0 %v6213_v29  ;;  %4877 = vmatprep.mubr.msk.f32.mxu0 %vm5706_vm0, %v7226_v46  ;;  %vm4181_vm0 = vcmask 48128  }
0x23ce   :  { %5164 = vmatprep.subr.bf16.mxu0 %v7227_v56 }
0x23d1   :  { %5166 = vmatpush3.bf16.msra.mxu0 %v6225_v44 }
0x23d2   :  { %5167 = vmatprep.subr.bf16.mxu0 %v7227_v56 }
0x23d5   :  { %5169 = vmatpush3.bf16.msra.mxu0 %v6238_v19 }
0x249f   :  { %v3772_v52 = vpop.f32.mrb[34].mxu0 }
0x24a0   :  { %v3773_v57 = vadd.f32 %v6886_v9, %v3772_v52  ;;  %v4853_v34 = vpop.f32.mrb[35].mxu0 }
0x24a2   :  { %3932 = vperm.xlu1 %5345, %v3773_v57   ;;  %3925 = vperm.xlu0 %5344, %v3773_v57  }
0x24a6   :  { %5346 = vset.pattern.permute.xlu1 %v7231_v8  ;;  %5347 = vset.pattern.permute.xlu0 %v7220_v55 }
0x24a7   :  { %3940 = vperm.xlu1 %5346, %v3773_v57   ;;  %3778 = vperm.xlu0 %5347, %v3773_v57  }
0x24ab   :  { %5348 = vset.pattern.permute.xlu1 %v7217_v0  ;;  %5350 = vset.pattern.permute.xlu0 %v7222_v22 }
0x24ac   :  { %3785 = vperm.xlu1 %5348, %v3773_v57   ;;  %3793 = vperm.xlu0 %5350, %v3773_v57  }
0x24b0   :  { %5349 = vset.pattern.permute.xlu1 %v7232_v40  ;;  %5353 = vset.pattern.permute.xlu0 %v7235_v28 }
0x24b1   :  { %3948 = vperm.xlu1 %5349, %v3773_v57   ;;  %3964 = vperm.xlu0 %5353, %v3773_v57  }
0x24b5   :  { %5351 = vset.pattern.permute.xlu1 %v7233_v48  ;;  %5356 = vset.pattern.permute.xlu0 %v7241_v16 }
0x24b6   :  { %3956 = vperm.xlu1 %5351, %v3773_v57   ;;  %3817 = vperm.xlu0 %5356, %v3773_v57  }
0x24ba   :  { %5352 = vset.pattern.permute.xlu1 %v7240_v43  ;;  %5359 = vset.pattern.permute.xlu0 %v7221_v41 }
0x24bb   :  { %3801 = vperm.xlu1 %5352, %v3773_v57   ;;  %3833 = vperm.xlu0 %5359, %v3773_v57  }
0x24bf   :  { %5354 = vset.pattern.permute.xlu1 %v7219_v60  ;;  %5360 = vset.pattern.permute.xlu0 %v7218_v35 }
0x24c0   :  { %3809 = vperm.xlu1 %5354, %v3773_v57  }
0x24c4   :  { %5355 = vset.pattern.permute.xlu1 %v7234_v2 }
0x24c5   :  { %3972 = vperm.xlu1 %5355, %v3773_v57  }
0x24c9   :  { %5357 = vset.pattern.permute.xlu1 %v7218_v35 }
0x24ca   :  { %3980 = vperm.xlu1 %5357, %v3773_v57  }
0x24ce   :  { %5358 = vset.pattern.permute.xlu1 %v7242_v62 }
0x24cf   :  { %3825 = vperm.xlu1 %5358, %v3773_v57   ;;  %v7265_v57 = vld [vmem:[#allocation9_spill] sm:$0xff] }
0x2521   :  { %v3933_v29 = vpop.permute.xlu1 %3932  ;;  %v3926_v19 = vpop.permute.xlu0 %3925 }
0x2522   :  { %v3935_v60 = vadd.f32 %v3933_v29, %v6199_v36  ;;  %v3928_v46 = vadd.f32 %v3926_v19, %v6199_v36 }
0x2524   :  { %5657 = vtanh.f32 %v3935_v60 }
0x2525   :  { %5659 = vtanh.f32 %v3928_v46  ;;  %v7266_v46 = vld [vmem:[#allocation10_spill] sm:$0xff] }
0x2526   :  { %v3941_v44 = vpop.permute.xlu1 %3940  ;;  %v3779_v41 = vpop.permute.xlu0 %3778 }
0x2527   :  { %v3943_v8 = vadd.f32 %v3941_v44, %v6199_v36  ;;  %v3781_v28 = vadd.f32 %v3779_v41, %v6180_v18 }
0x2529   :  { %5661 = vtanh.f32 %v3943_v8  ;;  %v7267_v8 = vld [vmem:[#allocation12_spill] sm:$0xff] }
0x252b   :  { %v3786_v0 = vpop.permute.xlu1 %3785  ;;  %v3794_v56 = vpop.permute.xlu0 %3793 }
0x252c   :  { %v3788_v48 = vadd.f32 %v3786_v0, %v6180_v18  ;;  %v3796_v16 = vadd.f32 %v3794_v56, %v6180_v18 }
0x252e   :  { %v5658_v13 = vpop.eup %5657 }
0x252f   :  { %v5660_v10 = vpop.eup %5659  ;;  %v3937_v30 = vmul.f32 %v5658_v13, %v7251_v4 }
0x2530   :  { %v3949_v55 = vpop.permute.xlu1 %3948  ;;  %v3965_v43 = vpop.permute.xlu0 %3964  ;;  %v3930_v32 = vmul.f32 %v5660_v10, %v7259_v59 }
0x2531   :  { %v3951_v35 = vadd.f32 %v3949_v55, %v6199_v36  ;;  %v3967_v9 = vadd.f32 %v3965_v43, %v6199_v36  ;;  %v7268_v43 = vld [vmem:[#allocation11_spill] sm:$0xff] }
0x2532   :  { %v3938_v17 = vadd.f32 %v3937_v30, %v3930_v32 }
0x2533   :  { %5663 = vtanh.f32 %v3951_v35  ;;  %v5662_v61 = vpop.eup %5661 }
0x2534   :  { %5665 = vtanh.f32 %v3788_v48  ;;  %v3945_v47 = vmul.f32 %v5662_v61, %v6243_v50 }
0x2535   :  { %v3957_v22 = vpop.permute.xlu1 %3956  ;;  %v3818_v42 = vpop.permute.xlu0 %3817 }
0x2536   :  { %v3959_v2 = vadd.f32 %v3957_v22, %v6199_v36  ;;  %v3820_v26 = vadd.f32 %v3818_v42, %v6180_v18  ;;  %v3946_v52 = vadd.f32 %v3945_v47, %v3938_v17 }
0x2538   :  { %5667 = vtanh.f32 %v3959_v2 }
0x2539   :  { %5669 = vtanh.f32 %v3781_v28 }
0x253a   :  { %v3802_v40 = vpop.permute.xlu1 %3801  ;;  %5671 = vtanh.f32 %v3796_v16  ;;  %v3834_v33 = vpop.permute.xlu0 %3833 }
0x253b   :  { %v3804_v53 = vadd.f32 %v3802_v40, %v6180_v18  ;;  %5673 = vtanh.f32 %v3967_v9  ;;  %v3836_v59 = vadd.f32 %v3834_v33, %v6180_v18 }
0x253d   :  { %5675 = vtanh.f32 %v3804_v53  ;;  %v5664_v37 = vpop.eup %5663 }
0x253e   :  { %v5666_v24 = vpop.eup %5665  ;;  %v3953_v21 = vmul.f32 %v5664_v37, %v6250_v39 }
0x253f   :  { %v3810_v62 = vpop.permute.xlu1 %3809  ;;  %v3790_v4 = vmul.f32 %v5666_v24, %v7263_v31 }
0x2540   :  { %v3812_v45 = vadd.f32 %v3810_v62, %v6180_v18 }
0x2542   :  { %5677 = vtanh.f32 %v3812_v45  ;;  %v5668_v54 = vpop.eup %5667 }
0x2543   :  { %v5670_v58 = vpop.eup %5669  ;;  %v3961_v50 = vmul.f32 %v5668_v54, %v7265_v57  ;;  %v7274_v57 = vld [vmem:[#allocation23_spill] sm:$0xff] }
0x2544   :  { %v3973_v5 = vpop.permute.xlu1 %3972  ;;  %v5672_v20 = vpop.eup %5671  ;;  %v3783_v29 = vmul.f32 %v5670_v58, %v7261_v27 }
0x2545   :  { %v3975_v51 = vadd.f32 %v3973_v5, %v6199_v36  ;;  %v5674_v34 = vpop.eup %5673  ;;  %v3798_v60 = vmul.f32 %v5672_v20, %v7264_v38  ;;  %v7272_v20 = vld [vmem:[#allocation27_spill] sm:$0xff] }
0x2546   :  { %v3791_v39 = vadd.f32 %v3790_v4, %v3783_v29  ;;  %v3969_v56 = vmul.f32 %v5674_v34, %v7266_v46  ;;  %v7270_v4 = vld [vmem:[#allocation18_spill] sm:$0xff]  ;;  %v7276_v34 = vld [vmem:[#allocation28_spill] sm:$0xff] }
0x2547   :  { %5679 = vtanh.f32 %v3975_v51  ;;  %v5676_v19 = vpop.eup %5675  ;;  %v7277_v29 = vld [vmem:[#allocation26_spill] sm:$0xff] }
0x2548   :  { %v3806_v22 = vmul.f32 %v5676_v19, %v6158_v63  ;;  %v3799_v27 = vadd.f32 %v3798_v60, %v3791_v39  ;;  %v7281_v19 = vld [vmem:[#allocation22_spill] sm:$0xff] }
0x2549   :  { %v3981_v14 = vpop.permute.xlu1 %3980 }
0x254a   :  { %v3983_v12 = vadd.f32 %v3981_v14, %v6199_v36  ;;  %v3954_v36 = vadd.f32 %v3953_v21, %v3946_v52  ;;  %v7269_v21 = vld [vmem:[#allocation15_spill] sm:$0xff]  ;;  %v7273_v52 = vld [vmem:[#allocation17_spill] sm:$0xff] }
0x254c   :  { %5681 = vtanh.f32 %v3983_v12  ;;  %v5678_v55 = vpop.eup %5677  ;;  %v3962_v41 = vadd.f32 %v3961_v50, %v3954_v36  ;;  %v7275_v50 = vld [vmem:[#allocation20_spill] sm:$0xff]  ;;  %v7282_v36 = vld [vmem:[#allocation7_spill] sm:$0xff] }
0x254d   :  { %5683 = vtanh.f32 %v3820_v26  ;;  %v3814_v40 = vmul.f32 %v5678_v55, %v6160_v1 }
0x254e   :  { %v3826_v44 = vpop.permute.xlu1 %3825  ;;  %5685 = vtanh.f32 %v3836_v59  ;;  %v3970_v48 = vadd.f32 %v3969_v56, %v3962_v41  ;;  %v7271_v59 = vld [vmem:[#allocation21_spill] sm:$0xff] }
0x254f   :  { %v3828_v0 = vadd.f32 %v3826_v44, %v6180_v18  ;;  %v3807_v18 = vadd.f32 %v3806_v22, %v3799_v27  ;;  %v7279_v44 = vld [vmem:[#allocation25_spill] sm:$0xff]  ;;  %v7284_v27 = vld [vmem:[#allocation24_spill] sm:$0xff] }
0x2551   :  { %v5680_v31 = vpop.eup %5679  ;;  %5687 = vtanh.f32 %v3828_v0  ;;  %v3815_v9 = vadd.f32 %v3814_v40, %v3807_v18 }
0x2552   :  { %v3977_v35 = vmul.f32 %v5680_v31, %v7267_v8  ;;  %v7283_v8 = vld [vmem:[#allocation3_spill] sm:$0xff] }
0x2554   :  { %v3978_v62 = vadd.f32 %v3977_v35, %v3970_v48 }
0x2556   :  { %v5682_v2 = vpop.eup %5681 }
0x2557   :  { %v5684_v28 = vpop.eup %5683  ;;  %v3985_v16 = vmul.f32 %v5682_v2, %v7268_v43 }
0x2558   :  { %v5686_v45 = vpop.eup %5685  ;;  %v3822_v38 = vmul.f32 %v5684_v28, %v6166_v7 }
0x2559   :  { %v3986_v53 = vadd.f32 %v3985_v16, %v3978_v62  ;;  %v3838_v1 = vmul.f32 %v5686_v45, %v6170_v11 }
0x255a   :  { %v3823_v42 = vadd.f32 %v3822_v38, %v3815_v9 }
0x255b   :  { %v5688_v63 = vpop.eup %5687  ;;  %4878 = vmatmul.mubr.msk.f32.vlgmr.msra.gmra.mrb[36].mxu0 %vm756_vm9, %v3986_v53  ;;  %vm4192_vm9 = vcmask 386048  }
0x255c   :  { %v3830_v13 = vmul.f32 %v5688_v63, %v6164_v6 }
0x255e   :  { %v3831_v10 = vadd.f32 %v3830_v13, %v3823_v42 }
0x2560   :  { %v3839_v5 = vadd.f32 %v3838_v1, %v3831_v10  ;;  %v7285_v10 = vld [vmem:[#allocation14_spill] sm:$0xff] }
0x2562   :  { %4863 = vmatmul.mubr.msk.f32.vlgmr.msra.gmra.mrb[28].mxu1 %vm77_vm1, %v3839_v5 }
0x262e   :  { %v4056_v51 = vpop.f32.mrb[36].mxu0 }
0x262f   :  { %v4060_v61 = vmul.f32 0.7, %v4056_v51  ;;  %v4879_v30 = vpop.f32.mrb[37].mxu0 }
0x2631   :  { %v4061_v32 = vadd.f32 %v4060_v61, %v6280_v25 }
0x2633   :  { %v4062_v37 = vsel %vm832_vm11, %v4061_v32, -inf }
0x2634   :  { %4063 = vmax.xlane.f32.xlu0 %v4062_v37  ;;  %v7286_v37 = vld [vmem:[#allocation13_spill] sm:$0xff] }
0x2635   :  { %v3909_v7 = vpop.f32.mrb[28].mxu1 }
0x2636   :  { %v4864_v24 = vpop.f32.mrb[29].mxu1  ;;  %v3913_v47 = vsel %vm644_vm10, %v3909_v7, -inf }
0x2637   :  { %3914 = vmax.xlane.f32.xlu1 %v3913_v47 }
0x26c1   :  { %v4064_v6 = vpop.xlane.xlu0 %4063 }
0x26c2   :  { %v4065_v26 = vsub.f32 %v4061_v32, %v4064_v6 }
0x26c4   :  { %v4066_v11 = vmul.f32 1.442695, %v4065_v26  ;;  %v3915_v33 = vpop.xlane.xlu1 %3914 }
0x26c5   :  { %v3916_v14 = vsub.f32 %v3909_v7, %v3915_v33 }
0x26c6   :  { %5689 = vpow2.f32 %v4066_v11 }
0x26c7   :  { %v3917_v54 = vmul.f32 1.442695, %v3916_v14 }
0x26c9   :  { %5691 = vpow2.f32 %v3917_v54 }
0x26d0   :  { %v5690_v12 = vpop.eup %5689 }
0x26d1   :  { %v4068_v58 = vsel %vm832_vm11, %v5690_v12, 0.0 }
0x26d2   :  { %4069 = vadd.xlane.f32.xlu0 %v4068_v58 }
0x26d3   :  { %v5692_v25 = vpop.eup %5691 }
0x26d4   :  { %v3919_v17 = vsel %vm644_vm10, %v5692_v25, 0.0 }
0x26d5   :  { %3920 = vadd.xlane.f32.xlu1 %v3919_v17 }
0x26e6   :  { %4073 = vrot.lane.b32.xlu1 %v7269_v21, %s5739_s27 }
0x26e8   :  { %4076 = vrot.lane.b32.xlu0 %v7270_v4, %s5740_s28 }
0x26ea   :  { %4079 = vrot.lane.b32.xlu1 %v7271_v59, %s5741_s29 }
0x26ec   :  { %4085 = vrot.lane.b32.xlu0 %v6871_v49, %s5740_s28  ;;  %v7278_v49 = vld [vmem:[#allocation19_spill] sm:$0xff] }
0x26ee   :  { %4082 = vrot.lane.b32.xlu1 %v7272_v20, %s5739_s27 }
0x26f0   :  { %4111 = vrot.lane.b32.xlu0 %v7273_v52, %s5708_s3  ;;  %s5747_s3 = smov 6  }
0x26f2   :  { %4088 = vrot.lane.b32.xlu1 %v6980_v3, %s5741_s29  ;;  %v7280_v3 = vld [vmem:[#allocation16_spill] sm:$0xff] }
0x26f4   :  { %4119 = vrot.lane.b32.xlu0 %v7274_v57, %s5742_s14 }
0x26f6   :  { %4115 = vrot.lane.b32.xlu1 %v7275_v50, %s5743_s12 }
0x26f8   :  { %4127 = vrot.lane.b32.xlu0 %v7276_v34, %s5744_s4 }
0x26fa   :  { %4123 = vrot.lane.b32.xlu1 %v7277_v29, %s5745_s1 }
0x26fc   :  { %4158 = vrot.lane.b32.xlu0 %v7278_v49, %s5742_s14 }
0x26fe   :  { %4131 = vrot.lane.b32.xlu1 %v6968_v15, %s5746_s7 }
0x2700   :  { %4166 = vrot.lane.b32.xlu0 %v7279_v44, %s5746_s7 }
0x2702   :  { %4154 = vrot.lane.b32.xlu1 %v7280_v3, %s5747_s3 }
0x2706   :  { %4162 = vrot.lane.b32.xlu1 %v7281_v19, %s5748_s2 }
0x270a   :  { %4170 = vrot.lane.b32.xlu1 %v7282_v36, %s5749_s30 }
0x275f   :  { %v4070_v0 = vpop.xlane.xlu0 %4069 }
0x2760   :  { %5693 = vrcp.f32 %v4070_v0 }
0x2762   :  { %v3921_v55 = vpop.xlane.xlu1 %3920 }
0x2763   :  { %5695 = vrcp.f32 %v3921_v55  ;;  %v4077_v60 = vpop.permute.xlu0 %4076 }
0x2766   :  { %v4074_v39 = vpop.permute.xlu1 %4073 }
0x2767   :  { %v4091_v35 = vsel %vm77_vm1, %v7283_v8, %v4074_v39  ;;  %v4086_v48 = vpop.permute.xlu0 %4085 }
0x2768   :  { %v4092_v2 = vsel %vm193_vm8, %v4091_v35, %v4077_v60 }
0x276a   :  { %v5694_v31 = vpop.eup %5693  ;;  %v4080_v41 = vpop.permute.xlu1 %4079 }
0x276b   :  { %v4072_v15 = vmul.f32 %v5694_v31, %v5690_v12  ;;  %v4094_v43 = vsel %vm4093_vm12, %v4092_v2, %v4080_v41  ;;  %v4112_v53 = vpop.permute.xlu0 %4111 }
0x276c   :  { %v4138_v5 = vsel %vm302_vm5, %v7285_v10, %v4112_v53  ;;  %vm4187_vm5 = vcmask 244736  }
0x276d   :  { %v5696_v22 = vpop.eup %5695  ;;  %4178 = vrot.lane.b32.xlu1 %v4072_v15, %s5750_s8 }
0x276e   :  { %v4083_v46 = vpop.permute.xlu1 %4082  ;;  %v3923_v56 = vmul.f32 %v5696_v22, %v5692_v25 }
0x276f   :  { %v4095_v40 = vsel %vm77_vm1, %v7284_v27, %v4083_v46  ;;  %v4120_v38 = vpop.permute.xlu0 %4119  ;;  %vm4145_vm1 = vcmask 162816  }
0x2770   :  { %4135 = vrot.lane.b32.xlu0 %v3923_v56, %s5751_s17  ;;  %v4096_v28 = vsel %vm193_vm8, %v4095_v40, %v4086_v48  ;;  %vm4189_vm8 = vcmask 293888  }
0x2772   :  { %v4089_v18 = vpop.permute.xlu1 %4088 }
0x2773   :  { %v4097_v16 = vsel %vm4093_vm12, %v4096_v28, %v4089_v18  ;;  %v4128_v13 = vpop.permute.xlu0 %4127 }
0x2774   :  { %v4100_v62 = vcombine.low %v4094_v43, %v4097_v16  ;;  %4174 = vrot.lane.b32.xlu0 %v6964_v23, %s5752_s6 }
0x2776   :  { %4255 = vst.sshfl [vmem:[%s7103_s19] sm:$0x33 pattern:$0x76325410] %v4100_v62  ;;  %v4116_v9 = vpop.permute.xlu1 %4115 }
0x2777   :  { %v4159_v1 = vpop.permute.xlu0 %4158  ;;  %v4140_v51 = vsel %vm4139_vm13, %v4138_v5, %v4116_v9 }
0x2778   :  { %v4142_v23 = vsel %vm4141_vm14, %v4140_v51, %v4120_v38 }
0x277a   :  { %v4124_v45 = vpop.permute.xlu1 %4123 }
0x277b   :  { %v4144_v30 = vsel %vm4143_vm15, %v4142_v23, %v4124_v45  ;;  %v4167_v32 = vpop.permute.xlu0 %4166 }
0x277c   :  { %v4146_v24 = vsel %vm4145_vm1, %v4144_v30, %v4128_v13 }
0x277e   :  { %v4132_v63 = vpop.permute.xlu1 %4131 }
0x277f   :  { %v4148_v6 = vsel %vm4147_vm2, %v4146_v24, %v4132_v63 }
0x2782   :  { %v4155_v42 = vpop.permute.xlu1 %4154 }
0x2783   :  { %v4182_v7 = vsel %vm4181_vm0, %v7286_v37, %v4155_v42 }
0x2784   :  { %v4183_v47 = vsel %vm4141_vm14, %v4182_v7, %v4159_v1 }
0x2786   :  { %v4163_v61 = vpop.permute.xlu1 %4162 }
0x2787   :  { %v4185_v26 = vsel %vm4184_vm3, %v4183_v47, %v4163_v61 }
0x2788   :  { %v4186_v54 = vsel %vm4147_vm2, %v4185_v26, %v4167_v32 }
0x278a   :  { %v4171_v33 = vpop.permute.xlu1 %4170 }
0x278b   :  { %v4188_v12 = vsel %vm4187_vm5, %v4186_v54, %v4171_v33 }
0x27df   :  { %v4179_v25 = vpop.permute.xlu1 %4178 }
0x27e2   :  { %v4136_v11 = vpop.permute.xlu0 %4135 }
0x27e3   :  { %v4150_v14 = vsel %vm4149_vm4, %v4148_v6, %v4136_v11 }
0x27e4   :  { %4152 = vst.msk [vmem:[%s7104_s20] sm:$0x3] %vm4151_vm6, %v4150_v14 }
0x27e6   :  { %v4175_v58 = vpop.permute.xlu0 %4174 }
0x27e7   :  { %v4190_v17 = vsel %vm4189_vm8, %v4188_v12, %v4175_v58 }
0x27e8   :  { %v4191_v21 = vsel %vm312_vm7, %v4190_v17, %v4179_v25 }
0x27e9   :  { %4193 = vst.msk [vmem:[%s7105_s21] sm:$0x3] %vm4192_vm9, %v4191_v21 }

</bundles_post_ra>
